<compile_context>
chip_gen: v7x
topology: tpu7x:2x2x1
jax: 0.10.0
libtpu: 0.0.40
codegen_flags: <defaults>
</compile_context>

<pallas_src>
import numpy as np
import jax
import jax.numpy as jnp
from jax import lax
from jax.experimental import pallas as pl
from jax.experimental.pallas import tpu as pltpu

# ---------------- small, lane-dense config ----------------
VOCAB = 30            # vocabSize
EMBED = 128           # embedSize
HID = 128             # rnnHiddenSize (== nhid == imgEmbedSize, required by module's views)
NHID = 128            # attention hidden size ("self.nhid")
NUM_LAYERS = 2
IMG_FEAT = 128        # imgFeatureSize
IMG_EMBED = 128       # imgEmbedSize
B = 2                 # batch
P = 8                 # number of image proposals (ppsNum)


def _vmem_spec():
    return pl.BlockSpec(memory_space=pltpu.MemorySpace.VMEM)


# =======================================================================
# Kernel 1: 2-layer LSTM encoder over a padded sequence (dynamicRNN).
# Single launch; time loop lives inside the kernel.  Layer-0 input
# projections are hoisted into one wide matmul before the loop; per-step
# state updates are gated by sequence length with jnp.where so the result
# equals pack_padded / right-aligned dynamicRNN final states.
# =======================================================================
def _lstm_kernel(x_ref, len_ref,
                 wih0_ref, whh0_ref, b0_ref,
                 wih1_ref, whh1_ref, b1_ref,
                 h_ref, c_ref, xg0_ref):
    T, Bb, E = x_ref.shape
    H = whh0_ref.shape[0]

    # Hoisted layer-0 input projection: one (T*B, E) @ (E, 4H) matmul.
    x_flat = x_ref[...].reshape(T * Bb, E)
    xg0_ref[...] = (jnp.dot(x_flat, wih0_ref[...], preferred_element_type=jnp.float32)
                    + b0_ref[...]).reshape(T, Bb, 4 * H)

    lens = len_ref[...]                      # (B, 1) int32, loaded once
    whh0 = whh0_ref[...]
    wih1 = wih1_ref[...]
    whh1 = whh1_ref[...]
    b1 = b1_ref[...]

    def gates(g, c):
        i = jax.nn.sigmoid(g[:, 0 * H:1 * H])
        f = jax.nn.sigmoid(g[:, 1 * H:2 * H])
        gg = jnp.tanh(g[:, 2 * H:3 * H])
        o = jax.nn.sigmoid(g[:, 3 * H:4 * H])
        c_new = f * c + i * gg
        h_new = o * jnp.tanh(c_new)
        return h_new, c_new

    def step(t, carry):
        h0, c0, h1, c1 = carry
        g0 = xg0_ref[t] + jnp.dot(h0, whh0, preferred_element_type=jnp.float32)
        h0n, c0n = gates(g0, c0)
        g1 = (jnp.dot(h0n, wih1, preferred_element_type=jnp.float32)
              + jnp.dot(h1, whh1, preferred_element_type=jnp.float32) + b1)
        h1n, c1n = gates(g1, c1)
        upd = t < lens                       # (B, 1) -> single vselect per state tensor
        return (jnp.where(upd, h0n, h0), jnp.where(upd, c0n, c0),
                jnp.where(upd, h1n, h1), jnp.where(upd, c1n, c1))

    z = jnp.zeros((Bb, H), jnp.float32)
    h0, c0, h1, c1 = lax.fori_loop(0, T, step, (z, z, z, z), unroll=True)

    h_ref[0] = h0
    h_ref[1] = h1
    c_ref[0] = c0
    c_ref[1] = c1


def lstm_encode(x_tbe, lengths, params):
    """x_tbe: (T, B, E) time-major; lengths: (B, 1) int32.  Returns (h_n, c_n): (L, B, H)."""
    T, Bb, E = x_tbe.shape
    wih0, whh0, b0, wih1, whh1, b1 = params
    H = HID
    flops = 2 * T * Bb * (E * 4 * H + 3 * H * 4 * H) + 16 * T * Bb * H
    transc = 10 * T * Bb * H
    nbytes = 4 * (T * Bb * E + (E + 3 * H) * 4 * H + 2 * 4 * H
                  + 2 * NUM_LAYERS * Bb * H + Bb)
    h, c = pl.pallas_call(
        _lstm_kernel,
        out_shape=(jax.ShapeDtypeStruct((NUM_LAYERS, Bb, H), jnp.float32),
                   jax.ShapeDtypeStruct((NUM_LAYERS, Bb, H), jnp.float32)),
        in_specs=[_vmem_spec() for _ in range(8)],
        out_specs=(_vmem_spec(), _vmem_spec()),
        scratch_shapes=[pltpu.VMEM((T, Bb, 4 * H), jnp.float32)],
        cost_estimate=pl.CostEstimate(flops=flops, transcendentals=transc,
                                      bytes_accessed=nbytes),
    )(x_tbe, lengths, wih0, whh0, b0, wih1, whh1, b1)
    return h, c


# =======================================================================
# Kernel 2: fused imgNet embedding + concatDialogRNNInput
#   (two-stage attention + fc1) in a single launch.
# =======================================================================
def _att_kernel(ques_ref, his_ref, image_ref,
                wimg_ref, bimg_ref,
                wq12_ref, bq12_ref, wh1_ref, bh1_ref, wa1_ref, ba1_ref,
                wh2_ref, bh2_ref, wi2_ref, bi2_ref, wa2_ref, ba2_ref,
                wfc_ref, bfc_ref,
                attw_ref, enc_ref, imge_ref):
    Bb, R, H = his_ref.shape
    Pp = image_ref.shape[1]
    F = image_ref.shape[2]

    image = image_ref[...]                                    # (B, P, F)

    # ---- imageEmbed = tanh(imgNet(dropout(image))), dropout = identity ----
    imge_flat = jnp.tanh(
        jnp.dot(image.reshape(Bb * Pp, F), wimg_ref[...],
                preferred_element_type=jnp.float32) + bimg_ref[...])       # (B*P, IE)
    imge = imge_flat.reshape(Bb, Pp, IMG_EMBED)
    imge_ref[...] = imge

    ques = ques_ref[...]                                      # (B, H)
    his = his_ref[...]                                        # (B, R, H)

    # ---- fused Wq_1 / Wq_2 projection of the question feature ----
    qe = jnp.dot(ques, wq12_ref[...], preferred_element_type=jnp.float32) + bq12_ref[...]
    qe1 = qe[:, :NHID]
    qe2 = qe[:, NHID:]

    # ---- stage 1: attention over dialog history (facts) ----
    he1 = (jnp.dot(his.reshape(Bb * R, H), wh1_ref[...],
                   preferred_element_type=jnp.float32) + bh1_ref[...]).reshape(Bb, R, NHID)
    att1 = jnp.tanh(he1 + qe1[:, None, :])
    logit1 = jnp.sum(att1 * wa1_ref[...][None], axis=-1) + ba1_ref[...]     # (B, R)
    w1 = jax.nn.softmax(logit1, axis=-1)
    his_attn = jnp.sum(w1[:, :, None] * his, axis=1)                        # (B, H)

    # ---- stage 2: attention over image proposals ----
    he2 = jnp.dot(his_attn, wh2_ref[...], preferred_element_type=jnp.float32) + bh2_ref[...]
    ie2 = (jnp.dot(imge_flat, wi2_ref[...],
                   preferred_element_type=jnp.float32) + bi2_ref[...]).reshape(Bb, Pp, NHID)
    att2 = jnp.tanh(ie2 + qe2[:, None, :] + he2[:, None, :])
    logit2 = jnp.sum(att2 * wa2_ref[...][None], axis=-1) + ba2_ref[...]     # (B, P)
    # masked_fill_(image.abs().sum(2) == 0, -inf); -1e30 equivalent under softmax
    empty = jnp.sum(jnp.abs(image), axis=-1) == 0.0                         # (B, P)
    logit2 = jnp.where(empty, -1e30, logit2)
    w2 = jax.nn.softmax(logit2, axis=-1)
    img_attn = jnp.sum(w2[:, :, None] * imge, axis=1)                       # (B, IE)

    # ---- fc1 on concat(ques, his_attn, img_attn): split row-wise, no lane concat ----
    enc = jnp.tanh(
        jnp.dot(ques, wfc_ref[0:NHID, :], preferred_element_type=jnp.float32)
        + jnp.dot(his_attn, wfc_ref[NHID:2 * NHID, :], preferred_element_type=jnp.float32)
        + jnp.dot(img_attn, wfc_ref[2 * NHID:3 * NHID, :], preferred_element_type=jnp.float32)
        + bfc_ref[...])

    attw_ref[...] = w2
    enc_ref[...] = enc


def attention(ques_feat, his_feat, image, p):
    Bb, R, H = his_feat.shape
    Pp, F = image.shape[1], image.shape[2]
    flops = 2 * (Bb * Pp * F * IMG_EMBED
                 + Bb * H * 2 * NHID
                 + Bb * R * H * NHID
                 + Bb * H * NHID
                 + Bb * Pp * IMG_EMBED * NHID
                 + 3 * Bb * NHID * EMBED)
    transc = Bb * (Pp * IMG_EMBED + R * NHID + Pp * NHID + EMBED + R + Pp)
    nbytes = 4 * (Bb * H + Bb * R * H + Bb * Pp * F
                  + F * IMG_EMBED + H * 2 * NHID + 2 * H * NHID + IMG_EMBED * NHID
                  + 2 * NHID + 3 * NHID * EMBED
                  + Bb * Pp + Bb * EMBED + Bb * Pp * IMG_EMBED)
    attw, enc, imge = pl.pallas_call(
        _att_kernel,
        out_shape=(jax.ShapeDtypeStruct((Bb, Pp), jnp.float32),
                   jax.ShapeDtypeStruct((Bb, EMBED), jnp.float32),
                   jax.ShapeDtypeStruct((Bb, Pp, IMG_EMBED), jnp.float32)),
        in_specs=[_vmem_spec() for _ in range(19)],
        out_specs=(_vmem_spec(), _vmem_spec(), _vmem_spec()),
        cost_estimate=pl.CostEstimate(flops=flops, transcendentals=transc,
                                      bytes_accessed=nbytes),
    )(ques_feat, his_feat, image,
      p['imgnet_w'], p['imgnet_b'],
      p['Wq_12'], p['bq_12'], p['Wh_1'], p['bh_1'], p['Wa_1'], p['ba_1'],
      p['Wh_2'], p['bh_2'], p['Wi_2'], p['bi_2'], p['Wa_2'], p['ba_2'],
      p['fc1_w'], p['fc1_b'])
    return attw, enc, imge


# =======================================================================
# Parameter construction (deterministic, mimics module __init__ shapes)
# =======================================================================
def kaiming_uniform_t(key, in_f, out_f):
    bound = float(np.sqrt(6.0 / in_f))
    return jax.random.uniform(key, (in_f, out_f), jnp.float32, -bound, bound)


def lstm_layer_params(key, in_f, hid):
    k1, k2, k3, k4 = jax.random.split(key, 4)
    s = 1.0 / float(np.sqrt(hid))
    wih = jax.random.uniform(k1, (in_f, 4 * hid), jnp.float32, -s, s)   # (in, 4H) pre-transposed
    whh = jax.random.uniform(k2, (hid, 4 * hid), jnp.float32, -s, s)
    bih = jax.random.uniform(k3, (4 * hid,), jnp.float32, -s, s)
    bhh = jax.random.uniform(k4, (4 * hid,), jnp.float32, -s, s)
    return wih, whh, (bih + bhh).reshape(1, 4 * hid)


def build_params(key):
    ks = jax.random.split(key, 20)
    p = {}
    # word embedding (padding_idx = 0)
    emb = jax.random.normal(ks[0], (VOCAB, EMBED), jnp.float32) * 0.1
    p['word_emb'] = emb.at[0].set(0.0)
    # imgNet
    p['imgnet_w'] = kaiming_uniform_t(ks[1], IMG_FEAT, IMG_EMBED)
    p['imgnet_b'] = jnp.zeros((1, IMG_EMBED), jnp.float32)
    # attention linears (biases initialised to 0, as in the module)
    wq1 = kaiming_uniform_t(ks[2], HID, NHID)
    wq2 = kaiming_uniform_t(ks[5], HID, NHID)
    p['Wh_1'] = kaiming_uniform_t(ks[3], HID, NHID); p['bh_1'] = jnp.zeros((1, NHID), jnp.float32)
    p['Wa_1'] = jax.random.uniform(ks[4], (1, NHID), jnp.float32,
                                   -float(np.sqrt(6.0 / NHID)), float(np.sqrt(6.0 / NHID)))
    p['ba_1'] = jnp.zeros((1, 1), jnp.float32)
    p['Wh_2'] = kaiming_uniform_t(ks[6], NHID, NHID); p['bh_2'] = jnp.zeros((1, NHID), jnp.float32)
    p['Wi_2'] = kaiming_uniform_t(ks[7], IMG_EMBED, NHID); p['bi_2'] = jnp.zeros((1, NHID), jnp.float32)
    p['Wa_2'] = jax.random.uniform(ks[8], (1, NHID), jnp.float32,
                                   -float(np.sqrt(6.0 / NHID)), float(np.sqrt(6.0 / NHID)))
    p['ba_2'] = jnp.zeros((1, 1), jnp.float32)
    p['fc1_w'] = kaiming_uniform_t(ks[9], 3 * NHID, EMBED)
    p['fc1_b'] = jnp.zeros((1, EMBED), jnp.float32)
    # fused Wq_1 | Wq_2 (one MXU push on the shared ques_feat input)
    p['Wq_12'] = jnp.concatenate([wq1, wq2], axis=1)
    p['bq_12'] = jnp.zeros((1, 2 * NHID), jnp.float32)
    # LSTMs (2 layers each)
    p['factRNN'] = lstm_layer_params(ks[10], EMBED, HID) + lstm_layer_params(ks[11], HID, HID)
    p['quesRNN'] = lstm_layer_params(ks[12], EMBED, HID) + lstm_layer_params(ks[13], HID, HID)
    return p


# =======================================================================
# Host-side glue mirroring observe()/processSequence()/concatPaddedSequences()
# =======================================================================
def make_seq(key, raw_lens, max_raw_len):
    toks = np.zeros((B, max_raw_len), dtype=np.int32)
    vals = np.asarray(jax.random.randint(key, (B, max_raw_len), 2, VOCAB))
    for b in range(B):
        toks[b, 0] = 1  # <START>
        toks[b, 1:raw_lens[b]] = vals[b, 1:raw_lens[b]]
    return toks, np.asarray(raw_lens, dtype=np.int32)


def process_sequence(seq, lens):
    return seq[:, 1:], lens - 1


def concat_padded(q, qlens, a, alens):
    total = qlens + alens
    out = np.zeros((B, int(total.max())), dtype=np.int32)
    for b in range(B):
        out[b, :qlens[b]] = q[b, :qlens[b]]
        out[b, qlens[b]:qlens[b] + alens[b]] = a[b, :alens[b]]
    return out, total


# TODO(synk): nn.Embedding lookup is a data-dependent gather; kept in plain JAX glue.
def word_embed(table, tokens):
    return table[jnp.asarray(tokens)]


def encoder_forward(params, image, cap_tok, cap_len, qa_facts, ques_tok, ques_len):
    """Returns (img_atten_weight, imageEmbed, encoder_feat, (H_link, C_link))."""
    # ---- embedFact: all R independent factRNN sequences batched into ONE launch ----
    seqs = [(cap_tok, cap_len)] + list(qa_facts)
    R = len(seqs)
    Tf = max(int(s.shape[1]) for s, _ in seqs)
    toks = np.zeros((R * B, Tf), dtype=np.int32)
    lens = np.zeros((R * B, 1), dtype=np.int32)
    for i, (s, l) in enumerate(seqs):
        toks[i * B:(i + 1) * B, :s.shape[1]] = s
        lens[i * B:(i + 1) * B, 0] = l
    fact_emb = word_embed(params['word_emb'], toks)                      # (R*B, Tf, E)
    h_f, _c_f = lstm_encode(jnp.transpose(fact_emb, (1, 0, 2)),
                            jnp.asarray(lens), params['factRNN'])
    fact_feat = h_f[-1]                                                   # (R*B, H)
    his_feat = jnp.stack([fact_feat[i * B:(i + 1) * B] for i in range(R)], axis=1)  # (B, R, H)

    # ---- embedQuestion(round): current question through quesRNN ----
    # TODO(synk): on v7x the fact batch and the question RNN could run on separate
    # TensorCores (pl.core_map); kept as two sequential launches for portability.
    q_emb = word_embed(params['word_emb'], ques_tok)
    h_q, c_q = lstm_encode(jnp.transpose(q_emb, (1, 0, 2)),
                           jnp.asarray(ques_len, dtype=np.int32).reshape(B, 1),
                           params['quesRNN'])
    ques_feat = h_q[-1]                                                   # (B, H)

    # ---- fused embedInputDialog(imgNet) + concatDialogRNNInput(round) ----
    img_atten_weight, encoder_feat, image_embed = attention(ques_feat, his_feat, image, params)

    # isAnswerer: H_link/C_link come from the question RNN states
    H_link, C_link = h_q, c_q
    return img_atten_weight, image_embed, encoder_feat, (H_link, C_link)


# =======================================================================
if __name__ == "__main__":
    key = jax.random.PRNGKey(0)
    k_img, k_cap, k_q0, k_a0, k_q1, k_par = jax.random.split(key, 6)

    params = build_params(k_par)

    # image features (B, P, IMG_FEAT); last proposal is all-zero to exercise the mask
    image = jax.random.normal(k_img, (B, P, IMG_FEAT), jnp.float32)
    image = image.at[:, -1, :].set(0.0)

    # observe(-1, caption), observe(0, q0), observe(0, a0), observe(1, q1)  -> round = 1
    cap_raw, cap_raw_len = make_seq(k_cap, [10, 8], 10)
    q0_raw, q0_raw_len = make_seq(k_q0, [6, 5], 6)
    a0_raw, a0_raw_len = make_seq(k_a0, [5, 4], 5)
    q1_raw, q1_raw_len = make_seq(k_q1, [7, 6], 7)

    cap_tok, cap_len = process_sequence(cap_raw, cap_raw_len)
    q0_tok, q0_len = process_sequence(q0_raw, q0_raw_len)
    a0_tok, a0_len = process_sequence(a0_raw, a0_raw_len)
    q1_tok, q1_len = process_sequence(q1_raw, q1_raw_len)
    qa0_tok, qa0_len = concat_padded(q0_tok, q0_len, a0_tok, a0_len)

    outs = encoder_forward(params, image, cap_tok, cap_len,
                           [(qa0_tok, qa0_len)], q1_tok, q1_len)
    img_atten_weight, image_embed, encoder_feat, (H_link, C_link) = outs
    jax.block_until_ready((img_atten_weight, image_embed, encoder_feat, H_link, C_link))

    # sanity checks
    w = np.asarray(img_atten_weight)
    assert w.shape == (B, P)
    assert np.allclose(w.sum(axis=-1), 1.0, atol=1e-4), "attention weights must sum to 1"
    assert np.all(w[:, -1] < 1e-6), "masked (zero) proposal must get ~0 attention"
    assert np.asarray(image_embed).shape == (B, P, IMG_EMBED)
    assert np.asarray(encoder_feat).shape == (B, EMBED)
    assert np.asarray(H_link).shape == (NUM_LAYERS, B, HID)
    assert np.asarray(C_link).shape == (NUM_LAYERS, B, HID)
    assert all(np.isfinite(np.asarray(x)).all()
               for x in (w, image_embed, encoder_feat, H_link, C_link))

    print("KERNEL_OK")
</pallas_src>

<mosaic_0001>
module attributes {stable_mosaic.version = 11 : i64} {
  func.func @_lstm_kernel(%arg0: memref<9x4x128xf32, #tpu.memory_space<vmem>>, %arg1: memref<4x1xi32, #tpu.memory_space<vmem>>, %arg2: memref<128x512xf32, #tpu.memory_space<vmem>>, %arg3: memref<128x512xf32, #tpu.memory_space<vmem>>, %arg4: memref<1x512xf32, #tpu.memory_space<vmem>>, %arg5: memref<128x512xf32, #tpu.memory_space<vmem>>, %arg6: memref<128x512xf32, #tpu.memory_space<vmem>>, %arg7: memref<1x512xf32, #tpu.memory_space<vmem>>, %arg8: memref<2x4x128xf32, #tpu.memory_space<vmem>>, %arg9: memref<2x4x128xf32, #tpu.memory_space<vmem>>, %arg10: memref<9x4x512xf32, #tpu.memory_space<vmem>>) attributes {dimension_semantics = [], scalar_prefetch = 0 : i64, scratch_operands = 1 : i64, tpu.core_type = #tpu.core_type<tc>} {
    %c0 = arith.constant 0 : index
    %c0_0 = arith.constant 0 : index
    %c0_1 = arith.constant 0 : index
    %0 = vector.load %arg0[%c0, %c0_0, %c0_1] : memref<9x4x128xf32, #tpu.memory_space<vmem>>, vector<9x4x128xf32>
    %1 = vector.shape_cast %0 : vector<9x4x128xf32> to vector<36x128xf32>
    %c0_2 = arith.constant 0 : index
    %c0_3 = arith.constant 0 : index
    %2 = vector.load %arg2[%c0_2, %c0_3] : memref<128x512xf32, #tpu.memory_space<vmem>>, vector<128x512xf32>
    %cst = arith.constant dense<0.000000e+00> : vector<36x512xf32>
    %3 = tpu.matmul %1, %2, %cst {dimension_numbers = #tpu.dot_dimension_numbers<[1], [0], [0], [1], [0, 0, 1, 1], [], []>} : vector<36x128xf32>, vector<128x512xf32>, vector<36x512xf32> -> vector<36x512xf32>
    %c0_4 = arith.constant 0 : index
    %c0_5 = arith.constant 0 : index
    %4 = vector.load %arg4[%c0_4, %c0_5] : memref<1x512xf32, #tpu.memory_space<vmem>>, vector<1x512xf32>
    %5 = vector.broadcast %4 : vector<1x512xf32> to vector<36x512xf32>
    %6 = arith.addf %3, %5 : vector<36x512xf32>
    %7 = vector.shape_cast %6 : vector<36x512xf32> to vector<9x4x512xf32>
    %c0_6 = arith.constant 0 : index
    %c0_7 = arith.constant 0 : index
    %c0_8 = arith.constant 0 : index
    %8 = vector.load %arg10[%c0_6, %c0_7, %c0_8] : memref<9x4x512xf32, #tpu.memory_space<vmem>>, vector<9x4x512xf32>
    tpu.vector_store %arg10[%c0_6, %c0_7, %c0_8], %7 {strides = array<i32>} : memref<9x4x512xf32, #tpu.memory_space<vmem>>, vector<9x4x512xf32>,
    %c0_9 = arith.constant 0 : index
    %c0_10 = arith.constant 0 : index
    %9 = vector.load %arg1[%c0_9, %c0_10] : memref<4x1xi32, #tpu.memory_space<vmem>>, vector<4x1xi32>
    %c0_11 = arith.constant 0 : index
    %c0_12 = arith.constant 0 : index
    %10 = vector.load %arg3[%c0_11, %c0_12] : memref<128x512xf32, #tpu.memory_space<vmem>>, vector<128x512xf32>
    %c0_13 = arith.constant 0 : index
    %c0_14 = arith.constant 0 : index
    %11 = vector.load %arg5[%c0_13, %c0_14] : memref<128x512xf32, #tpu.memory_space<vmem>>, vector<128x512xf32>
    %c0_15 = arith.constant 0 : index
    %c0_16 = arith.constant 0 : index
    %12 = vector.load %arg6[%c0_15, %c0_16] : memref<128x512xf32, #tpu.memory_space<vmem>>, vector<128x512xf32>
    %c0_17 = arith.constant 0 : index
    %c0_18 = arith.constant 0 : index
    %13 = vector.load %arg7[%c0_17, %c0_18] : memref<1x512xf32, #tpu.memory_space<vmem>>, vector<1x512xf32>
    %cst_19 = arith.constant 0.000000e+00 : f32
    %14 = vector.broadcast %cst_19 : f32 to vector<4x128xf32>
    %c0_i32 = arith.constant 0 : i32
    %15 = arith.index_cast %c0_i32 : i32 to index
    %c0_20 = arith.constant 0 : index
    %c0_21 = arith.constant 0 : index
    %16 = vector.load %arg10[%15, %c0_20, %c0_21] : memref<9x4x512xf32, #tpu.memory_space<vmem>>, vector<1x4x512xf32>
    %17 = vector.shape_cast %16 : vector<1x4x512xf32> to vector<4x512xf32>
    %cst_22 = arith.constant dense<0.000000e+00> : vector<4x512xf32>
    %18 = tpu.matmul %14, %10, %cst_22 {dimension_numbers = #tpu.dot_dimension_numbers<[1], [0], [0], [1], [0, 0, 1, 1], [], []>} : vector<4x128xf32>, vector<128x512xf32>, vector<4x512xf32> -> vector<4x512xf32>
    %19 = arith.addf %17, %18 : vector<4x512xf32>
    %20 = vector.extract_strided_slice %19 {offsets = [0, 0], sizes = [4, 128], strides = [1, 1]} : vector<4x512xf32> to vector<4x128xf32>
    %21 = arith.negf %20 : vector<4x128xf32>
    %22 = math.exp %21 : vector<4x128xf32>
    %cst_23 = arith.constant 1.000000e+00 : f32
    %23 = vector.broadcast %cst_23 : f32 to vector<4x128xf32>
    %24 = arith.addf %23, %22 : vector<4x128xf32>
    %25 = arith.divf %23, %24 : vector<4x128xf32>
    %26 = vector.extract_strided_slice %19 {offsets = [0, 128], sizes = [4, 128], strides = [1, 1]} : vector<4x512xf32> to vector<4x128xf32>
    %27 = arith.negf %26 : vector<4x128xf32>
    %28 = math.exp %27 : vector<4x128xf32>
    %cst_24 = arith.constant 1.000000e+00 : f32
    %29 = vector.broadcast %cst_24 : f32 to vector<4x128xf32>
    %30 = arith.addf %29, %28 : vector<4x128xf32>
    %31 = arith.divf %29, %30 : vector<4x128xf32>
    %32 = vector.extract_strided_slice %19 {offsets = [0, 256], sizes = [4, 128], strides = [1, 1]} : vector<4x512xf32> to vector<4x128xf32>
    %33 = math.tanh %32 : vector<4x128xf32>
    %34 = vector.extract_strided_slice %19 {offsets = [0, 384], sizes = [4, 128], strides = [1, 1]} : vector<4x512xf32> to vector<4x128xf32>
    %35 = arith.negf %34 : vector<4x128xf32>
    %36 = math.exp %35 : vector<4x128xf32>
    %cst_25 = arith.constant 1.000000e+00 : f32
    %37 = vector.broadcast %cst_25 : f32 to vector<4x128xf32>
    %38 = arith.addf %37, %36 : vector<4x128xf32>
    %39 = arith.divf %37, %38 : vector<4x128xf32>
    %40 = arith.mulf %31, %14 : vector<4x128xf32>
    %41 = arith.mulf %25, %33 : vector<4x128xf32>
    %42 = arith.addf %40, %41 : vector<4x128xf32>
    %43 = math.tanh %42 : vector<4x128xf32>
    %44 = arith.mulf %39, %43 : vector<4x128xf32>
    %cst_26 = arith.constant dense<0.000000e+00> : vector<4x512xf32>
    %45 = tpu.matmul %44, %11, %cst_26 {dimension_numbers = #tpu.dot_dimension_numbers<[1], [0], [0], [1], [0, 0, 1, 1], [], []>} : vector<4x128xf32>, vector<128x512xf32>, vector<4x512xf32> -> vector<4x512xf32>
    %cst_27 = arith.constant dense<0.000000e+00> : vector<4x512xf32>
    %46 = tpu.matmul %14, %12, %cst_27 {dimension_numbers = #tpu.dot_dimension_numbers<[1], [0], [0], [1], [0, 0, 1, 1], [], []>} : vector<4x128xf32>, vector<128x512xf32>, vector<4x512xf32> -> vector<4x512xf32>
    %47 = arith.addf %45, %46 : vector<4x512xf32>
    %48 = vector.broadcast %13 : vector<1x512xf32> to vector<4x512xf32>
    %49 = arith.addf %47, %48 : vector<4x512xf32>
    %50 = vector.extract_strided_slice %49 {offsets = [0, 0], sizes = [4, 128], strides = [1, 1]} : vector<4x512xf32> to vector<4x128xf32>
    %51 = arith.negf %50 : vector<4x128xf32>
    %52 = math.exp %51 : vector<4x128xf32>
    %cst_28 = arith.constant 1.000000e+00 : f32
    %53 = vector.broadcast %cst_28 : f32 to vector<4x128xf32>
    %54 = arith.addf %53, %52 : vector<4x128xf32>
    %55 = arith.divf %53, %54 : vector<4x128xf32>
    %56 = vector.extract_strided_slice %49 {offsets = [0, 128], sizes = [4, 128], strides = [1, 1]} : vector<4x512xf32> to vector<4x128xf32>
    %57 = arith.negf %56 : vector<4x128xf32>
    %58 = math.exp %57 : vector<4x128xf32>
    %cst_29 = arith.constant 1.000000e+00 : f32
    %59 = vector.broadcast %cst_29 : f32 to vector<4x128xf32>
    %60 = arith.addf %59, %58 : vector<4x128xf32>
    %61 = arith.divf %59, %60 : vector<4x128xf32>
    %62 = vector.extract_strided_slice %49 {offsets = [0, 256], sizes = [4, 128], strides = [1, 1]} : vector<4x512xf32> to vector<4x128xf32>
    %63 = math.tanh %62 : vector<4x128xf32>
    %64 = vector.extract_strided_slice %49 {offsets = [0, 384], sizes = [4, 128], strides = [1, 1]} : vector<4x512xf32> to vector<4x128xf32>
    %65 = arith.negf %64 : vector<4x128xf32>
    %66 = math.exp %65 : vector<4x128xf32>
    %cst_30 = arith.constant 1.000000e+00 : f32
    %67 = vector.broadcast %cst_30 : f32 to vector<4x128xf32>
    %68 = arith.addf %67, %66 : vector<4x128xf32>
    %69 = arith.divf %67, %68 : vector<4x128xf32>
    %70 = arith.mulf %61, %14 : vector<4x128xf32>
    %71 = arith.mulf %55, %63 : vector<4x128xf32>
    %72 = arith.addf %70, %71 : vector<4x128xf32>
    %73 = math.tanh %72 : vector<4x128xf32>
    %74 = arith.mulf %69, %73 : vector<4x128xf32>
    %75 = vector.broadcast %c0_i32 : i32 to vector<4x1xi32>
    %76 = arith.cmpi slt, %75, %9 : vector<4x1xi32>
    %77 = vector.shape_cast %76 : vector<4x1xi1> to vector<4x1xi1>
    %78 = vector.broadcast %77 : vector<4x1xi1> to vector<4x128xi1>
    %79 = arith.select %78, %44, %14 : vector<4x128xi1>, vector<4x128xf32>
    %80 = vector.shape_cast %76 : vector<4x1xi1> to vector<4x1xi1>
    %81 = vector.broadcast %80 : vector<4x1xi1> to vector<4x128xi1>
    %82 = arith.select %81, %42, %14 : vector<4x128xi1>, vector<4x128xf32>
    %83 = vector.shape_cast %76 : vector<4x1xi1> to vector<4x1xi1>
    %84 = vector.broadcast %83 : vector<4x1xi1> to vector<4x128xi1>
    %85 = arith.select %84, %74, %14 : vector<4x128xi1>, vector<4x128xf32>
    %86 = vector.shape_cast %76 : vector<4x1xi1> to vector<4x1xi1>
    %87 = vector.broadcast %86 : vector<4x1xi1> to vector<4x128xi1>
    %88 = arith.select %87, %72, %14 : vector<4x128xi1>, vector<4x128xf32>
    %c1_i32 = arith.constant 1 : i32
    %89 = arith.index_cast %c1_i32 : i32 to index
    %c0_31 = arith.constant 0 : index
    %c0_32 = arith.constant 0 : index
    %90 = vector.load %arg10[%89, %c0_31, %c0_32] : memref<9x4x512xf32, #tpu.memory_space<vmem>>, vector<1x4x512xf32>
    %91 = vector.shape_cast %90 : vector<1x4x512xf32> to vector<4x512xf32>
    %cst_33 = arith.constant dense<0.000000e+00> : vector<4x512xf32>
    %92 = tpu.matmul %79, %10, %cst_33 {dimension_numbers = #tpu.dot_dimension_numbers<[1], [0], [0], [1], [0, 0, 1, 1], [], []>} : vector<4x128xf32>, vector<128x512xf32>, vector<4x512xf32> -> vector<4x512xf32>
    %93 = arith.addf %91, %92 : vector<4x512xf32>
    %94 = vector.extract_strided_slice %93 {offsets = [0, 0], sizes = [4, 128], strides = [1, 1]} : vector<4x512xf32> to vector<4x128xf32>
    %95 = arith.negf %94 : vector<4x128xf32>
    %96 = math.exp %95 : vector<4x128xf32>
    %cst_34 = arith.constant 1.000000e+00 : f32
    %97 = vector.broadcast %cst_34 : f32 to vector<4x128xf32>
    %98 = arith.addf %97, %96 : vector<4x128xf32>
    %99 = arith.divf %97, %98 : vector<4x128xf32>
    %100 = vector.extract_strided_slice %93 {offsets = [0, 128], sizes = [4, 128], strides = [1, 1]} : vector<4x512xf32> to vector<4x128xf32>
    %101 = arith.negf %100 : vector<4x128xf32>
    %102 = math.exp %101 : vector<4x128xf32>
    %cst_35 = arith.constant 1.000000e+00 : f32
    %103 = vector.broadcast %cst_35 : f32 to vector<4x128xf32>
    %104 = arith.addf %103, %102 : vector<4x128xf32>
    %105 = arith.divf %103, %104 : vector<4x128xf32>
    %106 = vector.extract_strided_slice %93 {offsets = [0, 256], sizes = [4, 128], strides = [1, 1]} : vector<4x512xf32> to vector<4x128xf32>
    %107 = math.tanh %106 : vector<4x128xf32>
    %108 = vector.extract_strided_slice %93 {offsets = [0, 384], sizes = [4, 128], strides = [1, 1]} : vector<4x512xf32> to vector<4x128xf32>
    %109 = arith.negf %108 : vector<4x128xf32>
    %110 = math.exp %109 : vector<4x128xf32>
    %cst_36 = arith.constant 1.000000e+00 : f32
    %111 = vector.broadcast %cst_36 : f32 to vector<4x128xf32>
    %112 = arith.addf %111, %110 : vector<4x128xf32>
    %113 = arith.divf %111, %112 : vector<4x128xf32>
    %114 = arith.mulf %105, %82 : vector<4x128xf32>
    %115 = arith.mulf %99, %107 : vector<4x128xf32>
    %116 = arith.addf %114, %115 : vector<4x128xf32>
    %117 = math.tanh %116 : vector<4x128xf32>
    %118 = arith.mulf %113, %117 : vector<4x128xf32>
    %cst_37 = arith.constant dense<0.000000e+00> : vector<4x512xf32>
    %119 = tpu.matmul %118, %11, %cst_37 {dimension_numbers = #tpu.dot_dimension_numbers<[1], [0], [0], [1], [0, 0, 1, 1], [], []>} : vector<4x128xf32>, vector<128x512xf32>, vector<4x512xf32> -> vector<4x512xf32>
    %cst_38 = arith.constant dense<0.000000e+00> : vector<4x512xf32>
    %120 = tpu.matmul %85, %12, %cst_38 {dimension_numbers = #tpu.dot_dimension_numbers<[1], [0], [0], [1], [0, 0, 1, 1], [], []>} : vector<4x128xf32>, vector<128x512xf32>, vector<4x512xf32> -> vector<4x512xf32>
    %121 = arith.addf %119, %120 : vector<4x512xf32>
    %122 = vector.broadcast %13 : vector<1x512xf32> to vector<4x512xf32>
    %123 = arith.addf %121, %122 : vector<4x512xf32>
    %124 = vector.extract_strided_slice %123 {offsets = [0, 0], sizes = [4, 128], strides = [1, 1]} : vector<4x512xf32> to vector<4x128xf32>
    %125 = arith.negf %124 : vector<4x128xf32>
    %126 = math.exp %125 : vector<4x128xf32>
    %cst_39 = arith.constant 1.000000e+00 : f32
    %127 = vector.broadcast %cst_39 : f32 to vector<4x128xf32>
    %128 = arith.addf %127, %126 : vector<4x128xf32>
    %129 = arith.divf %127, %128 : vector<4x128xf32>
    %130 = vector.extract_strided_slice %123 {offsets = [0, 128], sizes = [4, 128], strides = [1, 1]} : vector<4x512xf32> to vector<4x128xf32>
    %131 = arith.negf %130 : vector<4x128xf32>
    %132 = math.exp %131 : vector<4x128xf32>
    %cst_40 = arith.constant 1.000000e+00 : f32
    %133 = vector.broadcast %cst_40 : f32 to vector<4x128xf32>
    %134 = arith.addf %133, %132 : vector<4x128xf32>
    %135 = arith.divf %133, %134 : vector<4x128xf32>
    %136 = vector.extract_strided_slice %123 {offsets = [0, 256], sizes = [4, 128], strides = [1, 1]} : vector<4x512xf32> to vector<4x128xf32>
    %137 = math.tanh %136 : vector<4x128xf32>
    %138 = vector.extract_strided_slice %123 {offsets = [0, 384], sizes = [4, 128], strides = [1, 1]} : vector<4x512xf32> to vector<4x128xf32>
    %139 = arith.negf %138 : vector<4x128xf32>
    %140 = math.exp %139 : vector<4x128xf32>
    %cst_41 = arith.constant 1.000000e+00 : f32
    %141 = vector.broadcast %cst_41 : f32 to vector<4x128xf32>
    %142 = arith.addf %141, %140 : vector<4x128xf32>
    %143 = arith.divf %141, %142 : vector<4x128xf32>
    %144 = arith.mulf %135, %88 : vector<4x128xf32>
    %145 = arith.mulf %129, %137 : vector<4x128xf32>
    %146 = arith.addf %144, %145 : vector<4x128xf32>
    %147 = math.tanh %146 : vector<4x128xf32>
    %148 = arith.mulf %143, %147 : vector<4x128xf32>
    %149 = vector.broadcast %c1_i32 : i32 to vector<4x1xi32>
    %150 = arith.cmpi slt, %149, %9 : vector<4x1xi32>
    %151 = vector.shape_cast %150 : vector<4x1xi1> to vector<4x1xi1>
    %152 = vector.broadcast %151 : vector<4x1xi1> to vector<4x128xi1>
    %153 = arith.select %152, %118, %79 : vector<4x128xi1>, vector<4x128xf32>
    %154 = vector.shape_cast %150 : vector<4x1xi1> to vector<4x1xi1>
    %155 = vector.broadcast %154 : vector<4x1xi1> to vector<4x128xi1>
    %156 = arith.select %155, %116, %82 : vector<4x128xi1>, vector<4x128xf32>
    %157 = vector.shape_cast %150 : vector<4x1xi1> to vector<4x1xi1>
    %158 = vector.broadcast %157 : vector<4x1xi1> to vector<4x128xi1>
    %159 = arith.select %158, %148, %85 : vector<4x128xi1>, vector<4x128xf32>
    %160 = vector.shape_cast %150 : vector<4x1xi1> to vector<4x1xi1>
    %161 = vector.broadcast %160 : vector<4x1xi1> to vector<4x128xi1>
    %162 = arith.select %161, %146, %88 : vector<4x128xi1>, vector<4x128xf32>
    %c2_i32 = arith.constant 2 : i32
    %163 = arith.index_cast %c2_i32 : i32 to index
    %c0_42 = arith.constant 0 : index
    %c0_43 = arith.constant 0 : index
    %164 = vector.load %arg10[%163, %c0_42, %c0_43] : memref<9x4x512xf32, #tpu.memory_space<vmem>>, vector<1x4x512xf32>
    %165 = vector.shape_cast %164 : vector<1x4x512xf32> to vector<4x512xf32>
    %cst_44 = arith.constant dense<0.000000e+00> : vector<4x512xf32>
    %166 = tpu.matmul %153, %10, %cst_44 {dimension_numbers = #tpu.dot_dimension_numbers<[1], [0], [0], [1], [0, 0, 1, 1], [], []>} : vector<4x128xf32>, vector<128x512xf32>, vector<4x512xf32> -> vector<4x512xf32>
    %167 = arith.addf %165, %166 : vector<4x512xf32>
    %168 = vector.extract_strided_slice %167 {offsets = [0, 0], sizes = [4, 128], strides = [1, 1]} : vector<4x512xf32> to vector<4x128xf32>
    %169 = arith.negf %168 : vector<4x128xf32>
    %170 = math.exp %169 : vector<4x128xf32>
    %cst_45 = arith.constant 1.000000e+00 : f32
    %171 = vector.broadcast %cst_45 : f32 to vector<4x128xf32>
    %172 = arith.addf %171, %170 : vector<4x128xf32>
    %173 = arith.divf %171, %172 : vector<4x128xf32>
    %174 = vector.extract_strided_slice %167 {offsets = [0, 128], sizes = [4, 128], strides = [1, 1]} : vector<4x512xf32> to vector<4x128xf32>
    %175 = arith.negf %174 : vector<4x128xf32>
    %176 = math.exp %175 : vector<4x128xf32>
    %cst_46 = arith.constant 1.000000e+00 : f32
    %177 = vector.broadcast %cst_46 : f32 to vector<4x128xf32>
    %178 = arith.addf %177, %176 : vector<4x128xf32>
    %179 = arith.divf %177, %178 : vector<4x128xf32>
    %180 = vector.extract_strided_slice %167 {offsets = [0, 256], sizes = [4, 128], strides = [1, 1]} : vector<4x512xf32> to vector<4x128xf32>
    %181 = math.tanh %180 : vector<4x128xf32>
    %182 = vector.extract_strided_slice %167 {offsets = [0, 384], sizes = [4, 128], strides = [1, 1]} : vector<4x512xf32> to vector<4x128xf32>
    %183 = arith.negf %182 : vector<4x128xf32>
    %184 = math.exp %183 : vector<4x128xf32>
    %cst_47 = arith.constant 1.000000e+00 : f32
    %185 = vector.broadcast %cst_47 : f32 to vector<4x128xf32>
    %186 = arith.addf %185, %184 : vector<4x128xf32>
    %187 = arith.divf %185, %186 : vector<4x128xf32>
    %188 = arith.mulf %179, %156 : vector<4x128xf32>
    %189 = arith.mulf %173, %181 : vector<4x128xf32>
    %190 = arith.addf %188, %189 : vector<4x128xf32>
    %191 = math.tanh %190 : vector<4x128xf32>
    %192 = arith.mulf %187, %191 : vector<4x128xf32>
    %cst_48 = arith.constant dense<0.000000e+00> : vector<4x512xf32>
    %193 = tpu.matmul %192, %11, %cst_48 {dimension_numbers = #tpu.dot_dimension_numbers<[1], [0], [0], [1], [0, 0, 1, 1], [], []>} : vector<4x128xf32>, vector<128x512xf32>, vector<4x512xf32> -> vector<4x512xf32>
    %cst_49 = arith.constant dense<0.000000e+00> : vector<4x512xf32>
    %194 = tpu.matmul %159, %12, %cst_49 {dimension_numbers = #tpu.dot_dimension_numbers<[1], [0], [0], [1], [0, 0, 1, 1], [], []>} : vector<4x128xf32>, vector<128x512xf32>, vector<4x512xf32> -> vector<4x512xf32>
    %195 = arith.addf %193, %194 : vector<4x512xf32>
    %196 = vector.broadcast %13 : vector<1x512xf32> to vector<4x512xf32>
    %197 = arith.addf %195, %196 : vector<4x512xf32>
    %198 = vector.extract_strided_slice %197 {offsets = [0, 0], sizes = [4, 128], strides = [1, 1]} : vector<4x512xf32> to vector<4x128xf32>
    %199 = arith.negf %198 : vector<4x128xf32>
    %200 = math.exp %199 : vector<4x128xf32>
    %cst_50 = arith.constant 1.000000e+00 : f32
    %201 = vector.broadcast %cst_50 : f32 to vector<4x128xf32>
    %202 = arith.addf %201, %200 : vector<4x128xf32>
    %203 = arith.divf %201, %202 : vector<4x128xf32>
    %204 = vector.extract_strided_slice %197 {offsets = [0, 128], sizes = [4, 128], strides = [1, 1]} : vector<4x512xf32> to vector<4x128xf32>
    %205 = arith.negf %204 : vector<4x128xf32>
    %206 = math.exp %205 : vector<4x128xf32>
    %cst_51 = arith.constant 1.000000e+00 : f32
    %207 = vector.broadcast %cst_51 : f32 to vector<4x128xf32>
    %208 = arith.addf %207, %206 : vector<4x128xf32>
    %209 = arith.divf %207, %208 : vector<4x128xf32>
    %210 = vector.extract_strided_slice %197 {offsets = [0, 256], sizes = [4, 128], strides = [1, 1]} : vector<4x512xf32> to vector<4x128xf32>
    %211 = math.tanh %210 : vector<4x128xf32>
    %212 = vector.extract_strided_slice %197 {offsets = [0, 384], sizes = [4, 128], strides = [1, 1]} : vector<4x512xf32> to vector<4x128xf32>
    %213 = arith.negf %212 : vector<4x128xf32>
    %214 = math.exp %213 : vector<4x128xf32>
    %cst_52 = arith.constant 1.000000e+00 : f32
    %215 = vector.broadcast %cst_52 : f32 to vector<4x128xf32>
    %216 = arith.addf %215, %214 : vector<4x128xf32>
    %217 = arith.divf %215, %216 : vector<4x128xf32>
    %218 = arith.mulf %209, %162 : vector<4x128xf32>
    %219 = arith.mulf %203, %211 : vector<4x128xf32>
    %220 = arith.addf %218, %219 : vector<4x128xf32>
    %221 = math.tanh %220 : vector<4x128xf32>
    %222 = arith.mulf %217, %221 : vector<4x128xf32>
    %223 = vector.broadcast %c2_i32 : i32 to vector<4x1xi32>
    %224 = arith.cmpi slt, %223, %9 : vector<4x1xi32>
    %225 = vector.shape_cast %224 : vector<4x1xi1> to vector<4x1xi1>
    %226 = vector.broadcast %225 : vector<4x1xi1> to vector<4x128xi1>
    %227 = arith.select %226, %192, %153 : vector<4x128xi1>, vector<4x128xf32>
    %228 = vector.shape_cast %224 : vector<4x1xi1> to vector<4x1xi1>
    %229 = vector.broadcast %228 : vector<4x1xi1> to vector<4x128xi1>
    %230 = arith.select %229, %190, %156 : vector<4x128xi1>, vector<4x128xf32>
    %231 = vector.shape_cast %224 : vector<4x1xi1> to vector<4x1xi1>
    %232 = vector.broadcast %231 : vector<4x1xi1> to vector<4x128xi1>
    %233 = arith.select %232, %222, %159 : vector<4x128xi1>, vector<4x128xf32>
    %234 = vector.shape_cast %224 : vector<4x1xi1> to vector<4x1xi1>
    %235 = vector.broadcast %234 : vector<4x1xi1> to vector<4x128xi1>
    %236 = arith.select %235, %220, %162 : vector<4x128xi1>, vector<4x128xf32>
    %c3_i32 = arith.constant 3 : i32
    %237 = arith.index_cast %c3_i32 : i32 to index
    %c0_53 = arith.constant 0 : index
    %c0_54 = arith.constant 0 : index
    %238 = vector.load %arg10[%237, %c0_53, %c0_54] : memref<9x4x512xf32, #tpu.memory_space<vmem>>, vector<1x4x512xf32>
    %239 = vector.shape_cast %238 : vector<1x4x512xf32> to vector<4x512xf32>
    %cst_55 = arith.constant dense<0.000000e+00> : vector<4x512xf32>
    %240 = tpu.matmul %227, %10, %cst_55 {dimension_numbers = #tpu.dot_dimension_numbers<[1], [0], [0], [1], [0, 0, 1, 1], [], []>} : vector<4x128xf32>, vector<128x512xf32>, vector<4x512xf32> -> vector<4x512xf32>
    %241 = arith.addf %239, %240 : vector<4x512xf32>
    %242 = vector.extract_strided_slice %241 {offsets = [0, 0], sizes = [4, 128], strides = [1, 1]} : vector<4x512xf32> to vector<4x128xf32>
    %243 = arith.negf %242 : vector<4x128xf32>
    %244 = math.exp %243 : vector<4x128xf32>
    %cst_56 = arith.constant 1.000000e+00 : f32
    %245 = vector.broadcast %cst_56 : f32 to vector<4x128xf32>
    %246 = arith.addf %245, %244 : vector<4x128xf32>
    %247 = arith.divf %245, %246 : vector<4x128xf32>
    %248 = vector.extract_strided_slice %241 {offsets = [0, 128], sizes = [4, 128], strides = [1, 1]} : vector<4x512xf32> to vector<4x128xf32>
    %249 = arith.negf %248 : vector<4x128xf32>
    %250 = math.exp %249 : vector<4x128xf32>
    %cst_57 = arith.constant 1.000000e+00 : f32
    %251 = vector.broadcast %cst_57 : f32 to vector<4x128xf32>
    %252 = arith.addf %251, %250 : vector<4x128xf32>
    %253 = arith.divf %251, %252 : vector<4x128xf32>
    %254 = vector.extract_strided_slice %241 {offsets = [0, 256], sizes = [4, 128], strides = [1, 1]} : vector<4x512xf32> to vector<4x128xf32>
    %255 = math.tanh %254 : vector<4x128xf32>
    %256 = vector.extract_strided_slice %241 {offsets = [0, 384], sizes = [4, 128], strides = [1, 1]} : vector<4x512xf32> to vector<4x128xf32>
    %257 = arith.negf %256 : vector<4x128xf32>
    %258 = math.exp %257 : vector<4x128xf32>
    %cst_58 = arith.constant 1.000000e+00 : f32
    %259 = vector.broadcast %cst_58 : f32 to vector<4x128xf32>
    %260 = arith.addf %259, %258 : vector<4x128xf32>
    %261 = arith.divf %259, %260 : vector<4x128xf32>
    %262 = arith.mulf %253, %230 : vector<4x128xf32>
    %263 = arith.mulf %247, %255 : vector<4x128xf32>
    %264 = arith.addf %262, %263 : vector<4x128xf32>
    %265 = math.tanh %264 : vector<4x128xf32>
    %266 = arith.mulf %261, %265 : vector<4x128xf32>
    %cst_59 = arith.constant dense<0.000000e+00> : vector<4x512xf32>
    %267 = tpu.matmul %266, %11, %cst_59 {dimension_numbers = #tpu.dot_dimension_numbers<[1], [0], [0], [1], [0, 0, 1, 1], [], []>} : vector<4x128xf32>, vector<128x512xf32>, vector<4x512xf32> -> vector<4x512xf32>
    %cst_60 = arith.constant dense<0.000000e+00> : vector<4x512xf32>
    %268 = tpu.matmul %233, %12, %cst_60 {dimension_numbers = #tpu.dot_dimension_numbers<[1], [0], [0], [1], [0, 0, 1, 1], [], []>} : vector<4x128xf32>, vector<128x512xf32>, vector<4x512xf32> -> vector<4x512xf32>
    %269 = arith.addf %267, %268 : vector<4x512xf32>
    %270 = vector.broadcast %13 : vector<1x512xf32> to vector<4x512xf32>
    %271 = arith.addf %269, %270 : vector<4x512xf32>
    %272 = vector.extract_strided_slice %271 {offsets = [0, 0], sizes = [4, 128], strides = [1, 1]} : vector<4x512xf32> to vector<4x128xf32>
    %273 = arith.negf %272 : vector<4x128xf32>
    %274 = math.exp %273 : vector<4x128xf32>
    %cst_61 = arith.constant 1.000000e+00 : f32
    %275 = vector.broadcast %cst_61 : f32 to vector<4x128xf32>
    %276 = arith.addf %275, %274 : vector<4x128xf32>
    %277 = arith.divf %275, %276 : vector<4x128xf32>
    %278 = vector.extract_strided_slice %271 {offsets = [0, 128], sizes = [4, 128], strides = [1, 1]} : vector<4x512xf32> to vector<4x128xf32>
    %279 = arith.negf %278 : vector<4x128xf32>
    %280 = math.exp %279 : vector<4x128xf32>
    %cst_62 = arith.constant 1.000000e+00 : f32
    %281 = vector.broadcast %cst_62 : f32 to vector<4x128xf32>
    %282 = arith.addf %281, %280 : vector<4x128xf32>
    %283 = arith.divf %281, %282 : vector<4x128xf32>
    %284 = vector.extract_strided_slice %271 {offsets = [0, 256], sizes = [4, 128], strides = [1, 1]} : vector<4x512xf32> to vector<4x128xf32>
    %285 = math.tanh %284 : vector<4x128xf32>
    %286 = vector.extract_strided_slice %271 {offsets = [0, 384], sizes = [4, 128], strides = [1, 1]} : vector<4x512xf32> to vector<4x128xf32>
    %287 = arith.negf %286 : vector<4x128xf32>
    %288 = math.exp %287 : vector<4x128xf32>
    %cst_63 = arith.constant 1.000000e+00 : f32
    %289 = vector.broadcast %cst_63 : f32 to vector<4x128xf32>
    %290 = arith.addf %289, %288 : vector<4x128xf32>
    %291 = arith.divf %289, %290 : vector<4x128xf32>
    %292 = arith.mulf %283, %236 : vector<4x128xf32>
    %293 = arith.mulf %277, %285 : vector<4x128xf32>
    %294 = arith.addf %292, %293 : vector<4x128xf32>
    %295 = math.tanh %294 : vector<4x128xf32>
    %296 = arith.mulf %291, %295 : vector<4x128xf32>
    %297 = vector.broadcast %c3_i32 : i32 to vector<4x1xi32>
    %298 = arith.cmpi slt, %297, %9 : vector<4x1xi32>
    %299 = vector.shape_cast %298 : vector<4x1xi1> to vector<4x1xi1>
    %300 = vector.broadcast %299 : vector<4x1xi1> to vector<4x128xi1>
    %301 = arith.select %300, %266, %227 : vector<4x128xi1>, vector<4x128xf32>
    %302 = vector.shape_cast %298 : vector<4x1xi1> to vector<4x1xi1>
    %303 = vector.broadcast %302 : vector<4x1xi1> to vector<4x128xi1>
    %304 = arith.select %303, %264, %230 : vector<4x128xi1>, vector<4x128xf32>
    %305 = vector.shape_cast %298 : vector<4x1xi1> to vector<4x1xi1>
    %306 = vector.broadcast %305 : vector<4x1xi1> to vector<4x128xi1>
    %307 = arith.select %306, %296, %233 : vector<4x128xi1>, vector<4x128xf32>
    %308 = vector.shape_cast %298 : vector<4x1xi1> to vector<4x1xi1>
    %309 = vector.broadcast %308 : vector<4x1xi1> to vector<4x128xi1>
    %310 = arith.select %309, %294, %236 : vector<4x128xi1>, vector<4x128xf32>
    %c4_i32 = arith.constant 4 : i32
    %311 = arith.index_cast %c4_i32 : i32 to index
    %c0_64 = arith.constant 0 : index
    %c0_65 = arith.constant 0 : index
    %312 = vector.load %arg10[%311, %c0_64, %c0_65] : memref<9x4x512xf32, #tpu.memory_space<vmem>>, vector<1x4x512xf32>
    %313 = vector.shape_cast %312 : vector<1x4x512xf32> to vector<4x512xf32>
    %cst_66 = arith.constant dense<0.000000e+00> : vector<4x512xf32>
    %314 = tpu.matmul %301, %10, %cst_66 {dimension_numbers = #tpu.dot_dimension_numbers<[1], [0], [0], [1], [0, 0, 1, 1], [], []>} : vector<4x128xf32>, vector<128x512xf32>, vector<4x512xf32> -> vector<4x512xf32>
    %315 = arith.addf %313, %314 : vector<4x512xf32>
    %316 = vector.extract_strided_slice %315 {offsets = [0, 0], sizes = [4, 128], strides = [1, 1]} : vector<4x512xf32> to vector<4x128xf32>
    %317 = arith.negf %316 : vector<4x128xf32>
    %318 = math.exp %317 : vector<4x128xf32>
    %cst_67 = arith.constant 1.000000e+00 : f32
    %319 = vector.broadcast %cst_67 : f32 to vector<4x128xf32>
    %320 = arith.addf %319, %318 : vector<4x128xf32>
    %321 = arith.divf %319, %320 : vector<4x128xf32>
    %322 = vector.extract_strided_slice %315 {offsets = [0, 128], sizes = [4, 128], strides = [1, 1]} : vector<4x512xf32> to vector<4x128xf32>
    %323 = arith.negf %322 : vector<4x128xf32>
    %324 = math.exp %323 : vector<4x128xf32>
    %cst_68 = arith.constant 1.000000e+00 : f32
    %325 = vector.broadcast %cst_68 : f32 to vector<4x128xf32>
    %326 = arith.addf %325, %324 : vector<4x128xf32>
    %327 = arith.divf %325, %326 : vector<4x128xf32>
    %328 = vector.extract_strided_slice %315 {offsets = [0, 256], sizes = [4, 128], strides = [1, 1]} : vector<4x512xf32> to vector<4x128xf32>
    %329 = math.tanh %328 : vector<4x128xf32>
    %330 = vector.extract_strided_slice %315 {offsets = [0, 384], sizes = [4, 128], strides = [1, 1]} : vector<4x512xf32> to vector<4x128xf32>
    %331 = arith.negf %330 : vector<4x128xf32>
    %332 = math.exp %331 : vector<4x128xf32>
    %cst_69 = arith.constant 1.000000e+00 : f32
    %333 = vector.broadcast %cst_69 : f32 to vector<4x128xf32>
    %334 = arith.addf %333, %332 : vector<4x128xf32>
    %335 = arith.divf %333, %334 : vector<4x128xf32>
    %336 = arith.mulf %327, %304 : vector<4x128xf32>
    %337 = arith.mulf %321, %329 : vector<4x128xf32>
    %338 = arith.addf %336, %337 : vector<4x128xf32>
    %339 = math.tanh %338 : vector<4x128xf32>
    %340 = arith.mulf %335, %339 : vector<4x128xf32>
    %cst_70 = arith.constant dense<0.000000e+00> : vector<4x512xf32>
    %341 = tpu.matmul %340, %11, %cst_70 {dimension_numbers = #tpu.dot_dimension_numbers<[1], [0], [0], [1], [0, 0, 1, 1], [], []>} : vector<4x128xf32>, vector<128x512xf32>, vector<4x512xf32> -> vector<4x512xf32>
    %cst_71 = arith.constant dense<0.000000e+00> : vector<4x512xf32>
    %342 = tpu.matmul %307, %12, %cst_71 {dimension_numbers = #tpu.dot_dimension_numbers<[1], [0], [0], [1], [0, 0, 1, 1], [], []>} : vector<4x128xf32>, vector<128x512xf32>, vector<4x512xf32> -> vector<4x512xf32>
    %343 = arith.addf %341, %342 : vector<4x512xf32>
    %344 = vector.broadcast %13 : vector<1x512xf32> to vector<4x512xf32>
    %345 = arith.addf %343, %344 : vector<4x512xf32>
    %346 = vector.extract_strided_slice %345 {offsets = [0, 0], sizes = [4, 128], strides = [1, 1]} : vector<4x512xf32> to vector<4x128xf32>
    %347 = arith.negf %346 : vector<4x128xf32>
    %348 = math.exp %347 : vector<4x128xf32>
    %cst_72 = arith.constant 1.000000e+00 : f32
    %349 = vector.broadcast %cst_72 : f32 to vector<4x128xf32>
    %350 = arith.addf %349, %348 : vector<4x128xf32>
    %351 = arith.divf %349, %350 : vector<4x128xf32>
    %352 = vector.extract_strided_slice %345 {offsets = [0, 128], sizes = [4, 128], strides = [1, 1]} : vector<4x512xf32> to vector<4x128xf32>
    %353 = arith.negf %352 : vector<4x128xf32>
    %354 = math.exp %353 : vector<4x128xf32>
    %cst_73 = arith.constant 1.000000e+00 : f32
    %355 = vector.broadcast %cst_73 : f32 to vector<4x128xf32>
    %356 = arith.addf %355, %354 : vector<4x128xf32>
    %357 = arith.divf %355, %356 : vector<4x128xf32>
    %358 = vector.extract_strided_slice %345 {offsets = [0, 256], sizes = [4, 128], strides = [1, 1]} : vector<4x512xf32> to vector<4x128xf32>
    %359 = math.tanh %358 : vector<4x128xf32>
    %360 = vector.extract_strided_slice %345 {offsets = [0, 384], sizes = [4, 128], strides = [1, 1]} : vector<4x512xf32> to vector<4x128xf32>
    %361 = arith.negf %360 : vector<4x128xf32>
    %362 = math.exp %361 : vector<4x128xf32>
    %cst_74 = arith.constant 1.000000e+00 : f32
    %363 = vector.broadcast %cst_74 : f32 to vector<4x128xf32>
    %364 = arith.addf %363, %362 : vector<4x128xf32>
    %365 = arith.divf %363, %364 : vector<4x128xf32>
    %366 = arith.mulf %357, %310 : vector<4x128xf32>
    %367 = arith.mulf %351, %359 : vector<4x128xf32>
    %368 = arith.addf %366, %367 : vector<4x128xf32>
    %369 = math.tanh %368 : vector<4x128xf32>
    %370 = arith.mulf %365, %369 : vector<4x128xf32>
    %371 = vector.broadcast %c4_i32 : i32 to vector<4x1xi32>
    %372 = arith.cmpi slt, %371, %9 : vector<4x1xi32>
    %373 = vector.shape_cast %372 : vector<4x1xi1> to vector<4x1xi1>
    %374 = vector.broadcast %373 : vector<4x1xi1> to vector<4x128xi1>
    %375 = arith.select %374, %340, %301 : vector<4x128xi1>, vector<4x128xf32>
    %376 = vector.shape_cast %372 : vector<4x1xi1> to vector<4x1xi1>
    %377 = vector.broadcast %376 : vector<4x1xi1> to vector<4x128xi1>
    %378 = arith.select %377, %338, %304 : vector<4x128xi1>, vector<4x128xf32>
    %379 = vector.shape_cast %372 : vector<4x1xi1> to vector<4x1xi1>
    %380 = vector.broadcast %379 : vector<4x1xi1> to vector<4x128xi1>
    %381 = arith.select %380, %370, %307 : vector<4x128xi1>, vector<4x128xf32>
    %382 = vector.shape_cast %372 : vector<4x1xi1> to vector<4x1xi1>
    %383 = vector.broadcast %382 : vector<4x1xi1> to vector<4x128xi1>
    %384 = arith.select %383, %368, %310 : vector<4x128xi1>, vector<4x128xf32>
    %c5_i32 = arith.constant 5 : i32
    %385 = arith.index_cast %c5_i32 : i32 to index
    %c0_75 = arith.constant 0 : index
    %c0_76 = arith.constant 0 : index
    %386 = vector.load %arg10[%385, %c0_75, %c0_76] : memref<9x4x512xf32, #tpu.memory_space<vmem>>, vector<1x4x512xf32>
    %387 = vector.shape_cast %386 : vector<1x4x512xf32> to vector<4x512xf32>
    %cst_77 = arith.constant dense<0.000000e+00> : vector<4x512xf32>
    %388 = tpu.matmul %375, %10, %cst_77 {dimension_numbers = #tpu.dot_dimension_numbers<[1], [0], [0], [1], [0, 0, 1, 1], [], []>} : vector<4x128xf32>, vector<128x512xf32>, vector<4x512xf32> -> vector<4x512xf32>
    %389 = arith.addf %387, %388 : vector<4x512xf32>
    %390 = vector.extract_strided_slice %389 {offsets = [0, 0], sizes = [4, 128], strides = [1, 1]} : vector<4x512xf32> to vector<4x128xf32>
    %391 = arith.negf %390 : vector<4x128xf32>
    %392 = math.exp %391 : vector<4x128xf32>
    %cst_78 = arith.constant 1.000000e+00 : f32
    %393 = vector.broadcast %cst_78 : f32 to vector<4x128xf32>
    %394 = arith.addf %393, %392 : vector<4x128xf32>
    %395 = arith.divf %393, %394 : vector<4x128xf32>
    %396 = vector.extract_strided_slice %389 {offsets = [0, 128], sizes = [4, 128], strides = [1, 1]} : vector<4x512xf32> to vector<4x128xf32>
    %397 = arith.negf %396 : vector<4x128xf32>
    %398 = math.exp %397 : vector<4x128xf32>
    %cst_79 = arith.constant 1.000000e+00 : f32
    %399 = vector.broadcast %cst_79 : f32 to vector<4x128xf32>
    %400 = arith.addf %399, %398 : vector<4x128xf32>
    %401 = arith.divf %399, %400 : vector<4x128xf32>
    %402 = vector.extract_strided_slice %389 {offsets = [0, 256], sizes = [4, 128], strides = [1, 1]} : vector<4x512xf32> to vector<4x128xf32>
    %403 = math.tanh %402 : vector<4x128xf32>
    %404 = vector.extract_strided_slice %389 {offsets = [0, 384], sizes = [4, 128], strides = [1, 1]} : vector<4x512xf32> to vector<4x128xf32>
    %405 = arith.negf %404 : vector<4x128xf32>
    %406 = math.exp %405 : vector<4x128xf32>
    %cst_80 = arith.constant 1.000000e+00 : f32
    %407 = vector.broadcast %cst_80 : f32 to vector<4x128xf32>
    %408 = arith.addf %407, %406 : vector<4x128xf32>
    %409 = arith.divf %407, %408 : vector<4x128xf32>
    %410 = arith.mulf %401, %378 : vector<4x128xf32>
    %411 = arith.mulf %395, %403 : vector<4x128xf32>
    %412 = arith.addf %410, %411 : vector<4x128xf32>
    %413 = math.tanh %412 : vector<4x128xf32>
    %414 = arith.mulf %409, %413 : vector<4x128xf32>
    %cst_81 = arith.constant dense<0.000000e+00> : vector<4x512xf32>
    %415 = tpu.matmul %414, %11, %cst_81 {dimension_numbers = #tpu.dot_dimension_numbers<[1], [0], [0], [1], [0, 0, 1, 1], [], []>} : vector<4x128xf32>, vector<128x512xf32>, vector<4x512xf32> -> vector<4x512xf32>
    %cst_82 = arith.constant dense<0.000000e+00> : vector<4x512xf32>
    %416 = tpu.matmul %381, %12, %cst_82 {dimension_numbers = #tpu.dot_dimension_numbers<[1], [0], [0], [1], [0, 0, 1, 1], [], []>} : vector<4x128xf32>, vector<128x512xf32>, vector<4x512xf32> -> vector<4x512xf32>
    %417 = arith.addf %415, %416 : vector<4x512xf32>
    %418 = vector.broadcast %13 : vector<1x512xf32> to vector<4x512xf32>
    %419 = arith.addf %417, %418 : vector<4x512xf32>
    %420 = vector.extract_strided_slice %419 {offsets = [0, 0], sizes = [4, 128], strides = [1, 1]} : vector<4x512xf32> to vector<4x128xf32>
    %421 = arith.negf %420 : vector<4x128xf32>
    %422 = math.exp %421 : vector<4x128xf32>
    %cst_83 = arith.constant 1.000000e+00 : f32
    %423 = vector.broadcast %cst_83 : f32 to vector<4x128xf32>
    %424 = arith.addf %423, %422 : vector<4x128xf32>
    %425 = arith.divf %423, %424 : vector<4x128xf32>
    %426 = vector.extract_strided_slice %419 {offsets = [0, 128], sizes = [4, 128], strides = [1, 1]} : vector<4x512xf32> to vector<4x128xf32>
    %427 = arith.negf %426 : vector<4x128xf32>
    %428 = math.exp %427 : vector<4x128xf32>
    %cst_84 = arith.constant 1.000000e+00 : f32
    %429 = vector.broadcast %cst_84 : f32 to vector<4x128xf32>
    %430 = arith.addf %429, %428 : vector<4x128xf32>
    %431 = arith.divf %429, %430 : vector<4x128xf32>
    %432 = vector.extract_strided_slice %419 {offsets = [0, 256], sizes = [4, 128], strides = [1, 1]} : vector<4x512xf32> to vector<4x128xf32>
    %433 = math.tanh %432 : vector<4x128xf32>
    %434 = vector.extract_strided_slice %419 {offsets = [0, 384], sizes = [4, 128], strides = [1, 1]} : vector<4x512xf32> to vector<4x128xf32>
    %435 = arith.negf %434 : vector<4x128xf32>
    %436 = math.exp %435 : vector<4x128xf32>
    %cst_85 = arith.constant 1.000000e+00 : f32
    %437 = vector.broadcast %cst_85 : f32 to vector<4x128xf32>
    %438 = arith.addf %437, %436 : vector<4x128xf32>
    %439 = arith.divf %437, %438 : vector<4x128xf32>
    %440 = arith.mulf %431, %384 : vector<4x128xf32>
    %441 = arith.mulf %425, %433 : vector<4x128xf32>
    %442 = arith.addf %440, %441 : vector<4x128xf32>
    %443 = math.tanh %442 : vector<4x128xf32>
    %444 = arith.mulf %439, %443 : vector<4x128xf32>
    %445 = vector.broadcast %c5_i32 : i32 to vector<4x1xi32>
    %446 = arith.cmpi slt, %445, %9 : vector<4x1xi32>
    %447 = vector.shape_cast %446 : vector<4x1xi1> to vector<4x1xi1>
    %448 = vector.broadcast %447 : vector<4x1xi1> to vector<4x128xi1>
    %449 = arith.select %448, %414, %375 : vector<4x128xi1>, vector<4x128xf32>
    %450 = vector.shape_cast %446 : vector<4x1xi1> to vector<4x1xi1>
    %451 = vector.broadcast %450 : vector<4x1xi1> to vector<4x128xi1>
    %452 = arith.select %451, %412, %378 : vector<4x128xi1>, vector<4x128xf32>
    %453 = vector.shape_cast %446 : vector<4x1xi1> to vector<4x1xi1>
    %454 = vector.broadcast %453 : vector<4x1xi1> to vector<4x128xi1>
    %455 = arith.select %454, %444, %381 : vector<4x128xi1>, vector<4x128xf32>
    %456 = vector.shape_cast %446 : vector<4x1xi1> to vector<4x1xi1>
    %457 = vector.broadcast %456 : vector<4x1xi1> to vector<4x128xi1>
    %458 = arith.select %457, %442, %384 : vector<4x128xi1>, vector<4x128xf32>
    %c6_i32 = arith.constant 6 : i32
    %459 = arith.index_cast %c6_i32 : i32 to index
    %c0_86 = arith.constant 0 : index
    %c0_87 = arith.constant 0 : index
    %460 = vector.load %arg10[%459, %c0_86, %c0_87] : memref<9x4x512xf32, #tpu.memory_space<vmem>>, vector<1x4x512xf32>
    %461 = vector.shape_cast %460 : vector<1x4x512xf32> to vector<4x512xf32>
    %cst_88 = arith.constant dense<0.000000e+00> : vector<4x512xf32>
    %462 = tpu.matmul %449, %10, %cst_88 {dimension_numbers = #tpu.dot_dimension_numbers<[1], [0], [0], [1], [0, 0, 1, 1], [], []>} : vector<4x128xf32>, vector<128x512xf32>, vector<4x512xf32> -> vector<4x512xf32>
    %463 = arith.addf %461, %462 : vector<4x512xf32>
    %464 = vector.extract_strided_slice %463 {offsets = [0, 0], sizes = [4, 128], strides = [1, 1]} : vector<4x512xf32> to vector<4x128xf32>
    %465 = arith.negf %464 : vector<4x128xf32>
    %466 = math.exp %465 : vector<4x128xf32>
    %cst_89 = arith.constant 1.000000e+00 : f32
    %467 = vector.broadcast %cst_89 : f32 to vector<4x128xf32>
    %468 = arith.addf %467, %466 : vector<4x128xf32>
    %469 = arith.divf %467, %468 : vector<4x128xf32>
    %470 = vector.extract_strided_slice %463 {offsets = [0, 128], sizes = [4, 128], strides = [1, 1]} : vector<4x512xf32> to vector<4x128xf32>
    %471 = arith.negf %470 : vector<4x128xf32>
    %472 = math.exp %471 : vector<4x128xf32>
    %cst_90 = arith.constant 1.000000e+00 : f32
    %473 = vector.broadcast %cst_90 : f32 to vector<4x128xf32>
    %474 = arith.addf %473, %472 : vector<4x128xf32>
    %475 = arith.divf %473, %474 : vector<4x128xf32>
    %476 = vector.extract_strided_slice %463 {offsets = [0, 256], sizes = [4, 128], strides = [1, 1]} : vector<4x512xf32> to vector<4x128xf32>
    %477 = math.tanh %476 : vector<4x128xf32>
    %478 = vector.extract_strided_slice %463 {offsets = [0, 384], sizes = [4, 128], strides = [1, 1]} : vector<4x512xf32> to vector<4x128xf32>
    %479 = arith.negf %478 : vector<4x128xf32>
    %480 = math.exp %479 : vector<4x128xf32>
    %cst_91 = arith.constant 1.000000e+00 : f32
    %481 = vector.broadcast %cst_91 : f32 to vector<4x128xf32>
    %482 = arith.addf %481, %480 : vector<4x128xf32>
    %483 = arith.divf %481, %482 : vector<4x128xf32>
    %484 = arith.mulf %475, %452 : vector<4x128xf32>
    %485 = arith.mulf %469, %477 : vector<4x128xf32>
    %486 = arith.addf %484, %485 : vector<4x128xf32>
    %487 = math.tanh %486 : vector<4x128xf32>
    %488 = arith.mulf %483, %487 : vector<4x128xf32>
    %cst_92 = arith.constant dense<0.000000e+00> : vector<4x512xf32>
    %489 = tpu.matmul %488, %11, %cst_92 {dimension_numbers = #tpu.dot_dimension_numbers<[1], [0], [0], [1], [0, 0, 1, 1], [], []>} : vector<4x128xf32>, vector<128x512xf32>, vector<4x512xf32> -> vector<4x512xf32>
    %cst_93 = arith.constant dense<0.000000e+00> : vector<4x512xf32>
    %490 = tpu.matmul %455, %12, %cst_93 {dimension_numbers = #tpu.dot_dimension_numbers<[1], [0], [0], [1], [0, 0, 1, 1], [], []>} : vector<4x128xf32>, vector<128x512xf32>, vector<4x512xf32> -> vector<4x512xf32>
    %491 = arith.addf %489, %490 : vector<4x512xf32>
    %492 = vector.broadcast %13 : vector<1x512xf32> to vector<4x512xf32>
    %493 = arith.addf %491, %492 : vector<4x512xf32>
    %494 = vector.extract_strided_slice %493 {offsets = [0, 0], sizes = [4, 128], strides = [1, 1]} : vector<4x512xf32> to vector<4x128xf32>
    %495 = arith.negf %494 : vector<4x128xf32>
    %496 = math.exp %495 : vector<4x128xf32>
    %cst_94 = arith.constant 1.000000e+00 : f32
    %497 = vector.broadcast %cst_94 : f32 to vector<4x128xf32>
    %498 = arith.addf %497, %496 : vector<4x128xf32>
    %499 = arith.divf %497, %498 : vector<4x128xf32>
    %500 = vector.extract_strided_slice %493 {offsets = [0, 128], sizes = [4, 128], strides = [1, 1]} : vector<4x512xf32> to vector<4x128xf32>
    %501 = arith.negf %500 : vector<4x128xf32>
    %502 = math.exp %501 : vector<4x128xf32>
    %cst_95 = arith.constant 1.000000e+00 : f32
    %503 = vector.broadcast %cst_95 : f32 to vector<4x128xf32>
    %504 = arith.addf %503, %502 : vector<4x128xf32>
    %505 = arith.divf %503, %504 : vector<4x128xf32>
    %506 = vector.extract_strided_slice %493 {offsets = [0, 256], sizes = [4, 128], strides = [1, 1]} : vector<4x512xf32> to vector<4x128xf32>
    %507 = math.tanh %506 : vector<4x128xf32>
    %508 = vector.extract_strided_slice %493 {offsets = [0, 384], sizes = [4, 128], strides = [1, 1]} : vector<4x512xf32> to vector<4x128xf32>
    %509 = arith.negf %508 : vector<4x128xf32>
    %510 = math.exp %509 : vector<4x128xf32>
    %cst_96 = arith.constant 1.000000e+00 : f32
    %511 = vector.broadcast %cst_96 : f32 to vector<4x128xf32>
    %512 = arith.addf %511, %510 : vector<4x128xf32>
    %513 = arith.divf %511, %512 : vector<4x128xf32>
    %514 = arith.mulf %505, %458 : vector<4x128xf32>
    %515 = arith.mulf %499, %507 : vector<4x128xf32>
    %516 = arith.addf %514, %515 : vector<4x128xf32>
    %517 = math.tanh %516 : vector<4x128xf32>
    %518 = arith.mulf %513, %517 : vector<4x128xf32>
    %519 = vector.broadcast %c6_i32 : i32 to vector<4x1xi32>
    %520 = arith.cmpi slt, %519, %9 : vector<4x1xi32>
    %521 = vector.shape_cast %520 : vector<4x1xi1> to vector<4x1xi1>
    %522 = vector.broadcast %521 : vector<4x1xi1> to vector<4x128xi1>
    %523 = arith.select %522, %488, %449 : vector<4x128xi1>, vector<4x128xf32>
    %524 = vector.shape_cast %520 : vector<4x1xi1> to vector<4x1xi1>
    %525 = vector.broadcast %524 : vector<4x1xi1> to vector<4x128xi1>
    %526 = arith.select %525, %486, %452 : vector<4x128xi1>, vector<4x128xf32>
    %527 = vector.shape_cast %520 : vector<4x1xi1> to vector<4x1xi1>
    %528 = vector.broadcast %527 : vector<4x1xi1> to vector<4x128xi1>
    %529 = arith.select %528, %518, %455 : vector<4x128xi1>, vector<4x128xf32>
    %530 = vector.shape_cast %520 : vector<4x1xi1> to vector<4x1xi1>
    %531 = vector.broadcast %530 : vector<4x1xi1> to vector<4x128xi1>
    %532 = arith.select %531, %516, %458 : vector<4x128xi1>, vector<4x128xf32>
    %c7_i32 = arith.constant 7 : i32
    %533 = arith.index_cast %c7_i32 : i32 to index
    %c0_97 = arith.constant 0 : index
    %c0_98 = arith.constant 0 : index
    %534 = vector.load %arg10[%533, %c0_97, %c0_98] : memref<9x4x512xf32, #tpu.memory_space<vmem>>, vector<1x4x512xf32>
    %535 = vector.shape_cast %534 : vector<1x4x512xf32> to vector<4x512xf32>
    %cst_99 = arith.constant dense<0.000000e+00> : vector<4x512xf32>
    %536 = tpu.matmul %523, %10, %cst_99 {dimension_numbers = #tpu.dot_dimension_numbers<[1], [0], [0], [1], [0, 0, 1, 1], [], []>} : vector<4x128xf32>, vector<128x512xf32>, vector<4x512xf32> -> vector<4x512xf32>
    %537 = arith.addf %535, %536 : vector<4x512xf32>
    %538 = vector.extract_strided_slice %537 {offsets = [0, 0], sizes = [4, 128], strides = [1, 1]} : vector<4x512xf32> to vector<4x128xf32>
    %539 = arith.negf %538 : vector<4x128xf32>
    %540 = math.exp %539 : vector<4x128xf32>
    %cst_100 = arith.constant 1.000000e+00 : f32
    %541 = vector.broadcast %cst_100 : f32 to vector<4x128xf32>
    %542 = arith.addf %541, %540 : vector<4x128xf32>
    %543 = arith.divf %541, %542 : vector<4x128xf32>
    %544 = vector.extract_strided_slice %537 {offsets = [0, 128], sizes = [4, 128], strides = [1, 1]} : vector<4x512xf32> to vector<4x128xf32>
    %545 = arith.negf %544 : vector<4x128xf32>
    %546 = math.exp %545 : vector<4x128xf32>
    %cst_101 = arith.constant 1.000000e+00 : f32
    %547 = vector.broadcast %cst_101 : f32 to vector<4x128xf32>
    %548 = arith.addf %547, %546 : vector<4x128xf32>
    %549 = arith.divf %547, %548 : vector<4x128xf32>
    %550 = vector.extract_strided_slice %537 {offsets = [0, 256], sizes = [4, 128], strides = [1, 1]} : vector<4x512xf32> to vector<4x128xf32>
    %551 = math.tanh %550 : vector<4x128xf32>
    %552 = vector.extract_strided_slice %537 {offsets = [0, 384], sizes = [4, 128], strides = [1, 1]} : vector<4x512xf32> to vector<4x128xf32>
    %553 = arith.negf %552 : vector<4x128xf32>
    %554 = math.exp %553 : vector<4x128xf32>
    %cst_102 = arith.constant 1.000000e+00 : f32
    %555 = vector.broadcast %cst_102 : f32 to vector<4x128xf32>
    %556 = arith.addf %555, %554 : vector<4x128xf32>
    %557 = arith.divf %555, %556 : vector<4x128xf32>
    %558 = arith.mulf %549, %526 : vector<4x128xf32>
    %559 = arith.mulf %543, %551 : vector<4x128xf32>
    %560 = arith.addf %558, %559 : vector<4x128xf32>
    %561 = math.tanh %560 : vector<4x128xf32>
    %562 = arith.mulf %557, %561 : vector<4x128xf32>
    %cst_103 = arith.constant dense<0.000000e+00> : vector<4x512xf32>
    %563 = tpu.matmul %562, %11, %cst_103 {dimension_numbers = #tpu.dot_dimension_numbers<[1], [0], [0], [1], [0, 0, 1, 1], [], []>} : vector<4x128xf32>, vector<128x512xf32>, vector<4x512xf32> -> vector<4x512xf32>
    %cst_104 = arith.constant dense<0.000000e+00> : vector<4x512xf32>
    %564 = tpu.matmul %529, %12, %cst_104 {dimension_numbers = #tpu.dot_dimension_numbers<[1], [0], [0], [1], [0, 0, 1, 1], [], []>} : vector<4x128xf32>, vector<128x512xf32>, vector<4x512xf32> -> vector<4x512xf32>
    %565 = arith.addf %563, %564 : vector<4x512xf32>
    %566 = vector.broadcast %13 : vector<1x512xf32> to vector<4x512xf32>
    %567 = arith.addf %565, %566 : vector<4x512xf32>
    %568 = vector.extract_strided_slice %567 {offsets = [0, 0], sizes = [4, 128], strides = [1, 1]} : vector<4x512xf32> to vector<4x128xf32>
    %569 = arith.negf %568 : vector<4x128xf32>
    %570 = math.exp %569 : vector<4x128xf32>
    %cst_105 = arith.constant 1.000000e+00 : f32
    %571 = vector.broadcast %cst_105 : f32 to vector<4x128xf32>
    %572 = arith.addf %571, %570 : vector<4x128xf32>
    %573 = arith.divf %571, %572 : vector<4x128xf32>
    %574 = vector.extract_strided_slice %567 {offsets = [0, 128], sizes = [4, 128], strides = [1, 1]} : vector<4x512xf32> to vector<4x128xf32>
    %575 = arith.negf %574 : vector<4x128xf32>
    %576 = math.exp %575 : vector<4x128xf32>
    %cst_106 = arith.constant 1.000000e+00 : f32
    %577 = vector.broadcast %cst_106 : f32 to vector<4x128xf32>
    %578 = arith.addf %577, %576 : vector<4x128xf32>
    %579 = arith.divf %577, %578 : vector<4x128xf32>
    %580 = vector.extract_strided_slice %567 {offsets = [0, 256], sizes = [4, 128], strides = [1, 1]} : vector<4x512xf32> to vector<4x128xf32>
    %581 = math.tanh %580 : vector<4x128xf32>
    %582 = vector.extract_strided_slice %567 {offsets = [0, 384], sizes = [4, 128], strides = [1, 1]} : vector<4x512xf32> to vector<4x128xf32>
    %583 = arith.negf %582 : vector<4x128xf32>
    %584 = math.exp %583 : vector<4x128xf32>
    %cst_107 = arith.constant 1.000000e+00 : f32
    %585 = vector.broadcast %cst_107 : f32 to vector<4x128xf32>
    %586 = arith.addf %585, %584 : vector<4x128xf32>
    %587 = arith.divf %585, %586 : vector<4x128xf32>
    %588 = arith.mulf %579, %532 : vector<4x128xf32>
    %589 = arith.mulf %573, %581 : vector<4x128xf32>
    %590 = arith.addf %588, %589 : vector<4x128xf32>
    %591 = math.tanh %590 : vector<4x128xf32>
    %592 = arith.mulf %587, %591 : vector<4x128xf32>
    %593 = vector.broadcast %c7_i32 : i32 to vector<4x1xi32>
    %594 = arith.cmpi slt, %593, %9 : vector<4x1xi32>
    %595 = vector.shape_cast %594 : vector<4x1xi1> to vector<4x1xi1>
    %596 = vector.broadcast %595 : vector<4x1xi1> to vector<4x128xi1>
    %597 = arith.select %596, %562, %523 : vector<4x128xi1>, vector<4x128xf32>
    %598 = vector.shape_cast %594 : vector<4x1xi1> to vector<4x1xi1>
    %599 = vector.broadcast %598 : vector<4x1xi1> to vector<4x128xi1>
    %600 = arith.select %599, %560, %526 : vector<4x128xi1>, vector<4x128xf32>
    %601 = vector.shape_cast %594 : vector<4x1xi1> to vector<4x1xi1>
    %602 = vector.broadcast %601 : vector<4x1xi1> to vector<4x128xi1>
    %603 = arith.select %602, %592, %529 : vector<4x128xi1>, vector<4x128xf32>
    %604 = vector.shape_cast %594 : vector<4x1xi1> to vector<4x1xi1>
    %605 = vector.broadcast %604 : vector<4x1xi1> to vector<4x128xi1>
    %606 = arith.select %605, %590, %532 : vector<4x128xi1>, vector<4x128xf32>
    %c8_i32 = arith.constant 8 : i32
    %607 = arith.index_cast %c8_i32 : i32 to index
    %c0_108 = arith.constant 0 : index
    %c0_109 = arith.constant 0 : index
    %608 = vector.load %arg10[%607, %c0_108, %c0_109] : memref<9x4x512xf32, #tpu.memory_space<vmem>>, vector<1x4x512xf32>
    %609 = vector.shape_cast %608 : vector<1x4x512xf32> to vector<4x512xf32>
    %cst_110 = arith.constant dense<0.000000e+00> : vector<4x512xf32>
    %610 = tpu.matmul %597, %10, %cst_110 {dimension_numbers = #tpu.dot_dimension_numbers<[1], [0], [0], [1], [0, 0, 1, 1], [], []>} : vector<4x128xf32>, vector<128x512xf32>, vector<4x512xf32> -> vector<4x512xf32>
    %611 = arith.addf %609, %610 : vector<4x512xf32>
    %612 = vector.extract_strided_slice %611 {offsets = [0, 0], sizes = [4, 128], strides = [1, 1]} : vector<4x512xf32> to vector<4x128xf32>
    %613 = arith.negf %612 : vector<4x128xf32>
    %614 = math.exp %613 : vector<4x128xf32>
    %cst_111 = arith.constant 1.000000e+00 : f32
    %615 = vector.broadcast %cst_111 : f32 to vector<4x128xf32>
    %616 = arith.addf %615, %614 : vector<4x128xf32>
    %617 = arith.divf %615, %616 : vector<4x128xf32>
    %618 = vector.extract_strided_slice %611 {offsets = [0, 128], sizes = [4, 128], strides = [1, 1]} : vector<4x512xf32> to vector<4x128xf32>
    %619 = arith.negf %618 : vector<4x128xf32>
    %620 = math.exp %619 : vector<4x128xf32>
    %cst_112 = arith.constant 1.000000e+00 : f32
    %621 = vector.broadcast %cst_112 : f32 to vector<4x128xf32>
    %622 = arith.addf %621, %620 : vector<4x128xf32>
    %623 = arith.divf %621, %622 : vector<4x128xf32>
    %624 = vector.extract_strided_slice %611 {offsets = [0, 256], sizes = [4, 128], strides = [1, 1]} : vector<4x512xf32> to vector<4x128xf32>
    %625 = math.tanh %624 : vector<4x128xf32>
    %626 = vector.extract_strided_slice %611 {offsets = [0, 384], sizes = [4, 128], strides = [1, 1]} : vector<4x512xf32> to vector<4x128xf32>
    %627 = arith.negf %626 : vector<4x128xf32>
    %628 = math.exp %627 : vector<4x128xf32>
    %cst_113 = arith.constant 1.000000e+00 : f32
    %629 = vector.broadcast %cst_113 : f32 to vector<4x128xf32>
    %630 = arith.addf %629, %628 : vector<4x128xf32>
    %631 = arith.divf %629, %630 : vector<4x128xf32>
    %632 = arith.mulf %623, %600 : vector<4x128xf32>
    %633 = arith.mulf %617, %625 : vector<4x128xf32>
    %634 = arith.addf %632, %633 : vector<4x128xf32>
    %635 = math.tanh %634 : vector<4x128xf32>
    %636 = arith.mulf %631, %635 : vector<4x128xf32>
    %cst_114 = arith.constant dense<0.000000e+00> : vector<4x512xf32>
    %637 = tpu.matmul %636, %11, %cst_114 {dimension_numbers = #tpu.dot_dimension_numbers<[1], [0], [0], [1], [0, 0, 1, 1], [], []>} : vector<4x128xf32>, vector<128x512xf32>, vector<4x512xf32> -> vector<4x512xf32>
    %cst_115 = arith.constant dense<0.000000e+00> : vector<4x512xf32>
    %638 = tpu.matmul %603, %12, %cst_115 {dimension_numbers = #tpu.dot_dimension_numbers<[1], [0], [0], [1], [0, 0, 1, 1], [], []>} : vector<4x128xf32>, vector<128x512xf32>, vector<4x512xf32> -> vector<4x512xf32>
    %639 = arith.addf %637, %638 : vector<4x512xf32>
    %640 = vector.broadcast %13 : vector<1x512xf32> to vector<4x512xf32>
    %641 = arith.addf %639, %640 : vector<4x512xf32>
    %642 = vector.extract_strided_slice %641 {offsets = [0, 0], sizes = [4, 128], strides = [1, 1]} : vector<4x512xf32> to vector<4x128xf32>
    %643 = arith.negf %642 : vector<4x128xf32>
    %644 = math.exp %643 : vector<4x128xf32>
    %cst_116 = arith.constant 1.000000e+00 : f32
    %645 = vector.broadcast %cst_116 : f32 to vector<4x128xf32>
    %646 = arith.addf %645, %644 : vector<4x128xf32>
    %647 = arith.divf %645, %646 : vector<4x128xf32>
    %648 = vector.extract_strided_slice %641 {offsets = [0, 128], sizes = [4, 128], strides = [1, 1]} : vector<4x512xf32> to vector<4x128xf32>
    %649 = arith.negf %648 : vector<4x128xf32>
    %650 = math.exp %649 : vector<4x128xf32>
    %cst_117 = arith.constant 1.000000e+00 : f32
    %651 = vector.broadcast %cst_117 : f32 to vector<4x128xf32>
    %652 = arith.addf %651, %650 : vector<4x128xf32>
    %653 = arith.divf %651, %652 : vector<4x128xf32>
    %654 = vector.extract_strided_slice %641 {offsets = [0, 256], sizes = [4, 128], strides = [1, 1]} : vector<4x512xf32> to vector<4x128xf32>
    %655 = math.tanh %654 : vector<4x128xf32>
    %656 = vector.extract_strided_slice %641 {offsets = [0, 384], sizes = [4, 128], strides = [1, 1]} : vector<4x512xf32> to vector<4x128xf32>
    %657 = arith.negf %656 : vector<4x128xf32>
    %658 = math.exp %657 : vector<4x128xf32>
    %cst_118 = arith.constant 1.000000e+00 : f32
    %659 = vector.broadcast %cst_118 : f32 to vector<4x128xf32>
    %660 = arith.addf %659, %658 : vector<4x128xf32>
    %661 = arith.divf %659, %660 : vector<4x128xf32>
    %662 = arith.mulf %653, %606 : vector<4x128xf32>
    %663 = arith.mulf %647, %655 : vector<4x128xf32>
    %664 = arith.addf %662, %663 : vector<4x128xf32>
    %665 = math.tanh %664 : vector<4x128xf32>
    %666 = arith.mulf %661, %665 : vector<4x128xf32>
    %667 = vector.broadcast %c8_i32 : i32 to vector<4x1xi32>
    %668 = arith.cmpi slt, %667, %9 : vector<4x1xi32>
    %669 = vector.shape_cast %668 : vector<4x1xi1> to vector<4x1xi1>
    %670 = vector.broadcast %669 : vector<4x1xi1> to vector<4x128xi1>
    %671 = arith.select %670, %636, %597 : vector<4x128xi1>, vector<4x128xf32>
    %672 = vector.shape_cast %668 : vector<4x1xi1> to vector<4x1xi1>
    %673 = vector.broadcast %672 : vector<4x1xi1> to vector<4x128xi1>
    %674 = arith.select %673, %634, %600 : vector<4x128xi1>, vector<4x128xf32>
    %675 = vector.shape_cast %668 : vector<4x1xi1> to vector<4x1xi1>
    %676 = vector.broadcast %675 : vector<4x1xi1> to vector<4x128xi1>
    %677 = arith.select %676, %666, %603 : vector<4x128xi1>, vector<4x128xf32>
    %678 = vector.shape_cast %668 : vector<4x1xi1> to vector<4x1xi1>
    %679 = vector.broadcast %678 : vector<4x1xi1> to vector<4x128xi1>
    %680 = arith.select %679, %664, %606 : vector<4x128xi1>, vector<4x128xf32>
    %c9_i32 = arith.constant 9 : i32
    %c0_119 = arith.constant 0 : index
    %c0_120 = arith.constant 0 : index
    %c0_121 = arith.constant 0 : index
    %681 = vector.load %arg8[%c0_119, %c0_120, %c0_121] : memref<2x4x128xf32, #tpu.memory_space<vmem>>, vector<1x4x128xf32>
    %682 = vector.shape_cast %681 : vector<1x4x128xf32> to vector<4x128xf32>
    %683 = vector.shape_cast %671 : vector<4x128xf32> to vector<1x4x128xf32>
    tpu.vector_store %arg8[%c0_119, %c0_120, %c0_121], %683 {strides = array<i32>} : memref<2x4x128xf32, #tpu.memory_space<vmem>>, vector<1x4x128xf32>,
    %c1 = arith.constant 1 : index
    %c0_122 = arith.constant 0 : index
    %c0_123 = arith.constant 0 : index
    %684 = vector.load %arg8[%c1, %c0_122, %c0_123] : memref<2x4x128xf32, #tpu.memory_space<vmem>>, vector<1x4x128xf32>
    %685 = vector.shape_cast %684 : vector<1x4x128xf32> to vector<4x128xf32>
    %686 = vector.shape_cast %677 : vector<4x128xf32> to vector<1x4x128xf32>
    tpu.vector_store %arg8[%c1, %c0_122, %c0_123], %686 {strides = array<i32>} : memref<2x4x128xf32, #tpu.memory_space<vmem>>, vector<1x4x128xf32>,
    %c0_124 = arith.constant 0 : index
    %c0_125 = arith.constant 0 : index
    %c0_126 = arith.constant 0 : index
    %687 = vector.load %arg9[%c0_124, %c0_125, %c0_126] : memref<2x4x128xf32, #tpu.memory_space<vmem>>, vector<1x4x128xf32>
    %688 = vector.shape_cast %687 : vector<1x4x128xf32> to vector<4x128xf32>
    %689 = vector.shape_cast %674 : vector<4x128xf32> to vector<1x4x128xf32>
    tpu.vector_store %arg9[%c0_124, %c0_125, %c0_126], %689 {strides = array<i32>} : memref<2x4x128xf32, #tpu.memory_space<vmem>>, vector<1x4x128xf32>,
    %c1_127 = arith.constant 1 : index
    %c0_128 = arith.constant 0 : index
    %c0_129 = arith.constant 0 : index
    %690 = vector.load %arg9[%c1_127, %c0_128, %c0_129] : memref<2x4x128xf32, #tpu.memory_space<vmem>>, vector<1x4x128xf32>
    %691 = vector.shape_cast %690 : vector<1x4x128xf32> to vector<4x128xf32>
    %692 = vector.shape_cast %680 : vector<4x128xf32> to vector<1x4x128xf32>
    tpu.vector_store %arg9[%c1_127, %c0_128, %c0_129], %692 {strides = array<i32>} : memref<2x4x128xf32, #tpu.memory_space<vmem>>, vector<1x4x128xf32>,
    return
  }
}

</mosaic_0001>

<bundles_post_ra>
// kernel: tpu_custom_call.1
= control target key start
LH: loop header
LB: loop body
LE: loop exit
PB: predicated region body
PF: predicated region fallthrough
CT: control target
= control target key end

     0   :  { %15 = vsyncpa [#allocation4], 0  ;;  %s9417_s0 = inlined_call_operand.hbm [shape: f32[9,4,128], index: 0, kind: input, shape index: {}]   ;;  %s9418_s1 = inlined_call_operand.vmem [shape: s32[4,1], index: 1, kind: input, shape index: {}]   ;;  %s9419_s2 = inlined_call_operand.hbm [shape: f32[128,512], index: 2, kind: input, shape index: {}]   ;;  %s9420_s3 = inlined_call_operand.hbm [shape: f32[128,512], index: 3, kind: input, shape index: {}]   ;;  %s9421_s4 = inlined_call_operand.vmem [shape: f32[1,512], index: 4, kind: input, shape index: {}]   ;;  %s9422_s5 = inlined_call_operand.hbm [shape: f32[128,512], index: 5, kind: input, shape index: {}]   ;;  %s9423_s6 = inlined_call_operand.hbm [shape: f32[128,512], index: 6, kind: input, shape index: {}]   ;;  %s9424_s7 = inlined_call_operand.vmem [shape: f32[1,512], index: 7, kind: input, shape index: {}]   ;;  %s9425_s8 = inlined_call_operand.hbm [shape: f32[2,4,128], index: 8, kind: output, shape index: {0}]   ;;  %s9426_s9 = inlined_call_operand.hbm [shape: f32[2,4,128], index: 9, kind: output, shape index: {1}]  }
   0x1   :  { %16 = vsyncpa [#allocation7], 0 }
   0x2   :  { %17 = vsyncpa [#allocation10], 0 }
   0x3   :  { %18 = vsyncpa [#allocation5], 0 }
   0x4   :  { %19 = vsyncpa [#allocation14], 0  ;;  %s7652_s30 = smov [#allocation6]   ;;  %s7488_s13 = scalar_lea.hbm %s9419_s2, 8192 }
   0x5   :  { %s39_s10 = sshll.u32 %s7652_s30, 4  ;;  %p7489_p0 = scmp.ne.s32.totalorder %s9419_s2, %s7488_s13  ;;  %s40_s10 = int_to_ptr.vmem [resolvable:$true] %s39_s10 }
   0x6   :  { %p7492_p1 = scmp.lt.u32.totalorder %s7488_s13, %s9419_s2 }
   0x8   :  { %p7494_p2 = pnand %p7492_p1, %p7489_p0 }
   0xa   :  { %7497 = shalt.err (!%p7494_p2)
}
   0xb   :  { %s7498_s18 = scalar_lea.vmem %s40_s10, 8192  ;;  %p7503_p4 = scmp.lt.s32.totalorder %s40_s10, %s40_s10 }
   0xc   :  { %p7499_p3 = scmp.ne.s32.totalorder %s40_s10, %s7498_s18  ;;  %p7504_p5 = scmp.lt.s32.totalorder %s7498_s18, %s7498_s18 }
   0xe   :  { %p7505_p6 = por %p7504_p5, %p7503_p4 }
  0x10   :  { %p7506_p7 = pnand %p7505_p6, %p7499_p3 }
  0x12   :  { %7509 = shalt.err (!%p7506_p7)
}
  0x13   :  { %s7653_s19 = smov 512   ;;  %s7654_s20 = smov 32  }
  0x14   :  { %45 = dma.hbm_to_vmem [thread:$0]  %s9419_s2, 8192, %s40_s10, [#allocation7], %s7653_s19, %s7653_s19, %s7654_s20  }
  0x15   :  { %s7655_s23 = smov [#allocation9]   ;;  %s7656_s25 = smov [#allocation3]  }
  0x16   :  { %s65_s24 = sshll.u32 %s7655_s23, 4  ;;  %s25_s26 = sshll.u32 %s7656_s25, 4  ;;  %s66_s24 = int_to_ptr.vmem [resolvable:$true] %s65_s24  ;;  %s26_s26 = int_to_ptr.vmem [resolvable:$true] %s25_s26 }
  0x17   :  { %s7510_s29 = scalar_lea.hbm %s9422_s5, 8192 }
  0x18   :  { %p7511_p8 = scmp.ne.s32.totalorder %s9422_s5, %s7510_s29  ;;  %p7514_p9 = scmp.lt.u32.totalorder %s7510_s29, %s9422_s5 }
  0x1a   :  { %p7516_p10 = pnand %p7514_p9, %p7511_p8 }
  0x1c   :  { %7519 = shalt.err (!%p7516_p10)
}
  0x1d   :  { %s7520_s2 = scalar_lea.vmem %s66_s24, 8192  ;;  %p7525_p12 = scmp.lt.s32.totalorder %s66_s24, %s66_s24 }
  0x1e   :  { %p7521_p11 = scmp.ne.s32.totalorder %s66_s24, %s7520_s2  ;;  %p7526_p13 = scmp.lt.s32.totalorder %s7520_s2, %s7520_s2 }
  0x20   :  { %p7527_p0 = por %p7526_p13, %p7525_p12 }
  0x22   :  { %p7528_p1 = pnand %p7527_p0, %p7521_p11 }
  0x24   :  { %7531 = shalt.err (!%p7528_p1)
}
  0x25   :  { %71 = dma.hbm_to_vmem [thread:$0]  %s9422_s5, 8192, %s66_s24, [#allocation10], %s7653_s19, %s7653_s19, %s7654_s20  }
  0x26   :  { %s7532_s17 = scalar_lea.hbm %s9417_s0, 576 }
  0x27   :  { %p7533_p2 = scmp.ne.s32.totalorder %s9417_s0, %s7532_s17  ;;  %p7536_p3 = scmp.lt.u32.totalorder %s7532_s17, %s9417_s0 }
  0x29   :  { %p7538_p4 = pnand %p7536_p3, %p7533_p2 }
  0x2b   :  { %7541 = shalt.err (!%p7538_p4)
}
  0x2c   :  { %s7542_s25 = scalar_lea.vmem %s26_s26, 576  ;;  %p7547_p6 = scmp.lt.s32.totalorder %s26_s26, %s26_s26 }
  0x2d   :  { %p7543_p5 = scmp.ne.s32.totalorder %s26_s26, %s7542_s25  ;;  %p7548_p7 = scmp.lt.s32.totalorder %s7542_s25, %s7542_s25 }
  0x2f   :  { %p7549_p8 = por %p7548_p7, %p7547_p6 }
  0x31   :  { %p7550_p9 = pnand %p7549_p8, %p7543_p5 }
  0x33   :  { %7553 = shalt.err (!%p7550_p9)
}
  0x34   :  { %s7657_s5 = smov 64   ;;  %s7658_s24 = smov 4  }
  0x35   :  { %31 = dma.hbm_to_vmem [thread:$0]  %s9417_s0, 576, %s26_s26, [#allocation4], %s7657_s5, %s7657_s5, %s7658_s24  }
  0x36   :  { %s7659_s29 = smov [#allocation8]   ;;  %s7660_s11 = smov [#allocation11]  }
  0x37   :  { %s51_s30 = sshll.u32 %s7659_s29, 4  ;;  %s77_s12 = sshll.u32 %s7660_s11, 4  ;;  %s52_s30 = int_to_ptr.vmem [resolvable:$true] %s51_s30  ;;  %s78_s12 = int_to_ptr.vmem [resolvable:$true] %s77_s12 }
  0x38   :  { %s7554_s10 = scalar_lea.hbm %s9420_s3, 8192 }
  0x39   :  { %p7555_p10 = scmp.ne.s32.totalorder %s9420_s3, %s7554_s10  ;;  %p7558_p11 = scmp.lt.u32.totalorder %s7554_s10, %s9420_s3 }
  0x3b   :  { %p7560_p12 = pnand %p7558_p11, %p7555_p10 }
  0x3d   :  { %7563 = shalt.err (!%p7560_p12)
}
  0x3e   :  { %s7564_s0 = scalar_lea.vmem %s52_s30, 8192  ;;  %p7569_p0 = scmp.lt.s32.totalorder %s52_s30, %s52_s30 }
  0x3f   :  { %p7565_p13 = scmp.ne.s32.totalorder %s52_s30, %s7564_s0  ;;  %p7570_p1 = scmp.lt.s32.totalorder %s7564_s0, %s7564_s0 }
  0x41   :  { %p7571_p2 = por %p7570_p1, %p7569_p0 }
  0x43   :  { %p7572_p3 = pnand %p7571_p2, %p7565_p13 }
  0x45   :  { %7575 = shalt.err (!%p7572_p3)
}
  0x46   :  { %57 = dma.hbm_to_vmem [thread:$0]  %s9420_s3, 8192, %s52_s30, [#allocation7], %s7653_s19, %s7653_s19, %s7654_s20  }
  0x47   :  { %s7576_s23 = scalar_lea.hbm %s9423_s6, 8192 }
  0x48   :  { %p7577_p4 = scmp.ne.s32.totalorder %s9423_s6, %s7576_s23  ;;  %p7580_p5 = scmp.lt.u32.totalorder %s7576_s23, %s9423_s6 }
  0x4a   :  { %p7582_p6 = pnand %p7580_p5, %p7577_p4 }
  0x4c   :  { %7585 = shalt.err (!%p7582_p6)
}
  0x4d   :  { %s7586_s11 = scalar_lea.vmem %s78_s12, 8192  ;;  %p7591_p8 = scmp.lt.s32.totalorder %s78_s12, %s78_s12 }
  0x4e   :  { %p7587_p7 = scmp.ne.s32.totalorder %s78_s12, %s7586_s11  ;;  %p7592_p9 = scmp.lt.s32.totalorder %s7586_s11, %s7586_s11 }
  0x50   :  { %p7593_p10 = por %p7592_p9, %p7591_p8 }
  0x52   :  { %p7594_p11 = pnand %p7593_p10, %p7587_p7 }
  0x54   :  { %7597 = shalt.err (!%p7594_p11)
}
  0x55   :  { %83 = dma.hbm_to_vmem [thread:$0]  %s9423_s6, 8192, %s78_s12, [#allocation10], %s7653_s19, %s7653_s19, %s7654_s20  }
  0x56   :  { %7642 = dma.done.wait [#allocation4], 576  }
  0x57   :  { %7643 = vsyncadd [#allocation4], 4294966720 }
  0x58   :  { %7644 = dma.done.wait [#allocation7], 16384  }
  0x59   :  { %7645 = vsyncadd [#allocation7], 4294950912 }
  0x5a   :  { %7646 = dma.done.wait [#allocation10], 16384  }
  0x5b   :  { %7647 = vsyncadd [#allocation10], 4294950912  ;;  %v9429_v0 = vmov 0.0   ;;  %v9427_v1 = vmov 0   ;;  %v111_v2 = vld [vmem:[#allocation6 + $0x8] sm:$0xff]  ;;  %v113_v4 = vld [vmem:[#allocation6 + $0x18] sm:$0xff] }
  0x5c   :  { %276 = vmatprep.mubr.f32.mxu0 %v9429_v0  ;;  %371 = vmatprep.mubr.f32.mxu1 %v9429_v0  ;;  %v115_v3 = vld [vmem:[#allocation6 + $0x28] sm:$0xff]  ;;  %v117_v6 = vld [vmem:[#allocation6 + $0x38] sm:$0xff]  ;;  %v110_v7 = vld [vmem:[#allocation6] sm:$0xff] }
  0x5d   :  { %7193 = vset.pattern.permute.xlu0 %v9427_v1  ;;  %7194 = vset.pattern.permute.xlu1 %v9427_v1  ;;  %v5352_v5 = vpack.c.bf16 %v115_v3, %v111_v2  ;;  %v114_v8 = vld [vmem:[#allocation6 + $0x20] sm:$0xff]  ;;  %v5384_v9 = vpack.c.bf16 %v117_v6, %v113_v4  ;;  %v112_v11 = vld [vmem:[#allocation6 + $0x10] sm:$0xff]  ;;  %v119_v13 = vld [vmem:[#allocation6 + $0x48] sm:$0xff] }
  0x5e   :  { %v5354_v10 = vpack.c.bf16 %v114_v8, %v110_v7  ;;  %v116_v12 = vld [vmem:[#allocation6 + $0x30] sm:$0xff]  ;;  %v123_v15 = vld [vmem:[#allocation6 + $0x68] sm:$0xff]  ;;  %v121_v16 = vld [vmem:[#allocation6 + $0x58] sm:$0xff] }
  0x5f   :  { %5353 = vmatprep.subr.bf16.mxu0 %v5352_v5  ;;  %v5386_v14 = vpack.c.bf16 %v116_v12, %v112_v11  ;;  %v125_v17 = vld [vmem:[#allocation6 + $0x78] sm:$0xff]  ;;  %5385 = vmatprep.subr.bf16.mxu1 %v5384_v9  ;;  %v5356_v18 = vpack.c.bf16 %v123_v15, %v119_v13  ;;  %v118_v20 = vld [vmem:[#allocation6 + $0x40] sm:$0xff]  ;;  %v120_v22 = vld [vmem:[#allocation6 + $0x50] sm:$0xff] }
  0x60   :  { %5355 = vmatpush1.bf16.msra.mxu0 %v5354_v10  ;;  %v5388_v19 = vpack.c.bf16 %v125_v17, %v121_v16  ;;  %v122_v21 = vld [vmem:[#allocation6 + $0x60] sm:$0xff]  ;;  %v124_v24 = vld [vmem:[#allocation6 + $0x70] sm:$0xff]  ;;  %v127_v25 = vld [vmem:[#allocation6 + $0x88] sm:$0xff] }
  0x61   :  { %5387 = vmatpush1.bf16.msra.mxu1 %v5386_v14  ;;  %v5358_v23 = vpack.c.bf16 %v122_v21, %v118_v20  ;;  %v131_v26 = vld [vmem:[#allocation6 + $0xa8] sm:$0xff]  ;;  %5357 = vmatprep.subr.bf16.mxu0 %v5356_v18  ;;  %v5390_v27 = vpack.c.bf16 %v124_v24, %v120_v22  ;;  %v129_v29 = vld [vmem:[#allocation6 + $0x98] sm:$0xff]  ;;  %v126_v31 = vld [vmem:[#allocation6 + $0x80] sm:$0xff] }
  0x62   :  { %5389 = vmatprep.subr.bf16.mxu1 %v5388_v19  ;;  %v5360_v28 = vpack.c.bf16 %v131_v26, %v127_v25  ;;  %v133_v30 = vld [vmem:[#allocation6 + $0xb8] sm:$0xff]  ;;  %v130_v33 = vld [vmem:[#allocation6 + $0xa0] sm:$0xff]  ;;  %v128_v34 = vld [vmem:[#allocation6 + $0x90] sm:$0xff] }
  0x63   :  { %v5392_v32 = vpack.c.bf16 %v133_v30, %v129_v29  ;;  %v132_v35 = vld [vmem:[#allocation6 + $0xb0] sm:$0xff]  ;;  %v5362_v36 = vpack.c.bf16 %v130_v33, %v126_v31  ;;  %v135_v37 = vld [vmem:[#allocation6 + $0xc8] sm:$0xff]  ;;  %v137_v39 = vld [vmem:[#allocation6 + $0xd8] sm:$0xff] }
  0x64   :  { %5359 = vmatpush1.bf16.msra.mxu0 %v5358_v23  ;;  %v139_v38 = vld [vmem:[#allocation6 + $0xe8] sm:$0xff]  ;;  %v5394_v40 = vpack.c.bf16 %v132_v35, %v128_v34  ;;  %v141_v42 = vld [vmem:[#allocation6 + $0xf8] sm:$0xff]  ;;  %v134_v43 = vld [vmem:[#allocation6 + $0xc0] sm:$0xff] }
  0x65   :  { %5391 = vmatpush1.bf16.msra.mxu1 %v5390_v27  ;;  %5361 = vmatprep.subr.bf16.mxu0 %v5360_v28  ;;  %v5364_v41 = vpack.c.bf16 %v139_v38, %v135_v37  ;;  %v138_v44 = vld [vmem:[#allocation6 + $0xe0] sm:$0xff]  ;;  %v5396_v45 = vpack.c.bf16 %v141_v42, %v137_v39  ;;  %v136_v46 = vld [vmem:[#allocation6 + $0xd0] sm:$0xff]  ;;  %v143_v48 = vld [vmem:[#allocation6 + $0x108] sm:$0xff] }
  0x66   :  { %5393 = vmatprep.subr.bf16.mxu1 %v5392_v32  ;;  %v140_v47 = vld [vmem:[#allocation6 + $0xf0] sm:$0xff]  ;;  %v147_v49 = vld [vmem:[#allocation6 + $0x128] sm:$0xff]  ;;  %v145_v50 = vld [vmem:[#allocation6 + $0x118] sm:$0xff]  ;;  %v5366_v52 = vpack.c.bf16 %v138_v44, %v134_v43 }
  0x67   :  { %v149_v51 = vld [vmem:[#allocation6 + $0x138] sm:$0xff]  ;;  %v5398_v53 = vpack.c.bf16 %v140_v47, %v136_v46  ;;  %v5368_v54 = vpack.c.bf16 %v147_v49, %v143_v48  ;;  %v142_v55 = vld [vmem:[#allocation6 + $0x100] sm:$0xff]  ;;  %v144_v57 = vld [vmem:[#allocation6 + $0x110] sm:$0xff] }
  0x68   :  { %5363 = vmatpush1.bf16.msra.mxu0 %v5362_v36  ;;  %v146_v56 = vld [vmem:[#allocation6 + $0x120] sm:$0xff]  ;;  %v5400_v58 = vpack.c.bf16 %v149_v51, %v145_v50  ;;  %v148_v59 = vld [vmem:[#allocation6 + $0x130] sm:$0xff]  ;;  %v151_v60 = vld [vmem:[#allocation6 + $0x148] sm:$0xff] }
  0x69   :  { %5395 = vmatpush1.bf16.msra.mxu1 %v5394_v40  ;;  %5365 = vmatprep.subr.bf16.mxu0 %v5364_v41  ;;  %v155_v61 = vld [vmem:[#allocation6 + $0x168] sm:$0xff]  ;;  %v153_v62 = vld [vmem:[#allocation6 + $0x158] sm:$0xff]  ;;  %v5370_v2 = vpack.c.bf16 %v146_v56, %v142_v55  ;;  %v5402_v3 = vpack.c.bf16 %v148_v59, %v144_v57  ;;  %v150_v5 = vld [vmem:[#allocation6 + $0x140] sm:$0xff] }
  0x6a   :  { %5397 = vmatprep.subr.bf16.mxu1 %v5396_v45  ;;  %v157_v63 = vld [vmem:[#allocation6 + $0x178] sm:$0xff]  ;;  %v5372_v4 = vpack.c.bf16 %v155_v61, %v151_v60  ;;  %v154_v6 = vld [vmem:[#allocation6 + $0x160] sm:$0xff]  ;;  %v152_v7 = vld [vmem:[#allocation6 + $0x150] sm:$0xff] }
  0x6b   :  { %v5404_v8 = vpack.c.bf16 %v157_v63, %v153_v62  ;;  %v156_v9 = vld [vmem:[#allocation6 + $0x170] sm:$0xff]  ;;  %v159_v10 = vld [vmem:[#allocation6 + $0x188] sm:$0xff]  ;;  %v161_v12 = vld [vmem:[#allocation6 + $0x198] sm:$0xff]  ;;  %v5374_v14 = vpack.c.bf16 %v154_v6, %v150_v5 }
  0x6c   :  { %5367 = vmatpush1.bf16.msra.mxu0 %v5366_v52  ;;  %v163_v11 = vld [vmem:[#allocation6 + $0x1a8] sm:$0xff]  ;;  %v165_v13 = vld [vmem:[#allocation6 + $0x1b8] sm:$0xff]  ;;  %v158_v15 = vld [vmem:[#allocation6 + $0x180] sm:$0xff]  ;;  %v5406_v17 = vpack.c.bf16 %v156_v9, %v152_v7 }
  0x6d   :  { %5399 = vmatpush1.bf16.msra.mxu1 %v5398_v53  ;;  %5369 = vmatprep.subr.bf16.mxu0 %v5368_v54  ;;  %v162_v16 = vld [vmem:[#allocation6 + $0x1a0] sm:$0xff]  ;;  %v5376_v18 = vpack.c.bf16 %v163_v11, %v159_v10  ;;  %v160_v19 = vld [vmem:[#allocation6 + $0x190] sm:$0xff]  ;;  %v5408_v20 = vpack.c.bf16 %v165_v13, %v161_v12  ;;  %v167_v22 = vld [vmem:[#allocation6 + $0x1c8] sm:$0xff] }
  0x6e   :  { %5401 = vmatprep.subr.bf16.mxu1 %v5400_v58  ;;  %v164_v21 = vld [vmem:[#allocation6 + $0x1b0] sm:$0xff]  ;;  %v171_v23 = vld [vmem:[#allocation6 + $0x1e8] sm:$0xff]  ;;  %v169_v24 = vld [vmem:[#allocation6 + $0x1d8] sm:$0xff]  ;;  %v5378_v26 = vpack.c.bf16 %v162_v16, %v158_v15 }
  0x6f   :  { %v173_v25 = vld [vmem:[#allocation6 + $0x1f8] sm:$0xff]  ;;  %v5410_v27 = vpack.c.bf16 %v164_v21, %v160_v19  ;;  %v5380_v28 = vpack.c.bf16 %v171_v23, %v167_v22  ;;  %v166_v29 = vld [vmem:[#allocation6 + $0x1c0] sm:$0xff]  ;;  %v168_v31 = vld [vmem:[#allocation6 + $0x1d0] sm:$0xff] }
  0x70   :  { %5371 = vmatpush1.bf16.msra.mxu0 %v5370_v2  ;;  %v170_v30 = vld [vmem:[#allocation6 + $0x1e0] sm:$0xff]  ;;  %v5412_v32 = vpack.c.bf16 %v173_v25, %v169_v24  ;;  %v172_v33 = vld [vmem:[#allocation6 + $0x1f0] sm:$0xff]  ;;  %v478_v34 = vld [vmem:[#allocation8 + $0x8] sm:$0xff] }
  0x71   :  { %5403 = vmatpush1.bf16.msra.mxu1 %v5402_v3  ;;  %5373 = vmatprep.subr.bf16.mxu0 %v5372_v4  ;;  %v482_v35 = vld [vmem:[#allocation8 + $0x28] sm:$0xff]  ;;  %v480_v36 = vld [vmem:[#allocation8 + $0x18] sm:$0xff]  ;;  %v5382_v38 = vpack.c.bf16 %v170_v30, %v166_v29  ;;  %v5414_v39 = vpack.c.bf16 %v172_v33, %v168_v31  ;;  %v477_v41 = vld [vmem:[#allocation8] sm:$0xff] }
  0x72   :  { %5405 = vmatprep.subr.bf16.mxu1 %v5404_v8  ;;  %v484_v37 = vld [vmem:[#allocation8 + $0x38] sm:$0xff]  ;;  %v7794_v40 = vpack.c.bf16 %v482_v35, %v478_v34  ;;  %v481_v42 = vld [vmem:[#allocation8 + $0x20] sm:$0xff]  ;;  %v479_v43 = vld [vmem:[#allocation8 + $0x10] sm:$0xff] }
  0x73   :  { %v7796_v44 = vpack.c.bf16 %v484_v37, %v480_v36  ;;  %v483_v45 = vld [vmem:[#allocation8 + $0x30] sm:$0xff]  ;;  %v486_v46 = vld [vmem:[#allocation8 + $0x48] sm:$0xff]  ;;  %v7195_v48 = vld [vmem:[#allocation3] sm:$0xff]   ;;  %v7798_v51 = vpack.c.bf16 %v481_v42, %v477_v41 }
  0x74   :  { %5375 = vmatpush1.bf16.msra.mxu0 %v5374_v14  ;;  %9673 = vst [vmem:[#allocation20_spill] sm:$0xff] %v7794_v40  ;;  %v490_v47 = vld [vmem:[#allocation8 + $0x68] sm:$0xff]  ;;  %v488_v49 = vld [vmem:[#allocation8 + $0x58] sm:$0xff]  ;;  %v485_v52 = vld [vmem:[#allocation8 + $0x40] sm:$0xff]  ;;  %v7801_v54 = vpack.c.bf16 %v483_v45, %v479_v43 }
  0x75   :  { %5407 = vmatpush1.bf16.msra.mxu1 %v5406_v17  ;;  %5377 = vmatprep.subr.bf16.mxu0 %v5376_v18  ;;  %9674 = vst [vmem:[#allocation21_spill] sm:$0xff] %v7796_v44  ;;  %v492_v50 = vld [vmem:[#allocation8 + $0x78] sm:$0xff]  ;;  %v489_v53 = vld [vmem:[#allocation8 + $0x60] sm:$0xff]  ;;  %v7803_v55 = vpack.c.bf16 %v490_v47, %v486_v46  ;;  %v487_v56 = vld [vmem:[#allocation8 + $0x50] sm:$0xff] }
  0x76   :  { %5409 = vmatprep.subr.bf16.mxu1 %v5408_v20  ;;  %v7806_v57 = vpack.c.bf16 %v492_v50, %v488_v49  ;;  %v491_v58 = vld [vmem:[#allocation8 + $0x70] sm:$0xff]  ;;  %v494_v59 = vld [vmem:[#allocation8 + $0x88] sm:$0xff]  ;;  %v496_v61 = vld [vmem:[#allocation8 + $0x98] sm:$0xff]  ;;  %v7809_v2 = vpack.c.bf16 %v489_v53, %v485_v52 }
  0x77   :  { %v498_v60 = vld [vmem:[#allocation8 + $0xa8] sm:$0xff]  ;;  %v500_v62 = vld [vmem:[#allocation8 + $0xb8] sm:$0xff]  ;;  %v493_v3 = vld [vmem:[#allocation8 + $0x80] sm:$0xff]  ;;  %v7813_v4 = vpack.c.bf16 %v491_v58, %v487_v56 }
  0x78   :  { %5379 = vmatpush1.bf16.msra.mxu0 %v5378_v26  ;;  %v7196_v63 = vld [vmem:[#allocation3 + $0x8] sm:$0xff]   ;;  %9675 = vst [vmem:[#allocation22_spill] sm:$0xff] %v7809_v2  ;;  %v7815_v5 = vpack.c.bf16 %v498_v60, %v494_v59  ;;  %v495_v7 = vld [vmem:[#allocation8 + $0x90] sm:$0xff]  ;;  %v7818_v8 = vpack.c.bf16 %v500_v62, %v496_v61  ;;  %v504_v12 = vld [vmem:[#allocation8 + $0xd8] sm:$0xff] }
  0x79   :  { %5411 = vmatpush1.bf16.msra.mxu1 %v5410_v27  ;;  %5381 = vmatprep.subr.bf16.mxu0 %v5380_v28  ;;  %9676 = vst [vmem:[#allocation23_spill] sm:$0xff] %v7813_v4  ;;  %v497_v6 = vld [vmem:[#allocation8 + $0xa0] sm:$0xff]  ;;  %v499_v9 = vld [vmem:[#allocation8 + $0xb0] sm:$0xff]  ;;  %v502_v10 = vld [vmem:[#allocation8 + $0xc8] sm:$0xff] }
  0x7a   :  { %5413 = vmatprep.subr.bf16.mxu1 %v5412_v32  ;;  %9677 = vst [vmem:[#allocation24_spill] sm:$0xff] %v7815_v5  ;;  %9678 = vst [vmem:[#allocation25_spill] sm:$0xff] %v7818_v8  ;;  %v506_v11 = vld [vmem:[#allocation8 + $0xe8] sm:$0xff]  ;;  %v508_v13 = vld [vmem:[#allocation8 + $0xf8] sm:$0xff]  ;;  %v7823_v15 = vpack.c.bf16 %v497_v6, %v493_v3  ;;  %v7827_v16 = vpack.c.bf16 %v499_v9, %v495_v7 }
  0x7b   :  { %v7197_v14 = vld [vmem:[#allocation3 + $0x10] sm:$0xff]   ;;  %v7829_v17 = vpack.c.bf16 %v506_v11, %v502_v10  ;;  %v501_v18 = vld [vmem:[#allocation8 + $0xc0] sm:$0xff]  ;;  %v7832_v21 = vpack.c.bf16 %v508_v13, %v504_v12  ;;  %v512_v25 = vld [vmem:[#allocation8 + $0x118] sm:$0xff] }
  0x7c   :  { %5383 = vmatpush1.bf16.msra.mxu0 %v5382_v38  ;;  %9679 = vst [vmem:[#allocation26_spill] sm:$0xff] %v7823_v15  ;;  %9680 = vst [vmem:[#allocation27_spill] sm:$0xff] %v7827_v16  ;;  %v505_v19 = vld [vmem:[#allocation8 + $0xe0] sm:$0xff]  ;;  %v503_v20 = vld [vmem:[#allocation8 + $0xd0] sm:$0xff] }
  0x7d   :  { %5415 = vmatpush1.bf16.msra.mxu1 %v5414_v39  ;;  %5417 = vmatprep.subr.bf16.mxu0 %v7794_v40  ;;  %9681 = vst [vmem:[#allocation28_spill] sm:$0xff] %v7829_v17  ;;  %9682 = vst [vmem:[#allocation29_spill] sm:$0xff] %v7832_v21  ;;  %v507_v22 = vld [vmem:[#allocation8 + $0xf0] sm:$0xff]  ;;  %v510_v23 = vld [vmem:[#allocation8 + $0x108] sm:$0xff]  ;;  %v7837_v28 = vpack.c.bf16 %v505_v19, %v501_v18 }
  0x7e   :  { %5449 = vmatprep.subr.bf16.mxu1 %v7796_v44  ;;  %v514_v24 = vld [vmem:[#allocation8 + $0x128] sm:$0xff]  ;;  %v516_v26 = vld [vmem:[#allocation8 + $0x138] sm:$0xff]  ;;  %v7841_v29 = vpack.c.bf16 %v507_v22, %v503_v20  ;;  %v509_v31 = vld [vmem:[#allocation8 + $0x100] sm:$0xff] }
  0x7f   :  { %277 = vmatmul.mubr.f32.vlgmr.msra.gmra.mrb[0].mxu0 %v7195_v48  ;;  %v7198_v27 = vld [vmem:[#allocation3 + $0x18] sm:$0xff]   ;;  %9683 = vst [vmem:[#allocation30_spill] sm:$0xff] %v7837_v28  ;;  %v7843_v30 = vpack.c.bf16 %v514_v24, %v510_v23  ;;  %v513_v32 = vld [vmem:[#allocation8 + $0x120] sm:$0xff]  ;;  %v7846_v34 = vpack.c.bf16 %v516_v26, %v512_v25  ;;  %v518_v36 = vld [vmem:[#allocation8 + $0x148] sm:$0xff] }
  0x80   :  { %372 = vmatmul.mubr.f32.vlgmr.msra.gmra.mrb[0].mxu1 %v7195_v48  ;;  %5419 = vmatpush1.bf16.msra.mxu0 %v7798_v51  ;;  %9684 = vst [vmem:[#allocation31_spill] sm:$0xff] %v7841_v29  ;;  %v511_v33 = vld [vmem:[#allocation8 + $0x110] sm:$0xff]  ;;  %v522_v37 = vld [vmem:[#allocation8 + $0x168] sm:$0xff]  ;;  %v520_v38 = vld [vmem:[#allocation8 + $0x158] sm:$0xff]  ;;  %v7856_v42 = vpack.c.bf16 %v513_v32, %v509_v31 }
  0x81   :  { %5451 = vmatpush1.bf16.msra.mxu1 %v7801_v54  ;;  %5421 = vmatprep.subr.bf16.mxu0 %v7803_v55  ;;  %9685 = vst [vmem:[#allocation32_spill] sm:$0xff] %v7843_v30  ;;  %9686 = vst [vmem:[#allocation33_spill] sm:$0xff] %v7846_v34  ;;  %v515_v35 = vld [vmem:[#allocation8 + $0x130] sm:$0xff]  ;;  %v524_v39 = vld [vmem:[#allocation8 + $0x178] sm:$0xff]  ;;  %v7862_v46 = vpack.c.bf16 %v522_v37, %v518_v36 }
  0x82   :  { %5453 = vmatprep.subr.bf16.mxu1 %v7806_v57  ;;  %282 = vmatprep.mubr.f32.mxu0 %v9429_v0  ;;  %v7853_v41 = vld [vmem:[%s9418_s1] sm:$0xf]  ;;  %9687 = vst [vmem:[#allocation34_spill] sm:$0xff] %v7856_v42  ;;  %v7860_v45 = vpack.c.bf16 %v515_v35, %v511_v33  ;;  %v517_v47 = vld [vmem:[#allocation8 + $0x140] sm:$0xff]  ;;  %v519_v49 = vld [vmem:[#allocation8 + $0x150] sm:$0xff]  ;;  %v7866_v50 = vpack.c.bf16 %v524_v39, %v520_v38 }
  0x83   :  { %283 = vmatmul.mubr.f32.gmra.mrb[2].mxu0 %v7196_v63  ;;  %377 = vmatprep.mubr.f32.mxu1 %v9429_v0  ;;  %v109_v43 = vld [vmem:[#allocation3 + $0x20] sm:$0xf]  ;;  %9689 = vst [vmem:[#allocation36_spill] sm:$0xff] %v7862_v46  ;;  %v521_v48 = vld [vmem:[#allocation8 + $0x160] sm:$0xff]  ;;  %vm1187_vm0 = vcmp.gt.s32.totalorder %v7853_v41, 0  ;;  %v523_v52 = vld [vmem:[#allocation8 + $0x170] sm:$0xff] }
  0x84   :  { %5423 = vmatpush1.bf16.msra.mxu0 %v7809_v2  ;;  %378 = vmatmul.mubr.f32.gmra.mrb[2].mxu1 %v7196_v63  ;;  %9688 = vst [vmem:[#allocation35_spill] sm:$0xff] %v7860_v45  ;;  %9690 = vst [vmem:[#allocation37_spill] sm:$0xff] %v7866_v50  ;;  %v526_v53 = vld [vmem:[#allocation8 + $0x188] sm:$0xff]  ;;  %v528_v58 = vld [vmem:[#allocation8 + $0x198] sm:$0xff]  ;;  %v7871_v60 = vpack.c.bf16 %v521_v48, %v517_v47  ;;  %v1188_v61 = vsel %vm1187_vm0, 1, %v9427_v1  ;;  %v7876_v62 = vpack.c.bf16 %v523_v52, %v519_v49 }
  0x85   :  { %5455 = vmatpush1.bf16.msra.mxu1 %v7813_v4  ;;  %5425 = vmatprep.subr.bf16.mxu0 %v7815_v5  ;;  %v530_v56 = vld [vmem:[#allocation8 + $0x1a8] sm:$0xff]  ;;  %v532_v59 = vld [vmem:[#allocation8 + $0x1b8] sm:$0xff]  ;;  %v525_v3 = vld [vmem:[#allocation8 + $0x180] sm:$0xff]  ;;  %vm1694_vm1 = vcmp.gt.s32.totalorder %v7853_v41, 1  ;;  %vm3215_vm2 = vcmp.gt.s32.totalorder %v7853_v41, 4  ;;  %vm4229_vm3 = vcmp.gt.s32.totalorder %v7853_v41, 6 }
  0x86   :  { %5457 = vmatprep.subr.bf16.mxu1 %v7818_v8  ;;  %288 = vmatprep.mubr.f32.mxu0 %v9429_v0  ;;  %9691 = vst [vmem:[#allocation38_spill] sm:$0xff] %v7871_v60  ;;  %9692 = vst [vmem:[#allocation39_spill] sm:$0xff] %v7876_v62  ;;  %v7878_v63 = vpack.c.bf16 %v530_v56, %v526_v53  ;;  %v529_v6 = vld [vmem:[#allocation8 + $0x1a0] sm:$0xff]  ;;  %v527_v7 = vld [vmem:[#allocation8 + $0x190] sm:$0xff]  ;;  %v7882_v9 = vpack.c.bf16 %v532_v59, %v528_v58  ;;  %v1695_v19 = vsel %vm1694_vm1, 1, %v9427_v1 }
  0x87   :  { %289 = vmatmul.mubr.f32.gmra.mrb[4].mxu0 %v7197_v14  ;;  %383 = vmatprep.mubr.f32.mxu1 %v9429_v0  ;;  %v531_v10 = vld [vmem:[#allocation8 + $0x1b0] sm:$0xff]  ;;  %v534_v11 = vld [vmem:[#allocation8 + $0x1c8] sm:$0xff]  ;;  %v536_v13 = vld [vmem:[#allocation8 + $0x1d8] sm:$0xff]  ;;  %v7887_v18 = vpack.c.bf16 %v529_v6, %v525_v3  ;;  %v3216_v32 = vsel %vm3215_vm2, 1, %v9427_v1  ;;  %v4230_v35 = vsel %vm4229_vm3, 1, %v9427_v1  ;;  %vm5243_vm4 = vcmp.gt.s32.totalorder %v7853_v41, 8 }
  0x88   :  { %5427 = vmatpush1.bf16.msra.mxu0 %v7823_v15  ;;  %384 = vmatmul.mubr.f32.gmra.mrb[4].mxu1 %v7197_v14  ;;  %9693 = vst [vmem:[#allocation40_spill] sm:$0xff] %v7878_v63  ;;  %9694 = vst [vmem:[#allocation41_spill] sm:$0xff] %v7882_v9  ;;  %v538_v12 = vld [vmem:[#allocation8 + $0x1e8] sm:$0xff]  ;;  %v540_v14 = vld [vmem:[#allocation8 + $0x1f8] sm:$0xff]  ;;  %v7892_v20 = vpack.c.bf16 %v531_v10, %v527_v7  ;;  %v5244_v36 = vsel %vm5243_vm4, 1, %v9427_v1 }
  0x89   :  { %5459 = vmatpush1.bf16.msra.mxu1 %v7827_v16  ;;  %5429 = vmatprep.subr.bf16.mxu0 %v7829_v17  ;;  %9695 = vst [vmem:[#allocation42_spill] sm:$0xff] %v7887_v18  ;;  %v7894_v22 = vpack.c.bf16 %v538_v12, %v534_v11  ;;  %v533_v23 = vld [vmem:[#allocation8 + $0x1c0] sm:$0xff]  ;;  %v7898_v25 = vpack.c.bf16 %v540_v14, %v536_v13  ;;  %v535_v26 = vld [vmem:[#allocation8 + $0x1d0] sm:$0xff]  ;;  %v606_v37 = vld [vmem:[#allocation11 + $0x8] sm:$0xff] }
  0x8a   :  { %5461 = vmatprep.subr.bf16.mxu1 %v7832_v21  ;;  %294 = vmatprep.mubr.f32.mxu0 %v9429_v0  ;;  %9696 = vst [vmem:[#allocation43_spill] sm:$0xff] %v7892_v20  ;;  %v537_v24 = vld [vmem:[#allocation8 + $0x1e0] sm:$0xff]  ;;  %v610_v38 = vld [vmem:[#allocation11 + $0x28] sm:$0xff]  ;;  %v608_v39 = vld [vmem:[#allocation11 + $0x18] sm:$0xff] }
  0x8b   :  { %295 = vmatmul.mubr.f32.gmra.mrb[6].mxu0 %v7198_v27  ;;  %389 = vmatprep.mubr.f32.mxu1 %v9429_v0  ;;  %9697 = vst [vmem:[#allocation44_spill] sm:$0xff] %v7894_v22  ;;  %9698 = vst [vmem:[#allocation45_spill] sm:$0xff] %v7898_v25  ;;  %v7901_v31 = vpack.c.bf16 %v537_v24, %v533_v23  ;;  %v612_v47 = vld [vmem:[#allocation11 + $0x38] sm:$0xff]  ;;  %v605_v48 = vld [vmem:[#allocation11] sm:$0xff] }
  0x8c   :  { %5431 = vmatpush1.bf16.msra.mxu0 %v7837_v28  ;;  %390 = vmatmul.mubr.f32.gmra.mrb[6].mxu1 %v7198_v27  ;;  %v539_v27 = vld [vmem:[#allocation8 + $0x1f0] sm:$0xff]  ;;  %v609_v41 = vld [vmem:[#allocation11 + $0x20] sm:$0xff]  ;;  %v7921_v49 = vpack.c.bf16 %v612_v47, %v608_v39  ;;  %v614_v59 = vld [vmem:[#allocation11 + $0x48] sm:$0xff] }
  0x8d   :  { %5463 = vmatpush1.bf16.msra.mxu1 %v7841_v29  ;;  %5433 = vmatprep.subr.bf16.mxu0 %v7843_v30  ;;  %9699 = vst [vmem:[#allocation46_spill] sm:$0xff] %v7901_v31  ;;  %v7906_v33 = vpack.c.bf16 %v539_v27, %v535_v26  ;;  %v7923_v52 = vpack.c.bf16 %v609_v41, %v605_v48  ;;  %v607_v53 = vld [vmem:[#allocation11 + $0x10] sm:$0xff]  ;;  %v616_v3 = vld [vmem:[#allocation11 + $0x58] sm:$0xff]  ;;  %v613_v10 = vld [vmem:[#allocation11 + $0x40] sm:$0xff] }
  0x8e   :  { %5465 = vmatprep.subr.bf16.mxu1 %v7846_v34  ;;  %300 = vmatprep.mubr.f32.mxu0 %v9429_v0  ;;  %9702 = vst [vmem:[#allocation49_spill] sm:$0xff] %v7921_v49  ;;  %v611_v56 = vld [vmem:[#allocation11 + $0x30] sm:$0xff]  ;;  %v620_v7 = vld [vmem:[#allocation11 + $0x78] sm:$0xff]  ;;  %v617_v11 = vld [vmem:[#allocation11 + $0x60] sm:$0xff] }
  0x8f   :  { %301 = vmatmul.mubr.f32.gmra.mrb[8].mxu0 %v109_v43  ;;  %395 = vmatprep.mubr.f32.mxu1 %v9429_v0  ;;  %9700 = vst [vmem:[#allocation47_spill] sm:$0xff] %v7906_v33  ;;  %9703 = vst [vmem:[#allocation50_spill] sm:$0xff] %v7923_v52  ;;  %v7926_v58 = vpack.c.bf16 %v611_v56, %v607_v53  ;;  %v7933_v12 = vpack.c.bf16 %v620_v7, %v616_v3  ;;  %v615_v14 = vld [vmem:[#allocation11 + $0x50] sm:$0xff]  ;;  %v622_v24 = vld [vmem:[#allocation11 + $0x88] sm:$0xff] }
  0x90   :  { %5435 = vmatpush1.bf16.msra.mxu0 %v7856_v42  ;;  %396 = vmatmul.mubr.f32.gmra.mrb[8].mxu1 %v109_v43  ;;  %v7919_v43 = vpack.c.bf16 %v610_v38, %v606_v37  ;;  %v7935_v13 = vpack.c.bf16 %v617_v11, %v613_v10  ;;  %v626_v26 = vld [vmem:[#allocation11 + $0xa8] sm:$0xff]  ;;  %v624_v27 = vld [vmem:[#allocation11 + $0x98] sm:$0xff]  ;;  %v625_v37 = vld [vmem:[#allocation11 + $0xa0] sm:$0xff] }
  0x91   :  { %5467 = vmatpush1.bf16.msra.mxu1 %v7860_v45  ;;  %5437 = vmatprep.subr.bf16.mxu0 %v7862_v46  ;;  %9704 = vst [vmem:[#allocation51_spill] sm:$0xff] %v7926_v58  ;;  %9706 = vst [vmem:[#allocation53_spill] sm:$0xff] %v7933_v12  ;;  %v623_v47 = vld [vmem:[#allocation11 + $0x90] sm:$0xff]  ;;  %v630_v53 = vld [vmem:[#allocation11 + $0xc8] sm:$0xff] }
  0x92   :  { %5469 = vmatprep.subr.bf16.mxu1 %v7866_v50  ;;  %736 = vmatprep.mubr.f32.mxu0 %v9429_v0  ;;  %9701 = vst [vmem:[#allocation48_spill] sm:$0xff] %v7919_v43  ;;  %9707 = vst [vmem:[#allocation54_spill] sm:$0xff] %v7935_v13  ;;  %v627_v48 = vld [vmem:[#allocation11 + $0xb0] sm:$0xff]  ;;  %v634_v56 = vld [vmem:[#allocation11 + $0xe8] sm:$0xff] }
  0x93   :  { %807 = vmatprep.mubr.f32.mxu1 %v9429_v0  ;;  %1190 = vperm.xlu0 %7193, %v1188_v61   ;;  %v618_v61 = vld [vmem:[#allocation11 + $0x68] sm:$0xff]  ;;  %v7950_v41 = vpack.c.bf16 %v627_v48, %v623_v47  ;;  %v636_v3 = vld [vmem:[#allocation11 + $0xf8] sm:$0xff]  ;;  %v629_v7 = vld [vmem:[#allocation11 + $0xc0] sm:$0xff] }
  0x94   :  { %5439 = vmatpush1.bf16.msra.mxu0 %v7871_v60  ;;  %v7931_v6 = vpack.c.bf16 %v618_v61, %v614_v59  ;;  %v632_v59 = vld [vmem:[#allocation11 + $0xd8] sm:$0xff]  ;;  %v7955_v61 = vpack.c.bf16 %v634_v56, %v630_v53  ;;  %v633_v10 = vld [vmem:[#allocation11 + $0xe0] sm:$0xff] }
  0x95   :  { %5471 = vmatpush1.bf16.msra.mxu1 %v7876_v62  ;;  %5441 = vmatprep.subr.bf16.mxu0 %v7878_v63  ;;  %9712 = vst [vmem:[#allocation59_spill] sm:$0xff] %v7950_v41  ;;  %v7957_v11 = vpack.c.bf16 %v636_v3, %v632_v59  ;;  %v644_v47 = vld [vmem:[#allocation11 + $0x138] sm:$0xff]  ;;  %v637_v48 = vld [vmem:[#allocation11 + $0x100] sm:$0xff]  ;;  %v639_v3 = vld [vmem:[#allocation11 + $0x110] sm:$0xff] }
  0x96   :  { %5473 = vmatprep.subr.bf16.mxu1 %v7882_v9  ;;  %9705 = vst [vmem:[#allocation52_spill] sm:$0xff] %v7931_v6  ;;  %9713 = vst [vmem:[#allocation60_spill] sm:$0xff] %v7955_v61  ;;  %v641_v53 = vld [vmem:[#allocation11 + $0x120] sm:$0xff] }
  0x97   :  { %1697 = vperm.xlu0 %7193, %v1695_v19   ;;  %v619_v19 = vld [vmem:[#allocation11 + $0x70] sm:$0xff]  ;;  %9714 = vst [vmem:[#allocation61_spill] sm:$0xff] %v7957_v11  ;;  %v7971_v59 = vpack.c.bf16 %v641_v53, %v637_v48  ;;  %v649_v48 = vld [vmem:[#allocation11 + $0x160] sm:$0xff] }
  0x98   :  { %5443 = vmatpush1.bf16.msra.mxu0 %v7887_v18  ;;  %v7938_v23 = vpack.c.bf16 %v619_v19, %v615_v14  ;;  %v7959_v14 = vpack.c.bf16 %v633_v10, %v629_v7  ;;  %v631_v19 = vld [vmem:[#allocation11 + $0xd0] sm:$0xff] }
  0x99   :  { %5475 = vmatpush1.bf16.msra.mxu1 %v7892_v20  ;;  %5445 = vmatprep.subr.bf16.mxu0 %v7894_v22  ;;  %9719 = vst [vmem:[#allocation66_spill] sm:$0xff] %v7971_v59  ;;  %v643_v7 = vld [vmem:[#allocation11 + $0x130] sm:$0xff] }
  0x9a   :  { %5477 = vmatprep.subr.bf16.mxu1 %v7898_v25  ;;  %9708 = vst [vmem:[#allocation55_spill] sm:$0xff] %v7938_v23  ;;  %9715 = vst [vmem:[#allocation62_spill] sm:$0xff] %v7959_v14  ;;  %v7974_v10 = vpack.c.bf16 %v643_v7, %v639_v3  ;;  %v647_v3 = vld [vmem:[#allocation11 + $0x150] sm:$0xff] }
  0x9b   :  { %3218 = vperm.xlu0 %7193, %v3216_v32   ;;  %v7943_v32 = vpack.c.bf16 %v626_v26, %v622_v24  ;;  %v635_v24 = vld [vmem:[#allocation11 + $0xf0] sm:$0xff] }
  0x9c   :  { %5447 = vmatpush1.bf16.msra.mxu0 %v7901_v31  ;;  %v7962_v26 = vpack.c.bf16 %v635_v24, %v631_v19  ;;  %9720 = vst [vmem:[#allocation67_spill] sm:$0xff] %v7974_v10  ;;  %v646_v19 = vld [vmem:[#allocation11 + $0x148] sm:$0xff]  ;;  %v651_v7 = vld [vmem:[#allocation11 + $0x170] sm:$0xff] }
  0x9d   :  { %5479 = vmatpush1.bf16.msra.mxu1 %v7906_v33  ;;  %5481 = vmatprep.subr.bf16.mxu0 %v7919_v43  ;;  %9709 = vst [vmem:[#allocation56_spill] sm:$0xff] %v7943_v32  ;;  %v650_v24 = vld [vmem:[#allocation11 + $0x168] sm:$0xff] }
  0x9e   :  { %5513 = vmatprep.subr.bf16.mxu1 %v7921_v49  ;;  %9716 = vst [vmem:[#allocation63_spill] sm:$0xff] %v7962_v26 }
  0x9f   :  { %737 = vmatmul.mubr.f32.vlgmr.msra.gmra.mrb[10].mxu0 %v9429_v0  ;;  %4232 = vperm.xlu0 %7193, %v4230_v35   ;;  %v628_v35 = vld [vmem:[#allocation11 + $0xb8] sm:$0xff] }
  0xa0   :  { %808 = vmatmul.mubr.f32.vlgmr.msra.gmra.mrb[10].mxu1 %v9429_v0  ;;  %918 = vmatprep.mubr.f32.mxu0 %v9429_v0  ;;  %v7945_v38 = vpack.c.bf16 %v628_v35, %v624_v27  ;;  %v638_v27 = vld [vmem:[#allocation11 + $0x108] sm:$0xff] }
  0xa1   :  { %989 = vmatprep.mubr.f32.mxu1 %v9429_v0  ;;  %5483 = vmatpush1.bf16.msra.mxu0 %v7923_v52  ;;  %v642_v35 = vld [vmem:[#allocation11 + $0x128] sm:$0xff]  ;;  %v7986_v0 = vpack.c.bf16 %v651_v7, %v647_v3  ;;  %v655_v3 = vld [vmem:[#allocation11 + $0x190] sm:$0xff] }
  0xa2   :  { %5515 = vmatpush1.bf16.msra.mxu1 %v7926_v58  ;;  %5485 = vmatprep.subr.bf16.mxu0 %v7931_v6  ;;  %9710 = vst [vmem:[#allocation57_spill] sm:$0xff] %v7945_v38  ;;  %v659_v7 = vld [vmem:[#allocation11 + $0x1b0] sm:$0xff] }
  0xa3   :  { %5246 = vperm.xlu0 %7193, %v5244_v36   ;;  %5517 = vmatprep.subr.bf16.mxu1 %v7933_v12  ;;  %v621_v36 = vld [vmem:[#allocation11 + $0x80] sm:$0xff]  ;;  %9724 = vst [vmem:[#allocation71_spill] sm:$0xff] %v7986_v0 }
  0xa4   :  { %v7947_v39 = vpack.c.bf16 %v625_v37, %v621_v36  ;;  %v640_v36 = vld [vmem:[#allocation11 + $0x118] sm:$0xff]  ;;  %v7967_v37 = vpack.c.bf16 %v642_v35, %v638_v27  ;;  %v7979_v35 = vpack.c.bf16 %v650_v24, %v646_v19  ;;  %v658_v19 = vld [vmem:[#allocation11 + $0x1a8] sm:$0xff] }
  0xa5   :  { %5487 = vmatpush1.bf16.msra.mxu0 %v7935_v13  ;;  %v7969_v56 = vpack.c.bf16 %v644_v47, %v640_v36  ;;  %v648_v27 = vld [vmem:[#allocation11 + $0x158] sm:$0xff]  ;;  %v645_v47 = vld [vmem:[#allocation11 + $0x140] sm:$0xff] }
  0xa6   :  { %5519 = vmatpush1.bf16.msra.mxu1 %v7938_v23  ;;  %9711 = vst [vmem:[#allocation58_spill] sm:$0xff] %v7947_v39  ;;  %5489 = vmatprep.subr.bf16.mxu0 %v7943_v32  ;;  %9717 = vst [vmem:[#allocation64_spill] sm:$0xff] %v7967_v37  ;;  %v652_v36 = vld [vmem:[#allocation11 + $0x178] sm:$0xff]  ;;  %v7983_v1 = vpack.c.bf16 %v649_v48, %v645_v47  ;;  %v657_v47 = vld [vmem:[#allocation11 + $0x1a0] sm:$0xff] }
  0xa7   :  { %5521 = vmatprep.subr.bf16.mxu1 %v7945_v38  ;;  %9718 = vst [vmem:[#allocation65_spill] sm:$0xff] %v7969_v56  ;;  %9721 = vst [vmem:[#allocation68_spill] sm:$0xff] %v7979_v35  ;;  %v7981_v53 = vpack.c.bf16 %v652_v36, %v648_v27  ;;  %v656_v24 = vld [vmem:[#allocation11 + $0x198] sm:$0xff]  ;;  %v653_v36 = vld [vmem:[#allocation11 + $0x180] sm:$0xff] }
  0xa8   :  { %9723 = vst [vmem:[#allocation70_spill] sm:$0xff] %v7983_v1  ;;  %v660_v27 = vld [vmem:[#allocation11 + $0x1b8] sm:$0xff] }
  0xa9   :  { %5491 = vmatpush1.bf16.msra.mxu0 %v7947_v39  ;;  %9722 = vst [vmem:[#allocation69_spill] sm:$0xff] %v7981_v53  ;;  %v7993_v48 = vpack.c.bf16 %v660_v27, %v656_v24  ;;  %v668_v24 = vld [vmem:[#allocation11 + $0x1f8] sm:$0xff]  ;;  %v661_v27 = vld [vmem:[#allocation11 + $0x1c0] sm:$0xff] }
  0xaa   :  { %5523 = vmatpush1.bf16.msra.mxu1 %v7950_v41  ;;  %5493 = vmatprep.subr.bf16.mxu0 %v7955_v61 }
  0xab   :  { %5525 = vmatprep.subr.bf16.mxu1 %v7957_v11  ;;  %9726 = vst [vmem:[#allocation73_spill] sm:$0xff] %v7993_v48 }
  0xad   :  { %5495 = vmatpush1.bf16.msra.mxu0 %v7959_v14  ;;  %v596_v14 = vld [vmem:[#allocation9 + $0x1b8] sm:$0xff] }
  0xae   :  { %5527 = vmatpush1.bf16.msra.mxu1 %v7962_v26  ;;  %5497 = vmatprep.subr.bf16.mxu0 %v7967_v37  ;;  %v594_v26 = vld [vmem:[#allocation9 + $0x1a8] sm:$0xff] }
  0xaf   :  { %5529 = vmatprep.subr.bf16.mxu1 %v7969_v56  ;;  %v7995_v56 = vpack.c.bf16 %v657_v47, %v653_v36  ;;  %v665_v36 = vld [vmem:[#allocation11 + $0x1e0] sm:$0xff] }
  0xb1   :  { %5499 = vmatpush1.bf16.msra.mxu0 %v7971_v59  ;;  %9727 = vst [vmem:[#allocation74_spill] sm:$0xff] %v7995_v56 }
  0xb2   :  { %5531 = vmatpush1.bf16.msra.mxu1 %v7974_v10  ;;  %5501 = vmatprep.subr.bf16.mxu0 %v7979_v35  ;;  %v654_v10 = vld [vmem:[#allocation11 + $0x188] sm:$0xff]  ;;  %v8007_v35 = vpack.c.bf16 %v665_v36, %v661_v27  ;;  %v545_v27 = vld [vmem:[#allocation9 + $0x20] sm:$0xff] }
  0xb3   :  { %5533 = vmatprep.subr.bf16.mxu1 %v7981_v53  ;;  %v7991_v59 = vpack.c.bf16 %v658_v19, %v654_v10  ;;  %v7998_v53 = vpack.c.bf16 %v659_v7, %v655_v3  ;;  %v666_v10 = vld [vmem:[#allocation11 + $0x1e8] sm:$0xff]  ;;  %v664_v19 = vld [vmem:[#allocation11 + $0x1d8] sm:$0xff]  ;;  %v663_v3 = vld [vmem:[#allocation11 + $0x1d0] sm:$0xff] }
  0xb4   :  { %v8005_v47 = vpack.c.bf16 %v668_v24, %v664_v19  ;;  %9731 = vst [vmem:[#allocation78_spill] sm:$0xff] %v8007_v35  ;;  %v667_v7 = vld [vmem:[#allocation11 + $0x1f0] sm:$0xff]  ;;  %v548_v19 = vld [vmem:[#allocation9 + $0x38] sm:$0xff]  ;;  %v541_v24 = vld [vmem:[#allocation9] sm:$0xff] }
  0xb5   :  { %5503 = vmatpush1.bf16.msra.mxu0 %v7983_v1  ;;  %9725 = vst [vmem:[#allocation72_spill] sm:$0xff] %v7991_v59  ;;  %9728 = vst [vmem:[#allocation75_spill] sm:$0xff] %v7998_v53 }
  0xb6   :  { %5535 = vmatpush1.bf16.msra.mxu1 %v7986_v0  ;;  %5505 = vmatprep.subr.bf16.mxu0 %v7991_v59  ;;  %v662_v0 = vld [vmem:[#allocation11 + $0x1c8] sm:$0xff]  ;;  %9730 = vst [vmem:[#allocation77_spill] sm:$0xff] %v8005_v47  ;;  %v8019_v59 = vpack.c.bf16 %v545_v27, %v541_v24  ;;  %v549_v24 = vld [vmem:[#allocation9 + $0x40] sm:$0xff] }
  0xb7   :  { %5537 = vmatprep.subr.bf16.mxu1 %v7993_v48  ;;  %v8003_v1 = vpack.c.bf16 %v666_v10, %v662_v0  ;;  %v8010_v48 = vpack.c.bf16 %v667_v7, %v663_v3  ;;  %v546_v0 = vld [vmem:[#allocation9 + $0x28] sm:$0xff]  ;;  %v544_v10 = vld [vmem:[#allocation9 + $0x18] sm:$0xff]  ;;  %v543_v3 = vld [vmem:[#allocation9 + $0x10] sm:$0xff] }
  0xb8   :  { %v8017_v36 = vpack.c.bf16 %v548_v19, %v544_v10  ;;  %9735 = vst [vmem:[#allocation82_spill] sm:$0xff] %v8019_v59  ;;  %v547_v7 = vld [vmem:[#allocation9 + $0x30] sm:$0xff]  ;;  %v556_v19 = vld [vmem:[#allocation9 + $0x78] sm:$0xff]  ;;  %v553_v27 = vld [vmem:[#allocation9 + $0x60] sm:$0xff] }
  0xb9   :  { %5507 = vmatpush1.bf16.msra.mxu0 %v7995_v56  ;;  %9729 = vst [vmem:[#allocation76_spill] sm:$0xff] %v8003_v1  ;;  %9732 = vst [vmem:[#allocation79_spill] sm:$0xff] %v8010_v48 }
  0xba   :  { %5539 = vmatpush1.bf16.msra.mxu1 %v7998_v53  ;;  %5509 = vmatprep.subr.bf16.mxu0 %v8003_v1  ;;  %v542_v53 = vld [vmem:[#allocation9 + $0x8] sm:$0xff]  ;;  %9734 = vst [vmem:[#allocation81_spill] sm:$0xff] %v8017_v36 }
  0xbb   :  { %5541 = vmatprep.subr.bf16.mxu1 %v8005_v47  ;;  %v8015_v56 = vpack.c.bf16 %v546_v0, %v542_v53  ;;  %v9736_v47 = vmov 0.0   ;;  %v550_v53 = vld [vmem:[#allocation9 + $0x48] sm:$0xff] }
  0xbc   :  { %v554_v0 = vld [vmem:[#allocation9 + $0x68] sm:$0xff] }
  0xbd   :  { %5511 = vmatpush1.bf16.msra.mxu0 %v8007_v35  ;;  %9733 = vst [vmem:[#allocation80_spill] sm:$0xff] %v8015_v56  ;;  %v8023_v35 = vpack.c.bf16 %v547_v7, %v543_v3  ;;  %v8029_v10 = vpack.c.bf16 %v554_v0, %v550_v53  ;;  %v8033_v3 = vpack.c.bf16 %v553_v27, %v549_v24  ;;  %v551_v7 = vld [vmem:[#allocation9 + $0x50] sm:$0xff]  ;;  %v558_v53 = vld [vmem:[#allocation9 + $0x88] sm:$0xff]  ;;  %v557_v24 = vld [vmem:[#allocation9 + $0x80] sm:$0xff] }
  0xbe   :  { %5543 = vmatpush1.bf16.msra.mxu1 %v8010_v48  ;;  %5545 = vmatprep.subr.bf16.mxu0 %v8015_v56  ;;  %v552_v48 = vld [vmem:[#allocation9 + $0x58] sm:$0xff]  ;;  %v562_v0 = vld [vmem:[#allocation9 + $0xa8] sm:$0xff]  ;;  %v561_v27 = vld [vmem:[#allocation9 + $0xa0] sm:$0xff] }
  0xbf   :  { %9737 = vst [vmem:[#allocation83_spill] sm:$0xff] %v8023_v35  ;;  %5577 = vmatprep.subr.bf16.mxu1 %v8017_v36  ;;  %9738 = vst [vmem:[#allocation84_spill] sm:$0xff] %v8029_v10  ;;  %v8031_v56 = vpack.c.bf16 %v556_v19, %v552_v48  ;;  %v555_v36 = vld [vmem:[#allocation9 + $0x70] sm:$0xff]  ;;  %v8043_v48 = vpack.c.bf16 %v562_v0, %v558_v53  ;;  %v564_v19 = vld [vmem:[#allocation9 + $0xb8] sm:$0xff]  ;;  %v8047_v37 = vpack.c.bf16 %v561_v27, %v557_v24 }
  0xc0   :  { %919 = vmatmul.mubr.f32.vlgmr.msra.gmra.mrb[12].mxu0 %v9736_v47  ;;  %9740 = vst [vmem:[#allocation86_spill] sm:$0xff] %v8033_v3  ;;  %v565_v0 = vld [vmem:[#allocation9 + $0xc0] sm:$0xff] }
  0xc1   :  { %990 = vmatmul.mubr.f32.vlgmr.msra.gmra.mrb[12].mxu1 %v9736_v47  ;;  %5547 = vmatpush1.bf16.msra.mxu0 %v8019_v59  ;;  %9739 = vst [vmem:[#allocation85_spill] sm:$0xff] %v8031_v56  ;;  %v8038_v59 = vpack.c.bf16 %v555_v36, %v551_v7  ;;  %9742 = vst [vmem:[#allocation88_spill] sm:$0xff] %v8043_v48  ;;  %v559_v36 = vld [vmem:[#allocation9 + $0x90] sm:$0xff] }
  0xc2   :  { %5579 = vmatpush1.bf16.msra.mxu1 %v8023_v35  ;;  %1060 = vmatprep.mubr.f32.mxu0 %v9736_v47  ;;  %v560_v35 = vld [vmem:[#allocation9 + $0x98] sm:$0xff]  ;;  %9744 = vst [vmem:[#allocation90_spill] sm:$0xff] %v8047_v37  ;;  %v563_v7 = vld [vmem:[#allocation9 + $0xb0] sm:$0xff] }
  0xc3   :  { %1131 = vmatprep.mubr.f32.mxu1 %v9736_v47  ;;  %5549 = vmatprep.subr.bf16.mxu0 %v8029_v10  ;;  %9741 = vst [vmem:[#allocation87_spill] sm:$0xff] %v8038_v59  ;;  %v8045_v1 = vpack.c.bf16 %v564_v19, %v560_v35  ;;  %v570_v10 = vld [vmem:[#allocation9 + $0xe8] sm:$0xff]  ;;  %v572_v35 = vld [vmem:[#allocation9 + $0xf8] sm:$0xff]  ;;  %v569_v19 = vld [vmem:[#allocation9 + $0xe0] sm:$0xff] }
  0xc4   :  { %5581 = vmatprep.subr.bf16.mxu1 %v8031_v56  ;;  %v8050_v56 = vpack.c.bf16 %v563_v7, %v559_v36  ;;  %v8059_v27 = vpack.c.bf16 %v569_v19, %v565_v0  ;;  %v567_v36 = vld [vmem:[#allocation9 + $0xd0] sm:$0xff] }
  0xc5   :  { %5551 = vmatpush1.bf16.msra.mxu0 %v8033_v3  ;;  %9743 = vst [vmem:[#allocation89_spill] sm:$0xff] %v8045_v1  ;;  %v566_v3 = vld [vmem:[#allocation9 + $0xc8] sm:$0xff]  ;;  %v571_v7 = vld [vmem:[#allocation9 + $0xf0] sm:$0xff] }
  0xc6   :  { %5583 = vmatpush1.bf16.msra.mxu1 %v8038_v59  ;;  %5553 = vmatprep.subr.bf16.mxu0 %v8043_v48  ;;  %9745 = vst [vmem:[#allocation91_spill] sm:$0xff] %v8050_v56  ;;  %v568_v59 = vld [vmem:[#allocation9 + $0xd8] sm:$0xff]  ;;  %v8055_v53 = vpack.c.bf16 %v570_v10, %v566_v3  ;;  %9748 = vst [vmem:[#allocation94_spill] sm:$0xff] %v8059_v27  ;;  %v578_v48 = vld [vmem:[#allocation9 + $0x128] sm:$0xff] }
  0xc7   :  { %5585 = vmatprep.subr.bf16.mxu1 %v8045_v1  ;;  %v8057_v24 = vpack.c.bf16 %v572_v35, %v568_v59  ;;  %v8062_v1 = vpack.c.bf16 %v571_v7, %v567_v36  ;;  %v580_v59 = vld [vmem:[#allocation9 + $0x138] sm:$0xff]  ;;  %v573_v3 = vld [vmem:[#allocation9 + $0x100] sm:$0xff]  ;;  %v575_v36 = vld [vmem:[#allocation9 + $0x110] sm:$0xff] }
  0xc8   :  { %9746 = vst [vmem:[#allocation92_spill] sm:$0xff] %v8055_v53  ;;  %v577_v35 = vld [vmem:[#allocation9 + $0x120] sm:$0xff]  ;;  %v579_v7 = vld [vmem:[#allocation9 + $0x130] sm:$0xff] }
  0xc9   :  { %5555 = vmatpush1.bf16.msra.mxu0 %v8047_v37  ;;  %9747 = vst [vmem:[#allocation93_spill] sm:$0xff] %v8057_v24  ;;  %9749 = vst [vmem:[#allocation95_spill] sm:$0xff] %v8062_v1  ;;  %v574_v37 = vld [vmem:[#allocation9 + $0x108] sm:$0xff]  ;;  %v8071_v19 = vpack.c.bf16 %v577_v35, %v573_v3 }
  0xca   :  { %5587 = vmatpush1.bf16.msra.mxu1 %v8050_v56  ;;  %5557 = vmatprep.subr.bf16.mxu0 %v8055_v53  ;;  %v576_v56 = vld [vmem:[#allocation9 + $0x118] sm:$0xff]  ;;  %v8067_v10 = vpack.c.bf16 %v578_v48, %v574_v37  ;;  %v586_v53 = vld [vmem:[#allocation9 + $0x168] sm:$0xff]  ;;  %v581_v48 = vld [vmem:[#allocation9 + $0x140] sm:$0xff] }
  0xcb   :  { %5589 = vmatprep.subr.bf16.mxu1 %v8057_v24  ;;  %v8069_v0 = vpack.c.bf16 %v580_v59, %v576_v56  ;;  %9752 = vst [vmem:[#allocation98_spill] sm:$0xff] %v8071_v19  ;;  %v8074_v24 = vpack.c.bf16 %v579_v7, %v575_v36  ;;  %v588_v56 = vld [vmem:[#allocation9 + $0x178] sm:$0xff]  ;;  %v585_v59 = vld [vmem:[#allocation9 + $0x160] sm:$0xff]  ;;  %v583_v36 = vld [vmem:[#allocation9 + $0x150] sm:$0xff] }
  0xcc   :  { %9750 = vst [vmem:[#allocation96_spill] sm:$0xff] %v8067_v10  ;;  %v8083_v35 = vpack.c.bf16 %v585_v59, %v581_v48  ;;  %v587_v7 = vld [vmem:[#allocation9 + $0x170] sm:$0xff] }
  0xcd   :  { %5559 = vmatpush1.bf16.msra.mxu0 %v8059_v27  ;;  %9751 = vst [vmem:[#allocation97_spill] sm:$0xff] %v8069_v0  ;;  %9753 = vst [vmem:[#allocation99_spill] sm:$0xff] %v8074_v24  ;;  %v582_v27 = vld [vmem:[#allocation9 + $0x148] sm:$0xff]  ;;  %v591_v48 = vld [vmem:[#allocation9 + $0x190] sm:$0xff] }
  0xce   :  { %5591 = vmatpush1.bf16.msra.mxu1 %v8062_v1  ;;  %5561 = vmatprep.subr.bf16.mxu0 %v8067_v10  ;;  %v584_v1 = vld [vmem:[#allocation9 + $0x158] sm:$0xff]  ;;  %v8079_v37 = vpack.c.bf16 %v586_v53, %v582_v27  ;;  %9756 = vst [vmem:[#allocation102_spill] sm:$0xff] %v8083_v35  ;;  %v590_v10 = vld [vmem:[#allocation9 + $0x188] sm:$0xff] }
  0xcf   :  { %5593 = vmatprep.subr.bf16.mxu1 %v8069_v0  ;;  %v8081_v3 = vpack.c.bf16 %v588_v56, %v584_v1  ;;  %v8086_v0 = vpack.c.bf16 %v587_v7, %v583_v36  ;;  %v8089_v53 = vpack.c.bf16 %v594_v26, %v590_v10  ;;  %v589_v1 = vld [vmem:[#allocation9 + $0x180] sm:$0xff]  ;;  %v595_v36 = vld [vmem:[#allocation9 + $0x1b0] sm:$0xff]  ;;  %v598_v7 = vld [vmem:[#allocation9 + $0x1c8] sm:$0xff] }
  0xd0   :  { %9754 = vst [vmem:[#allocation100_spill] sm:$0xff] %v8079_v37  ;;  %v593_v56 = vld [vmem:[#allocation9 + $0x1a0] sm:$0xff]  ;;  %v8099_v26 = vpack.c.bf16 %v595_v36, %v591_v48  ;;  %v600_v10 = vld [vmem:[#allocation9 + $0x1d8] sm:$0xff] }
  0xd1   :  { %5563 = vmatpush1.bf16.msra.mxu0 %v8071_v19  ;;  %9755 = vst [vmem:[#allocation101_spill] sm:$0xff] %v8081_v3  ;;  %9757 = vst [vmem:[#allocation103_spill] sm:$0xff] %v8086_v0  ;;  %v592_v19 = vld [vmem:[#allocation9 + $0x198] sm:$0xff]  ;;  %v8095_v59 = vpack.c.bf16 %v593_v56, %v589_v1  ;;  %v603_v1 = vld [vmem:[#allocation9 + $0x1f0] sm:$0xff] }
  0xd2   :  { %5595 = vmatpush1.bf16.msra.mxu1 %v8074_v24  ;;  %5565 = vmatprep.subr.bf16.mxu0 %v8079_v37  ;;  %9758 = vst [vmem:[#allocation104_spill] sm:$0xff] %v8089_v53  ;;  %v8091_v27 = vpack.c.bf16 %v596_v14, %v592_v19  ;;  %v602_v37 = vld [vmem:[#allocation9 + $0x1e8] sm:$0xff]  ;;  %9761 = vst [vmem:[#allocation107_spill] sm:$0xff] %v8099_v26  ;;  %v604_v19 = vld [vmem:[#allocation9 + $0x1f8] sm:$0xff] }
  0xd3   :  { %5597 = vmatprep.subr.bf16.mxu1 %v8081_v3  ;;  %9760 = vst [vmem:[#allocation106_spill] sm:$0xff] %v8095_v59  ;;  %v8101_v14 = vpack.c.bf16 %v602_v37, %v598_v7  ;;  %v597_v3 = vld [vmem:[#allocation9 + $0x1c0] sm:$0xff]  ;;  %v8103_v24 = vpack.c.bf16 %v604_v19, %v600_v10  ;;  %v176_v37 = vlaneseq }
  0xd4   :  { %9759 = vst [vmem:[#allocation105_spill] sm:$0xff] %v8091_v27 }
  0xd5   :  { %5567 = vmatpush1.bf16.msra.mxu0 %v8083_v35  ;;  %9762 = vst [vmem:[#allocation108_spill] sm:$0xff] %v8101_v14  ;;  %9763 = vst [vmem:[#allocation109_spill] sm:$0xff] %v8103_v24  ;;  %v601_v35 = vld [vmem:[#allocation9 + $0x1e0] sm:$0xff]  ;;  %v8117_v48 = vshrl.u32 %v176_v37, 7 }
  0xd6   :  { %5599 = vmatpush1.bf16.msra.mxu1 %v8086_v0  ;;  %5569 = vmatprep.subr.bf16.mxu0 %v8089_v53  ;;  %v599_v0 = vld [vmem:[#allocation9 + $0x1d0] sm:$0xff]  ;;  %v8107_v56 = vpack.c.bf16 %v601_v35, %v597_v3 }
  0xd7   :  { %5601 = vmatprep.subr.bf16.mxu1 %v8091_v27  ;;  %v8109_v53 = vpack.c.bf16 %v603_v1, %v599_v0  ;;  %9766 = vst [vmem:[#allocation112_spill] sm:$0xff] %v8117_v48  ;;  %v9531_v3 = vsub.s32 0, %v8117_v48  ;;  %v174_v0 = vld [vmem:[%s9421_s4] sm:$0xf]  ;;  %v9532_v35 = vsub.s32 1, %v8117_v48  ;;  %v9533_v36 = vsub.s32 2, %v8117_v48 }
  0xd8   :  { %9764 = vst [vmem:[#allocation110_spill] sm:$0xff] %v8107_v56  ;;  %v9536_v7 = vsub.s32 3, %v8117_v48 }
  0xd9   :  { %5571 = vmatpush1.bf16.msra.mxu0 %v8095_v59  ;;  %9765 = vst [vmem:[#allocation111_spill] sm:$0xff] %v8109_v53  ;;  %v179_v10 = vrot.slane %v174_v0, %v9531_v3  ;;  %v183_v19 = vrot.slane %v174_v0, %v9532_v35  ;;  %v187_v1 = vrot.slane %v174_v0, %v9533_v36 }
  0xda   :  { %5603 = vmatpush1.bf16.msra.mxu1 %v8099_v26  ;;  %5573 = vmatprep.subr.bf16.mxu0 %v8101_v14  ;;  %v191_v37 = vrot.slane %v174_v0, %v9536_v7 }
  0xdb   :  { %5605 = vmatprep.subr.bf16.mxu1 %v8103_v24 }
  0xdd   :  { %5575 = vmatpush1.bf16.msra.mxu0 %v8107_v56 }
  0xde   :  { %5607 = vmatpush1.bf16.msra.mxu1 %v8109_v53  ;;  %5609 = vmatprep.subr.bf16.mxu0 %v7794_v40 }
  0xdf   :  { %5641 = vmatprep.subr.bf16.mxu1 %v7796_v44 }
 0x152   :  { %v278_v44 = vpop.f32.mrb[0].mxu0 }
 0x153   :  { %v8134_v40 = vadd.f32 %v278_v44, %v179_v10  ;;  %v280_v53 = vpop.f32.mrb[1].mxu0  ;;  %v373_v56 = vpop.f32.mrb[0].mxu1 }
 0x154   :  { %v8136_v24 = vadd.f32 %v280_v53, %v183_v19  ;;  %v8138_v14 = vadd.f32 %v373_v56, %v187_v1  ;;  %v375_v26 = vpop.f32.mrb[1].mxu1 }
 0x155   :  { %9767 = vst [vmem:[#allocation113_spill] sm:$0xff] %v8134_v40  ;;  %v8140_v3 = vadd.f32 %v375_v26, %v191_v37 }
 0x156   :  { %9768 = vst [vmem:[#allocation114_spill] sm:$0xff] %v8136_v24  ;;  %9769 = vst [vmem:[#allocation115_spill] sm:$0xff] %v8138_v14  ;;  %v422_v35 = vcombine.low %v8134_v40, %v8136_v24  ;;  %v284_v59 = vpop.f32.mrb[2].mxu0 }
 0x157   :  { %9770 = vst [vmem:[#allocation116_spill] sm:$0xff] %v8140_v3  ;;  %v8146_v0 = vadd.f32 %v284_v59, %v179_v10  ;;  %v286_v44 = vpop.f32.mrb[3].mxu0  ;;  %v424_v7 = vcombine.low %v8138_v14, %v8140_v3  ;;  %v379_v56 = vpop.f32.mrb[2].mxu1 }
 0x158   :  { %v8152_v27 = vadd.f32 %v286_v44, %v183_v19  ;;  %v8154_v26 = vadd.f32 %v379_v56, %v187_v1  ;;  %v381_v48 = vpop.f32.mrb[3].mxu1 }
 0x159   :  { %9771 = vst [vmem:[#allocation117_spill] sm:$0xff] %v8146_v0  ;;  %v8156_v11 = vadd.f32 %v381_v48, %v191_v37 }
 0x15a   :  { %9772 = vst [vmem:[#allocation118_spill] sm:$0xff] %v8152_v27  ;;  %9773 = vst [vmem:[#allocation119_spill] sm:$0xff] %v8154_v26  ;;  %v290_v24 = vpop.f32.mrb[4].mxu0 }
 0x15b   :  { %9774 = vst [vmem:[#allocation120_spill] sm:$0xff] %v8156_v11  ;;  %v8162_v40 = vadd.f32 %v290_v24, %v179_v10  ;;  %v292_v61 = vpop.f32.mrb[5].mxu0  ;;  %v385_v56 = vpop.f32.mrb[4].mxu1 }
 0x15c   :  { %v8168_v3 = vadd.f32 %v292_v61, %v183_v19  ;;  %v8170_v48 = vadd.f32 %v385_v56, %v187_v1  ;;  %v387_v14 = vpop.f32.mrb[5].mxu1 }
 0x15d   :  { %9775 = vst [vmem:[#allocation121_spill] sm:$0xff] %v8162_v40  ;;  %v8172_v36 = vadd.f32 %v387_v14, %v191_v37 }
 0x15e   :  { %9776 = vst [vmem:[#allocation122_spill] sm:$0xff] %v8168_v3  ;;  %9777 = vst [vmem:[#allocation123_spill] sm:$0xff] %v8170_v48  ;;  %v296_v27 = vpop.f32.mrb[6].mxu0 }
 0x15f   :  { %9778 = vst [vmem:[#allocation124_spill] sm:$0xff] %v8172_v36  ;;  %v8178_v0 = vadd.f32 %v296_v27, %v179_v10  ;;  %v298_v53 = vpop.f32.mrb[7].mxu0  ;;  %v391_v56 = vpop.f32.mrb[6].mxu1 }
 0x160   :  { %v8184_v11 = vadd.f32 %v298_v53, %v183_v19  ;;  %v8186_v14 = vadd.f32 %v391_v56, %v187_v1  ;;  %v393_v26 = vpop.f32.mrb[7].mxu1 }
 0x161   :  { %9779 = vst [vmem:[#allocation125_spill] sm:$0xff] %v8178_v0  ;;  %v8188_v59 = vadd.f32 %v393_v26, %v191_v37 }
 0x162   :  { %9780 = vst [vmem:[#allocation126_spill] sm:$0xff] %v8184_v11  ;;  %9781 = vst [vmem:[#allocation127_spill] sm:$0xff] %v8186_v14  ;;  %v302_v3 = vpop.f32.mrb[8].mxu0 }
 0x163   :  { %9782 = vst [vmem:[#allocation128_spill] sm:$0xff] %v8188_v59  ;;  %v8194_v40 = vadd.f32 %v302_v3, %v179_v10  ;;  %v304_v44 = vpop.f32.mrb[9].mxu0  ;;  %v397_v56 = vpop.f32.mrb[8].mxu1 }
 0x164   :  { %v8200_v36 = vadd.f32 %v304_v44, %v183_v19  ;;  %v8202_v26 = vadd.f32 %v397_v56, %v187_v1  ;;  %v399_v48 = vpop.f32.mrb[9].mxu1 }
 0x165   :  { %9783 = vst [vmem:[#allocation129_spill] sm:$0xff] %v8194_v40  ;;  %v8204_v24 = vadd.f32 %v399_v48, %v191_v37  ;;  %v9805_v40 = vld [vmem:[#allocation77_spill] sm:$0xff] }
 0x166   :  { %9784 = vst [vmem:[#allocation130_spill] sm:$0xff] %v8200_v36  ;;  %9785 = vst [vmem:[#allocation131_spill] sm:$0xff] %v8202_v26  ;;  %v9804_v26 = vld [vmem:[#allocation76_spill] sm:$0xff] }
 0x167   :  { %9786 = vst [vmem:[#allocation132_spill] sm:$0xff] %v8204_v24  ;;  %v9803_v24 = vld [vmem:[#allocation75_spill] sm:$0xff] }
 0x172   :  { %v738_v10 = vpop.f32.mrb[10].mxu0 }
 0x173   :  { %v809_v11 = vpop.f32.mrb[10].mxu1  ;;  %v740_v61 = vpop.f32.mrb[11].mxu0 }
 0x174   :  { %v818_v0 = vcombine.low %v738_v10, %v740_v61  ;;  %v811_v41 = vpop.f32.mrb[11].mxu1 }
 0x175   :  { %v819_v53 = vcombine.low %v809_v11, %v811_v41 }
 0x176   :  { %v822_v59 = vadd.f32 %v818_v0, %v422_v35 }
 0x177   :  { %v823_v19 = vadd.f32 %v819_v53, %v424_v7 }
 0x178   :  { %v5294_v44 = vmul.f32 -1.442695, %v822_v59  ;;  %v831_v1 = vrot.slane %v822_v59, 4 }
 0x179   :  { %v841_v37 = vrot.slane %v823_v19, 4 }
 0x17a   :  { %7199 = vpow2.f32 %v5294_v44  ;;  %v5295_v56 = vmul.f32 -1.442695, %v831_v1  ;;  %v9789_v44 = vld [vmem:[#allocation61_spill] sm:$0xff]  ;;  %v9790_v1 = vld [vmem:[#allocation62_spill] sm:$0xff] }
 0x17b   :  { %v5296_v48 = vmul.f32 -1.442695, %v841_v37  ;;  %v9792_v37 = vld [vmem:[#allocation64_spill] sm:$0xff] }
 0x17c   :  { %7201 = vpow2.f32 %v5295_v56  ;;  %v9791_v56 = vld [vmem:[#allocation63_spill] sm:$0xff] }
 0x17d   :  { %7203 = vtanh.f32 %v823_v19 }
 0x17e   :  { %7205 = vpow2.f32 %v5296_v48  ;;  %v9793_v48 = vld [vmem:[#allocation65_spill] sm:$0xff] }
 0x184   :  { %v7200_v14 = vpop.eup %7199 }
 0x185   :  { %v827_v27 = vadd.f32 1.0, %v7200_v14 }
 0x186   :  { %v7202_v36 = vpop.eup %7201 }
 0x187   :  { %7207 = vrcp.f32 %v827_v27  ;;  %v836_v3 = vadd.f32 1.0, %v7202_v36  ;;  %v7204_v61 = vpop.eup %7203  ;;  %v8247_v36 = vpop.permute.xlu0 %1190  ;;  %v9787_v27 = vld [vmem:[#allocation59_spill] sm:$0xff] }
 0x188   :  { %v7206_v10 = vpop.eup %7205  ;;  %vm1192_vm5 = vcmp.eq.s32.totalorder %v8247_v36, 1 }
 0x189   :  { %7209 = vrcp.f32 %v836_v3  ;;  %v846_v7 = vadd.f32 1.0, %v7206_v10  ;;  %v9788_v3 = vld [vmem:[#allocation60_spill] sm:$0xff]  ;;  %v9795_v10 = vld [vmem:[#allocation67_spill] sm:$0xff] }
 0x18b   :  { %7211 = vrcp.f32 %v846_v7  ;;  %v9799_v7 = vld [vmem:[#allocation71_spill] sm:$0xff] }
 0x191   :  { %v7208_v41 = vpop.eup %7207 }
 0x192   :  { %v850_v11 = vmul.f32 %v7208_v41, %v7204_v61  ;;  %v9794_v61 = vld [vmem:[#allocation66_spill] sm:$0xff]  ;;  %v9796_v41 = vld [vmem:[#allocation68_spill] sm:$0xff] }
 0x193   :  { %v7210_v35 = vpop.eup %7209 }
 0x194   :  { %v849_v0 = vmul.f32 0.0, %v7210_v35  ;;  %v9798_v35 = vld [vmem:[#allocation70_spill] sm:$0xff] }
 0x195   :  { %v7212_v53 = vpop.eup %7211 }
 0x196   :  { %v8210_v59 = vadd.f32 %v850_v11, %v849_v0  ;;  %v9797_v11 = vld [vmem:[#allocation69_spill] sm:$0xff]  ;;  %v9800_v0 = vld [vmem:[#allocation72_spill] sm:$0xff] }
 0x198   :  { %7213 = vtanh.f32 %v8210_v59 }
 0x1a2   :  { %v7214_v14 = vpop.eup %7213 }
 0x1a3   :  { %v8213_v19 = vmul.f32 %v7214_v14, %v7212_v53  ;;  %v9801_v53 = vld [vmem:[#allocation73_spill] sm:$0xff]  ;;  %v9802_v14 = vld [vmem:[#allocation74_spill] sm:$0xff] }
 0x1a5   :  { %1061 = vmatmul.mubr.f32.vlgmr.msra.gmra.mrb[12].mxu0 %v8213_v19  ;;  %1132 = vmatmul.mubr.f32.vlgmr.msra.gmra.mrb[12].mxu1 %v8213_v19 }
 0x1a6   :  { %5611 = vmatpush1.bf16.msra.mxu0 %v7798_v51  ;;  %5643 = vmatpush1.bf16.msra.mxu1 %v7801_v54 }
 0x1a7   :  { %5613 = vmatprep.subr.bf16.mxu0 %v7803_v55  ;;  %5645 = vmatprep.subr.bf16.mxu1 %v7806_v57 }
 0x1a8   :  { %1264 = vmatprep.mubr.f32.mxu0 %v9736_v47  ;;  %1335 = vmatprep.mubr.f32.mxu1 %v9736_v47 }
 0x1aa   :  { %5615 = vmatpush1.bf16.msra.mxu0 %v7809_v2  ;;  %5647 = vmatpush1.bf16.msra.mxu1 %v7813_v4 }
 0x1ab   :  { %5617 = vmatprep.subr.bf16.mxu0 %v7815_v5  ;;  %5649 = vmatprep.subr.bf16.mxu1 %v7818_v8 }
 0x1ae   :  { %5619 = vmatpush1.bf16.msra.mxu0 %v7823_v15  ;;  %5651 = vmatpush1.bf16.msra.mxu1 %v7827_v16 }
 0x1af   :  { %5621 = vmatprep.subr.bf16.mxu0 %v7829_v17  ;;  %5653 = vmatprep.subr.bf16.mxu1 %v7832_v21 }
 0x1b2   :  { %5623 = vmatpush1.bf16.msra.mxu0 %v7837_v28  ;;  %5655 = vmatpush1.bf16.msra.mxu1 %v7841_v29 }
 0x1b3   :  { %5625 = vmatprep.subr.bf16.mxu0 %v7843_v30  ;;  %5657 = vmatprep.subr.bf16.mxu1 %v7846_v34 }
 0x1b6   :  { %5627 = vmatpush1.bf16.msra.mxu0 %v7856_v42  ;;  %5659 = vmatpush1.bf16.msra.mxu1 %v7860_v45 }
 0x1b7   :  { %5629 = vmatprep.subr.bf16.mxu0 %v7862_v46  ;;  %5661 = vmatprep.subr.bf16.mxu1 %v7866_v50 }
 0x1ba   :  { %5631 = vmatpush1.bf16.msra.mxu0 %v7871_v60  ;;  %5663 = vmatpush1.bf16.msra.mxu1 %v7876_v62 }
 0x1bb   :  { %5633 = vmatprep.subr.bf16.mxu0 %v7878_v63  ;;  %5665 = vmatprep.subr.bf16.mxu1 %v7882_v9 }
 0x1be   :  { %5635 = vmatpush1.bf16.msra.mxu0 %v7887_v18  ;;  %5667 = vmatpush1.bf16.msra.mxu1 %v7892_v20 }
 0x1bf   :  { %5637 = vmatprep.subr.bf16.mxu0 %v7894_v22  ;;  %5669 = vmatprep.subr.bf16.mxu1 %v7898_v25 }
 0x1c2   :  { %5639 = vmatpush1.bf16.msra.mxu0 %v7901_v31  ;;  %5671 = vmatpush1.bf16.msra.mxu1 %v7906_v33 }
 0x1c3   :  { %5673 = vmatprep.subr.bf16.mxu0 %v7919_v43  ;;  %5705 = vmatprep.subr.bf16.mxu1 %v7921_v49 }
 0x1c5   :  { %5300 = vmatmul.mubr.msk.f32.vlgmr.msra.gmra.mrb[14].mxu0 %vm1192_vm5, %v8213_v19  ;;  %5301 = vmatmul.mubr.msk.f32.vlgmr.msra.gmra.mrb[14].mxu1 %vm1192_vm5, %v8213_v19 }
 0x1c6   :  { %5675 = vmatpush1.bf16.msra.mxu0 %v7923_v52  ;;  %5707 = vmatpush1.bf16.msra.mxu1 %v7926_v58 }
 0x1c7   :  { %5677 = vmatprep.subr.bf16.mxu0 %v7931_v6  ;;  %5709 = vmatprep.subr.bf16.mxu1 %v7933_v12 }
 0x1c8   :  { %1446 = vmatprep.mubr.f32.mxu0 %v9736_v47  ;;  %1517 = vmatprep.mubr.f32.mxu1 %v9736_v47 }
 0x1ca   :  { %5679 = vmatpush1.bf16.msra.mxu0 %v7935_v13  ;;  %5711 = vmatpush1.bf16.msra.mxu1 %v7938_v23 }
 0x1cb   :  { %5681 = vmatprep.subr.bf16.mxu0 %v7943_v32  ;;  %5713 = vmatprep.subr.bf16.mxu1 %v7945_v38 }
 0x1ce   :  { %5683 = vmatpush1.bf16.msra.mxu0 %v7947_v39  ;;  %5715 = vmatpush1.bf16.msra.mxu1 %v9787_v27  ;;  %v9824_v39 = vld [vmem:[#allocation116_spill] sm:$0xff] }
 0x1cf   :  { %5685 = vmatprep.subr.bf16.mxu0 %v9788_v3  ;;  %5717 = vmatprep.subr.bf16.mxu1 %v9789_v44 }
 0x1d2   :  { %5687 = vmatpush1.bf16.msra.mxu0 %v9790_v1  ;;  %5719 = vmatpush1.bf16.msra.mxu1 %v9791_v56 }
 0x1d3   :  { %5689 = vmatprep.subr.bf16.mxu0 %v9792_v37  ;;  %5721 = vmatprep.subr.bf16.mxu1 %v9793_v48 }
 0x1d6   :  { %5691 = vmatpush1.bf16.msra.mxu0 %v9794_v61  ;;  %5723 = vmatpush1.bf16.msra.mxu1 %v9795_v10  ;;  %v9806_v10 = vld [vmem:[#allocation78_spill] sm:$0xff] }
 0x1d7   :  { %5693 = vmatprep.subr.bf16.mxu0 %v9796_v41  ;;  %5725 = vmatprep.subr.bf16.mxu1 %v9797_v11  ;;  %v9807_v41 = vld [vmem:[#allocation79_spill] sm:$0xff]  ;;  %v9808_v11 = vld [vmem:[#allocation80_spill] sm:$0xff] }
 0x1da   :  { %5695 = vmatpush1.bf16.msra.mxu0 %v9798_v35  ;;  %5727 = vmatpush1.bf16.msra.mxu1 %v9799_v7  ;;  %v9809_v35 = vld [vmem:[#allocation81_spill] sm:$0xff] }
 0x1db   :  { %5697 = vmatprep.subr.bf16.mxu0 %v9800_v0  ;;  %5729 = vmatprep.subr.bf16.mxu1 %v9801_v53  ;;  %v7487_v53 = vld [vmem:[%s9418_s1] sm:$0xf]  ;;  %s7663_s1 = smov [#allocation13]  }
 0x1dc   :  { %vm2201_vm6 = vcmp.gt.s32.totalorder %v7487_v53, 2  ;;  %vm2708_vm7 = vcmp.gt.s32.totalorder %v7487_v53, 3  ;;  %vm3722_vm8 = vcmp.gt.s32.totalorder %v7487_v53, 5  ;;  %vm4736_vm9 = vcmp.gt.s32.totalorder %v7487_v53, 7 }
 0x1de   :  { %5699 = vmatpush1.bf16.msra.mxu0 %v9802_v14  ;;  %5731 = vmatpush1.bf16.msra.mxu1 %v9803_v24  ;;  %v9810_v14 = vmov 0  }
 0x1df   :  { %5701 = vmatprep.subr.bf16.mxu0 %v9804_v26  ;;  %5733 = vmatprep.subr.bf16.mxu1 %v9805_v40  ;;  %v2202_v24 = vsel %vm2201_vm6, 1, %v9810_v14  ;;  %v2709_v26 = vsel %vm2708_vm7, 1, %v9810_v14 }
 0x1e0   :  { %2204 = vperm.xlu1 %7194, %v2202_v24   ;;  %v4737_v24 = vsel %vm4736_vm9, 1, %v9810_v14 }
 0x1e2   :  { %5703 = vmatpush1.bf16.msra.mxu0 %v9806_v10  ;;  %5735 = vmatpush1.bf16.msra.mxu1 %v9807_v41  ;;  %v669_v41 = vld [vmem:[%s9424_s7] sm:$0xf]  ;;  %s5276_s7 = sshll.u32 %s7663_s1, 4  ;;  %s5277_s7 = int_to_ptr.vmem [resolvable:$true] %s5276_s7 }
 0x1e3   :  { %5737 = vmatprep.subr.bf16.mxu0 %v9808_v11  ;;  %5769 = vmatprep.subr.bf16.mxu1 %v9809_v35  ;;  %v3723_v11 = vsel %vm3722_vm8, 1, %v9810_v14  ;;  %v9811_v35 = vld [vmem:[#allocation112_spill] sm:$0xff]  ;;  %s7598_s14 = scalar_lea.vmem %s5277_s7, 128  ;;  %p7603_p13 = scmp.lt.s32.totalorder %s5277_s7, %s5277_s7 }
 0x1e4   :  { %2711 = vperm.xlu1 %7194, %v2709_v26   ;;  %v9812_v10 = vsub.s32 0, %v9811_v35  ;;  %v9814_v0 = vsub.s32 1, %v9811_v35  ;;  %v9818_v14 = vsub.s32 2, %v9811_v35  ;;  %p7599_p12 = scmp.ne.s32.totalorder %s5277_s7, %s7598_s14  ;;  %p7604_p0 = scmp.lt.s32.totalorder %s7598_s14, %s7598_s14 }
 0x1e6   :  { %v8305_v40 = vrot.slane %v669_v41, %v9812_v10  ;;  %v8309_v7 = vrot.slane %v669_v41, %v9814_v0  ;;  %v9816_v10 = vsub.s32 3, %v9811_v35  ;;  %v8321_v3 = vrot.slane %v669_v41, %v9818_v14  ;;  %p7605_p1 = por %p7604_p0, %p7603_p13 }
 0x1e8   :  { %9813 = vst [vmem:[#allocation112_spill] sm:$0xff] %v8305_v40  ;;  %3725 = vperm.xlu1 %7194, %v3723_v11   ;;  %9815 = vst [vmem:[#allocation133_spill] sm:$0xff] %v8309_v7  ;;  %v8316_v44 = vrot.slane %v669_v41, %v9816_v10  ;;  %p7606_p2 = pnand %p7605_p1, %p7599_p12 }
 0x1e9   :  { %9819 = vst [vmem:[#allocation135_spill] sm:$0xff] %v8321_v3 }
 0x1ea   :  { %9817 = vst [vmem:[#allocation134_spill] sm:$0xff] %v8316_v44 }
 0x1ec   :  { %4739 = vperm.xlu1 %7194, %v4737_v24  }
 0x278   :  { %v1062_v61 = vpop.f32.mrb[12].mxu0  ;;  %v1133_v26 = vpop.f32.mrb[12].mxu1 }
 0x279   :  { %v1159_v48 = vadd.f32 %v8305_v40, %v1062_v61  ;;  %v1064_v37 = vpop.f32.mrb[13].mxu0  ;;  %v1135_v56 = vpop.f32.mrb[13].mxu1  ;;  %v1161_v40 = vadd.f32 %v8321_v3, %v1133_v26 }
 0x27a   :  { %v1160_v53 = vadd.f32 %v8309_v7, %v1064_v37  ;;  %v1162_v0 = vadd.f32 %v8316_v44, %v1135_v56  ;;  %v9823_v7 = vld [vmem:[#allocation115_spill] sm:$0xff] }
 0x27b   :  { %v5297_v1 = vmul.f32 -1.442695, %v1159_v48 }
 0x27c   :  { %v5298_v11 = vmul.f32 -1.442695, %v1160_v53  ;;  %v5299_v61 = vmul.f32 -1.442695, %v1162_v0 }
 0x27d   :  { %7215 = vpow2.f32 %v5297_v1 }
 0x27e   :  { %7217 = vpow2.f32 %v5298_v11 }
 0x27f   :  { %7219 = vpow2.f32 %v5299_v61  ;;  %v9820_v61 = vld [vmem:[#allocation113_spill] sm:$0xff] }
 0x280   :  { %7221 = vtanh.f32 %v1161_v40 }
 0x287   :  { %v7216_v24 = vpop.eup %7215 }
 0x288   :  { %v7218_v27 = vpop.eup %7217  ;;  %v1166_v37 = vadd.f32 1.0, %v7216_v24  ;;  %v9821_v24 = vld [vmem:[#allocation114_spill] sm:$0xff] }
 0x289   :  { %v1172_v48 = vadd.f32 1.0, %v7218_v27  ;;  %v7220_v53 = vpop.eup %7219 }
 0x28a   :  { %7223 = vrcp.f32 %v1166_v37  ;;  %v7222_v1 = vpop.eup %7221  ;;  %v1179_v44 = vadd.f32 1.0, %v7220_v53  ;;  %v9822_v37 = vcombine.high %v9820_v61, %v9821_v24  ;;  %v9830_v61 = vld [vmem:[#allocation86_spill] sm:$0xff] }
 0x28b   :  { %7225 = vrcp.f32 %v1172_v48 }
 0x28c   :  { %7227 = vrcp.f32 %v1179_v44 }
 0x294   :  { %v7224_v10 = vpop.eup %7223 }
 0x295   :  { %v7226_v11 = vpop.eup %7225  ;;  %v1183_v56 = vmul.f32 %v7224_v10, %v7222_v1  ;;  %v9825_v1 = vcombine.high %v9823_v7, %v9824_v39  ;;  %v9827_v7 = vld [vmem:[#allocation83_spill] sm:$0xff] }
 0x296   :  { %v1182_v35 = vmul.f32 0.0, %v7226_v11  ;;  %v7228_v44 = vpop.eup %7227 }
 0x298   :  { %v8324_v41 = vadd.f32 %v1183_v56, %v1182_v35  ;;  %v1266_v0 = vpop.f32.mrb[14].mxu0  ;;  %v1337_v14 = vpop.f32.mrb[14].mxu1 }
 0x299   :  { %v1268_v26 = vpop.f32.mrb[15].mxu0  ;;  %v1339_v3 = vpop.f32.mrb[15].mxu1 }
 0x29a   :  { %7229 = vtanh.f32 %v8324_v41  ;;  %v1346_v40 = vcombine.low %v1266_v0, %v1268_v26  ;;  %v1347_v27 = vcombine.low %v1337_v14, %v1339_v3  ;;  %v9826_v3 = vld [vmem:[#allocation82_spill] sm:$0xff]  ;;  %v9828_v0 = vld [vmem:[#allocation84_spill] sm:$0xff]  ;;  %v9829_v14 = vld [vmem:[#allocation85_spill] sm:$0xff] }
 0x29c   :  { %v1350_v48 = vadd.f32 %v1346_v40, %v9822_v37  ;;  %v1351_v53 = vadd.f32 %v1347_v27, %v9825_v1  ;;  %v9832_v37 = vld [vmem:[#allocation88_spill] sm:$0xff]  ;;  %v9834_v1 = vld [vmem:[#allocation90_spill] sm:$0xff] }
 0x29e   :  { %v5302_v10 = vmul.f32 -1.442695, %v1350_v48  ;;  %v1359_v11 = vrot.slane %v1350_v48, 4  ;;  %v1369_v38 = vrot.slane %v1351_v53, 4  ;;  %v9833_v48 = vld [vmem:[#allocation89_spill] sm:$0xff] }
 0x2a0   :  { %7231 = vpow2.f32 %v5302_v10  ;;  %v5303_v56 = vmul.f32 -1.442695, %v1359_v11  ;;  %v5304_v39 = vmul.f32 -1.442695, %v1369_v38  ;;  %v9831_v38 = vld [vmem:[#allocation87_spill] sm:$0xff]  ;;  %v9836_v11 = vld [vmem:[#allocation92_spill] sm:$0xff] }
 0x2a1   :  { %v9835_v10 = vld [vmem:[#allocation91_spill] sm:$0xff] }
 0x2a2   :  { %7233 = vpow2.f32 %v5303_v56  ;;  %v9838_v56 = vld [vmem:[#allocation94_spill] sm:$0xff] }
 0x2a3   :  { %7235 = vtanh.f32 %v1351_v53  ;;  %v9837_v53 = vld [vmem:[#allocation93_spill] sm:$0xff] }
 0x2a4   :  { %v7230_v35 = vpop.eup %7229  ;;  %7237 = vpow2.f32 %v5304_v39  ;;  %v9840_v39 = vld [vmem:[#allocation96_spill] sm:$0xff] }
 0x2a5   :  { %v8333_v32 = vmul.f32 %v7230_v35, %v7228_v44  ;;  %v9839_v44 = vld [vmem:[#allocation95_spill] sm:$0xff] }
 0x2a7   :  { %5305 = vmatmul.mubr.msk.f32.vlgmr.msra.gmra.mrb[16].mxu0 %vm1192_vm5, %v8333_v32  ;;  %5306 = vmatmul.mubr.msk.f32.vlgmr.msra.gmra.mrb[16].mxu1 %vm1192_vm5, %v8333_v32 }
 0x2a8   :  { %5739 = vmatpush1.bf16.msra.mxu0 %v9826_v3  ;;  %5771 = vmatpush1.bf16.msra.mxu1 %v9827_v7 }
 0x2a9   :  { %5741 = vmatprep.subr.bf16.mxu0 %v9828_v0  ;;  %5773 = vmatprep.subr.bf16.mxu1 %v9829_v14 }
 0x2aa   :  { %v7232_v26 = vpop.eup %7231  ;;  %1588 = vmatprep.mubr.f32.mxu0 %v9736_v47  ;;  %1659 = vmatprep.mubr.f32.mxu1 %v9736_v47 }
 0x2ab   :  { %v1355_v40 = vadd.f32 1.0, %v7232_v26  ;;  %v9841_v26 = vld [vmem:[#allocation97_spill] sm:$0xff] }
 0x2ac   :  { %v7234_v27 = vpop.eup %7233  ;;  %5743 = vmatpush1.bf16.msra.mxu0 %v9830_v61  ;;  %5775 = vmatpush1.bf16.msra.mxu1 %v9831_v38  ;;  %v9846_v38 = vld [vmem:[#allocation102_spill] sm:$0xff] }
 0x2ad   :  { %7239 = vrcp.f32 %v1355_v40  ;;  %v1364_v24 = vadd.f32 1.0, %v7234_v27  ;;  %5745 = vmatprep.subr.bf16.mxu0 %v9832_v37  ;;  %5777 = vmatprep.subr.bf16.mxu1 %v9833_v48  ;;  %v7236_v35 = vpop.eup %7235  ;;  %v9842_v48 = vld [vmem:[#allocation98_spill] sm:$0xff]  ;;  %v8366_v37 = vpop.permute.xlu0 %1697 }
 0x2ae   :  { %v7238_v40 = vpop.eup %7237  ;;  %vm1699_vm10 = vcmp.eq.s32.totalorder %v8366_v37, 1 }
 0x2af   :  { %7241 = vrcp.f32 %v1364_v24 }
 0x2b0   :  { %5747 = vmatpush1.bf16.msra.mxu0 %v9834_v1  ;;  %5779 = vmatpush1.bf16.msra.mxu1 %v9835_v10  ;;  %v9843_v1 = vld [vmem:[#allocation99_spill] sm:$0xff] }
 0x2b1   :  { %5749 = vmatprep.subr.bf16.mxu0 %v9836_v11  ;;  %5781 = vmatprep.subr.bf16.mxu1 %v9837_v53  ;;  %v1194_v53 = vsel %vm1192_vm5, %v8210_v59, 0.0  ;;  %v9844_v11 = vld [vmem:[#allocation100_spill] sm:$0xff] }
 0x2b4   :  { %5751 = vmatpush1.bf16.msra.mxu0 %v9838_v56  ;;  %5783 = vmatpush1.bf16.msra.mxu1 %v9839_v44  ;;  %v1374_v56 = vadd.f32 1.0, %v7238_v40  ;;  %v9845_v44 = vld [vmem:[#allocation101_spill] sm:$0xff]  ;;  %v9851_v40 = vld [vmem:[#allocation107_spill] sm:$0xff] }
 0x2b5   :  { %5753 = vmatprep.subr.bf16.mxu0 %v9840_v39  ;;  %5785 = vmatprep.subr.bf16.mxu1 %v9841_v26 }
 0x2b6   :  { %7243 = vrcp.f32 %v1374_v56  ;;  %v9855_v56 = vld [vmem:[#allocation111_spill] sm:$0xff] }
 0x2b7   :  { %v7240_v27 = vpop.eup %7239 }
 0x2b8   :  { %v1378_v24 = vmul.f32 %v7240_v27, %v7236_v35  ;;  %5755 = vmatpush1.bf16.msra.mxu0 %v9842_v48  ;;  %5787 = vmatpush1.bf16.msra.mxu1 %v9843_v1  ;;  %v9847_v35 = vld [vmem:[#allocation103_spill] sm:$0xff]  ;;  %v9848_v27 = vld [vmem:[#allocation104_spill] sm:$0xff]  ;;  %v9849_v1 = vld [vmem:[#allocation105_spill] sm:$0xff] }
 0x2b9   :  { %v7242_v10 = vpop.eup %7241  ;;  %5757 = vmatprep.subr.bf16.mxu0 %v9844_v11  ;;  %5789 = vmatprep.subr.bf16.mxu1 %v9845_v44 }
 0x2ba   :  { %v1377_v39 = vmul.f32 %v7242_v10, %v1194_v53  ;;  %v9850_v10 = vld [vmem:[#allocation106_spill] sm:$0xff] }
 0x2bc   :  { %v1379_v26 = vadd.f32 %v1378_v24, %v1377_v39  ;;  %5759 = vmatpush1.bf16.msra.mxu0 %v9846_v38  ;;  %5791 = vmatpush1.bf16.msra.mxu1 %v9847_v35  ;;  %v9852_v39 = vld [vmem:[#allocation108_spill] sm:$0xff]  ;;  %v9853_v24 = vld [vmem:[#allocation109_spill] sm:$0xff]  ;;  %v9854_v35 = vld [vmem:[#allocation110_spill] sm:$0xff] }
 0x2bd   :  { %5761 = vmatprep.subr.bf16.mxu0 %v9848_v27  ;;  %5793 = vmatprep.subr.bf16.mxu1 %v9849_v1  ;;  %v9856_v27 = vld [vmem:[#allocation20_spill] sm:$0xff]  ;;  %v9857_v1 = vld [vmem:[#allocation21_spill] sm:$0xff] }
 0x2be   :  { %7245 = vtanh.f32 %v1379_v26  ;;  %v8375_v59 = vsel %vm1699_vm10, %v1379_v26, %v1194_v53  ;;  %v1193_v26 = vsel %vm1192_vm5, %v8213_v19, 0.0  ;;  %v9859_v19 = vld [vmem:[#allocation56_spill] sm:$0xff] }
 0x2c0   :  { %5763 = vmatpush1.bf16.msra.mxu0 %v9850_v10  ;;  %5795 = vmatpush1.bf16.msra.mxu1 %v9851_v40  ;;  %v7244_v38 = vpop.eup %7243 }
 0x2c1   :  { %5765 = vmatprep.subr.bf16.mxu0 %v9852_v39  ;;  %5797 = vmatprep.subr.bf16.mxu1 %v9853_v24 }
 0x2c4   :  { %5767 = vmatpush1.bf16.msra.mxu0 %v9854_v35  ;;  %5799 = vmatpush1.bf16.msra.mxu1 %v9855_v56 }
 0x2c5   :  { %5801 = vmatprep.subr.bf16.mxu0 %v9856_v27  ;;  %5833 = vmatprep.subr.bf16.mxu1 %v9857_v1 }
 0x2c8   :  { %v7246_v44 = vpop.eup %7245 }
 0x2c9   :  { %v1381_v53 = vmul.f32 %v7246_v44, %v7244_v38  ;;  %v9860_v38 = vld [vmem:[#allocation57_spill] sm:$0xff]  ;;  %v9861_v44 = vld [vmem:[#allocation58_spill] sm:$0xff] }
 0x2cb   :  { %1589 = vmatmul.mubr.f32.vlgmr.msra.gmra.mrb[16].mxu0 %v1381_v53  ;;  %1660 = vmatmul.mubr.f32.vlgmr.msra.gmra.mrb[16].mxu1 %v1381_v53  ;;  %v8390_v24 = vsel %vm1699_vm10, %v1381_v53, %v1193_v26  ;;  %v9862_v53 = vld [vmem:[#allocation59_spill] sm:$0xff]  ;;  %v9863_v26 = vld [vmem:[#allocation60_spill] sm:$0xff] }
 0x2cc   :  { %9858 = vst [vmem:[#allocation113_spill] sm:$0xff] %v8390_v24  ;;  %5803 = vmatpush1.bf16.msra.mxu0 %v7798_v51  ;;  %5835 = vmatpush1.bf16.msra.mxu1 %v7801_v54 }
 0x2cd   :  { %5805 = vmatprep.subr.bf16.mxu0 %v7803_v55  ;;  %5837 = vmatprep.subr.bf16.mxu1 %v7806_v57 }
 0x2ce   :  { %1771 = vmatprep.mubr.f32.mxu0 %v9736_v47  ;;  %1842 = vmatprep.mubr.f32.mxu1 %v9736_v47 }
 0x2d0   :  { %5807 = vmatpush1.bf16.msra.mxu0 %v7809_v2  ;;  %5839 = vmatpush1.bf16.msra.mxu1 %v7813_v4 }
 0x2d1   :  { %5809 = vmatprep.subr.bf16.mxu0 %v7815_v5  ;;  %5841 = vmatprep.subr.bf16.mxu1 %v7818_v8 }
 0x2d4   :  { %5811 = vmatpush1.bf16.msra.mxu0 %v7823_v15  ;;  %5843 = vmatpush1.bf16.msra.mxu1 %v7827_v16 }
 0x2d5   :  { %5813 = vmatprep.subr.bf16.mxu0 %v7829_v17  ;;  %5845 = vmatprep.subr.bf16.mxu1 %v7832_v21 }
 0x2d8   :  { %5815 = vmatpush1.bf16.msra.mxu0 %v7837_v28  ;;  %5847 = vmatpush1.bf16.msra.mxu1 %v7841_v29 }
 0x2d9   :  { %5817 = vmatprep.subr.bf16.mxu0 %v7843_v30  ;;  %5849 = vmatprep.subr.bf16.mxu1 %v7846_v34 }
 0x2dc   :  { %5819 = vmatpush1.bf16.msra.mxu0 %v7856_v42  ;;  %5851 = vmatpush1.bf16.msra.mxu1 %v7860_v45 }
 0x2dd   :  { %5821 = vmatprep.subr.bf16.mxu0 %v7862_v46  ;;  %5853 = vmatprep.subr.bf16.mxu1 %v7866_v50 }
 0x2e0   :  { %5823 = vmatpush1.bf16.msra.mxu0 %v7871_v60  ;;  %5855 = vmatpush1.bf16.msra.mxu1 %v7876_v62 }
 0x2e1   :  { %5825 = vmatprep.subr.bf16.mxu0 %v7878_v63  ;;  %5857 = vmatprep.subr.bf16.mxu1 %v7882_v9 }
 0x2e4   :  { %5827 = vmatpush1.bf16.msra.mxu0 %v7887_v18  ;;  %5859 = vmatpush1.bf16.msra.mxu1 %v7892_v20 }
 0x2e5   :  { %5829 = vmatprep.subr.bf16.mxu0 %v7894_v22  ;;  %5861 = vmatprep.subr.bf16.mxu1 %v7898_v25 }
 0x2e8   :  { %5831 = vmatpush1.bf16.msra.mxu0 %v7901_v31  ;;  %5863 = vmatpush1.bf16.msra.mxu1 %v7906_v33 }
 0x2e9   :  { %5865 = vmatprep.subr.bf16.mxu0 %v7919_v43  ;;  %5897 = vmatprep.subr.bf16.mxu1 %v7921_v49  ;;  %v9886_v43 = vld [vmem:[#allocation133_spill] sm:$0xff] }
 0x2eb   :  { %1772 = vmatmul.mubr.f32.vlgmr.msra.gmra.mrb[18].mxu0 %v8390_v24  ;;  %1843 = vmatmul.mubr.f32.vlgmr.msra.gmra.mrb[18].mxu1 %v8390_v24  ;;  %v9885_v24 = vld [vmem:[#allocation112_spill] sm:$0xff] }
 0x2ec   :  { %5867 = vmatpush1.bf16.msra.mxu0 %v7923_v52  ;;  %5899 = vmatpush1.bf16.msra.mxu1 %v7926_v58  ;;  %v9866_v58 = vld [vmem:[#allocation63_spill] sm:$0xff]  ;;  %v9867_v52 = vld [vmem:[#allocation64_spill] sm:$0xff] }
 0x2ed   :  { %5869 = vmatprep.subr.bf16.mxu0 %v7931_v6  ;;  %5901 = vmatprep.subr.bf16.mxu1 %v7933_v12  ;;  %v9864_v6 = vld [vmem:[#allocation61_spill] sm:$0xff]  ;;  %v9865_v12 = vld [vmem:[#allocation62_spill] sm:$0xff] }
 0x2ee   :  { %1953 = vmatprep.mubr.f32.mxu0 %v9736_v47  ;;  %2024 = vmatprep.mubr.f32.mxu1 %v9736_v47 }
 0x2f0   :  { %5871 = vmatpush1.bf16.msra.mxu0 %v7935_v13  ;;  %5903 = vmatpush1.bf16.msra.mxu1 %v7938_v23  ;;  %v9868_v13 = vld [vmem:[#allocation65_spill] sm:$0xff]  ;;  %v9869_v23 = vld [vmem:[#allocation66_spill] sm:$0xff] }
 0x2f1   :  { %5873 = vmatprep.subr.bf16.mxu0 %v9859_v19  ;;  %5905 = vmatprep.subr.bf16.mxu1 %v9860_v38  ;;  %v9870_v19 = vld [vmem:[#allocation67_spill] sm:$0xff]  ;;  %v9871_v38 = vld [vmem:[#allocation68_spill] sm:$0xff] }
 0x2f4   :  { %5875 = vmatpush1.bf16.msra.mxu0 %v9861_v44  ;;  %5907 = vmatpush1.bf16.msra.mxu1 %v9862_v53  ;;  %v9872_v44 = vld [vmem:[#allocation69_spill] sm:$0xff]  ;;  %v9873_v53 = vld [vmem:[#allocation70_spill] sm:$0xff] }
 0x2f5   :  { %5877 = vmatprep.subr.bf16.mxu0 %v9863_v26  ;;  %5909 = vmatprep.subr.bf16.mxu1 %v9864_v6  ;;  %v9874_v26 = vld [vmem:[#allocation71_spill] sm:$0xff]  ;;  %v9875_v6 = vld [vmem:[#allocation72_spill] sm:$0xff] }
 0x2f8   :  { %5879 = vmatpush1.bf16.msra.mxu0 %v9865_v12  ;;  %5911 = vmatpush1.bf16.msra.mxu1 %v9866_v58  ;;  %v9876_v12 = vld [vmem:[#allocation73_spill] sm:$0xff]  ;;  %v9877_v58 = vld [vmem:[#allocation74_spill] sm:$0xff] }
 0x2f9   :  { %5881 = vmatprep.subr.bf16.mxu0 %v9867_v52  ;;  %5913 = vmatprep.subr.bf16.mxu1 %v9868_v13  ;;  %v9878_v52 = vld [vmem:[#allocation75_spill] sm:$0xff]  ;;  %v9879_v13 = vld [vmem:[#allocation76_spill] sm:$0xff] }
 0x2fc   :  { %5883 = vmatpush1.bf16.msra.mxu0 %v9869_v23  ;;  %5915 = vmatpush1.bf16.msra.mxu1 %v9870_v19  ;;  %v9880_v23 = vld [vmem:[#allocation77_spill] sm:$0xff]  ;;  %v9881_v19 = vld [vmem:[#allocation78_spill] sm:$0xff] }
 0x2fd   :  { %5885 = vmatprep.subr.bf16.mxu0 %v9871_v38  ;;  %5917 = vmatprep.subr.bf16.mxu1 %v9872_v44  ;;  %v9882_v38 = vld [vmem:[#allocation79_spill] sm:$0xff]  ;;  %v9883_v44 = vld [vmem:[#allocation80_spill] sm:$0xff] }
 0x300   :  { %5887 = vmatpush1.bf16.msra.mxu0 %v9873_v53  ;;  %5919 = vmatpush1.bf16.msra.mxu1 %v9874_v26  ;;  %v9884_v53 = vld [vmem:[#allocation81_spill] sm:$0xff] }
 0x301   :  { %5889 = vmatprep.subr.bf16.mxu0 %v9875_v6  ;;  %5921 = vmatprep.subr.bf16.mxu1 %v9876_v12 }
 0x304   :  { %5891 = vmatpush1.bf16.msra.mxu0 %v9877_v58  ;;  %5923 = vmatpush1.bf16.msra.mxu1 %v9878_v52 }
 0x305   :  { %5893 = vmatprep.subr.bf16.mxu0 %v9879_v13  ;;  %5925 = vmatprep.subr.bf16.mxu1 %v9880_v23  ;;  %v9887_v23 = vld [vmem:[#allocation134_spill] sm:$0xff] }
 0x308   :  { %5895 = vmatpush1.bf16.msra.mxu0 %v9881_v19  ;;  %5927 = vmatpush1.bf16.msra.mxu1 %v9882_v38  ;;  %v9888_v38 = vld [vmem:[#allocation135_spill] sm:$0xff] }
 0x309   :  { %5929 = vmatprep.subr.bf16.mxu0 %v9883_v44  ;;  %5961 = vmatprep.subr.bf16.mxu1 %v9884_v53 }
 0x39e   :  { %v1590_v26 = vpop.f32.mrb[16].mxu0  ;;  %v1661_v6 = vpop.f32.mrb[16].mxu1 }
 0x39f   :  { %v1666_v12 = vadd.f32 %v1590_v26, %v9885_v24  ;;  %v1592_v49 = vpop.f32.mrb[17].mxu0  ;;  %v1663_v58 = vpop.f32.mrb[17].mxu1  ;;  %v1668_v25 = vadd.f32 %v1661_v6, %v9888_v38 }
 0x3a0   :  { %v1667_v52 = vadd.f32 %v1592_v49, %v9886_v43  ;;  %v1669_v19 = vadd.f32 %v1663_v58, %v9887_v23  ;;  %v9890_v23 = vld [vmem:[#allocation118_spill] sm:$0xff] }
 0x3a1   :  { %v5307_v33 = vmul.f32 -1.442695, %v1666_v12 }
 0x3a2   :  { %v5308_v13 = vmul.f32 -1.442695, %v1667_v52  ;;  %v5309_v31 = vmul.f32 -1.442695, %v1669_v19 }
 0x3a3   :  { %7247 = vpow2.f32 %v5307_v33  ;;  %v1196_v33 = vsel %vm1192_vm5, %v8324_v41, 0.0 }
 0x3a4   :  { %7249 = vpow2.f32 %v5308_v13 }
 0x3a5   :  { %7251 = vpow2.f32 %v5309_v31 }
 0x3a6   :  { %7253 = vtanh.f32 %v1668_v25 }
 0x3ad   :  { %v7248_v44 = vpop.eup %7247 }
 0x3ae   :  { %v7250_v22 = vpop.eup %7249  ;;  %v1673_v53 = vadd.f32 1.0, %v7248_v44 }
 0x3af   :  { %v1679_v20 = vadd.f32 1.0, %v7250_v22  ;;  %v7252_v26 = vpop.eup %7251 }
 0x3b0   :  { %7255 = vrcp.f32 %v1673_v53  ;;  %v7254_v24 = vpop.eup %7253  ;;  %v1686_v58 = vadd.f32 1.0, %v7252_v26  ;;  %v9889_v53 = vld [vmem:[#allocation117_spill] sm:$0xff]  ;;  %v9893_v26 = vld [vmem:[#allocation120_spill] sm:$0xff] }
 0x3b1   :  { %7257 = vrcp.f32 %v1679_v20  ;;  %v9891_v43 = vcombine.low %v9889_v53, %v9890_v23 }
 0x3b2   :  { %7259 = vrcp.f32 %v1686_v58 }
 0x3ba   :  { %v7256_v49 = vpop.eup %7255 }
 0x3bb   :  { %v7258_v12 = vpop.eup %7257  ;;  %v1690_v52 = vmul.f32 %v7256_v49, %v7254_v24  ;;  %v9892_v24 = vld [vmem:[#allocation119_spill] sm:$0xff] }
 0x3bc   :  { %v1689_v13 = vmul.f32 %v7258_v12, %v1196_v33  ;;  %v9894_v49 = vcombine.low %v9892_v24, %v9893_v26 }
 0x3be   :  { %v1691_v6 = vadd.f32 %v1690_v52, %v1689_v13  ;;  %v1773_v19 = vpop.f32.mrb[18].mxu0  ;;  %v1844_v38 = vpop.f32.mrb[18].mxu1 }
 0x3bf   :  { %v1775_v31 = vpop.f32.mrb[19].mxu0  ;;  %v1846_v25 = vpop.f32.mrb[19].mxu1 }
 0x3c0   :  { %v1853_v22 = vcombine.low %v1773_v19, %v1775_v31  ;;  %v1854_v44 = vcombine.low %v1844_v38, %v1846_v25  ;;  %7261 = vtanh.f32 %v1691_v6  ;;  %v8471_v20 = vsel %vm1699_vm10, %v1691_v6, %v1196_v33  ;;  %v7260_v19 = vpop.eup %7259 }
 0x3c1   :  { %v1195_v33 = vsel %vm1192_vm5, %v8333_v32, 0.0 }
 0x3c2   :  { %v1857_v41 = vadd.f32 %v1853_v22, %v9891_v43  ;;  %v1858_v12 = vadd.f32 %v1854_v44, %v9894_v49  ;;  %v9895_v44 = vld [vmem:[#allocation87_spill] sm:$0xff]  ;;  %v9897_v49 = vld [vmem:[#allocation89_spill] sm:$0xff] }
 0x3c4   :  { %v5310_v52 = vmul.f32 -1.442695, %v1857_v41  ;;  %v1866_v13 = vrot.slane %v1857_v41, 4  ;;  %v1876_v31 = vrot.slane %v1858_v12, 4  ;;  %v9896_v41 = vld [vmem:[#allocation88_spill] sm:$0xff] }
 0x3c6   :  { %7263 = vpow2.f32 %v5310_v52  ;;  %v5311_v58 = vmul.f32 -1.442695, %v1866_v13  ;;  %v5312_v6 = vmul.f32 -1.442695, %v1876_v31  ;;  %v9898_v52 = vld [vmem:[#allocation90_spill] sm:$0xff]  ;;  %v9900_v13 = vld [vmem:[#allocation92_spill] sm:$0xff] }
 0x3c7   :  { %v9903_v31 = vld [vmem:[#allocation95_spill] sm:$0xff] }
 0x3c8   :  { %7265 = vpow2.f32 %v5311_v58  ;;  %v9901_v58 = vld [vmem:[#allocation93_spill] sm:$0xff] }
 0x3c9   :  { %7267 = vtanh.f32 %v1858_v12  ;;  %v9899_v12 = vld [vmem:[#allocation91_spill] sm:$0xff] }
 0x3ca   :  { %v7262_v38 = vpop.eup %7261  ;;  %7269 = vpow2.f32 %v5312_v6  ;;  %v9905_v6 = vld [vmem:[#allocation97_spill] sm:$0xff] }
 0x3cb   :  { %v1693_v25 = vmul.f32 %v7262_v38, %v7260_v19  ;;  %v9902_v38 = vld [vmem:[#allocation94_spill] sm:$0xff] }
 0x3cd   :  { %v8484_v43 = vsel %vm1699_vm10, %v1693_v25, %v1195_v33  ;;  %v9904_v33 = vld [vmem:[#allocation96_spill] sm:$0xff] }
 0x3ce   :  { %1954 = vmatmul.mubr.f32.vlgmr.msra.gmra.mrb[20].mxu0 %v8484_v43  ;;  %2025 = vmatmul.mubr.f32.vlgmr.msra.gmra.mrb[20].mxu1 %v8484_v43 }
 0x3cf   :  { %5931 = vmatpush1.bf16.msra.mxu0 %v9826_v3  ;;  %5963 = vmatpush1.bf16.msra.mxu1 %v9827_v7 }
 0x3d0   :  { %v7264_v22 = vpop.eup %7263  ;;  %5933 = vmatprep.subr.bf16.mxu0 %v9828_v0  ;;  %5965 = vmatprep.subr.bf16.mxu1 %v9829_v14 }
 0x3d1   :  { %v1862_v36 = vadd.f32 1.0, %v7264_v22  ;;  %2095 = vmatprep.mubr.f32.mxu0 %v9736_v47  ;;  %2166 = vmatprep.mubr.f32.mxu1 %v9736_v47 }
 0x3d2   :  { %v7266_v32 = vpop.eup %7265 }
 0x3d3   :  { %7271 = vrcp.f32 %v1862_v36  ;;  %v1871_v37 = vadd.f32 1.0, %v7266_v32  ;;  %5935 = vmatpush1.bf16.msra.mxu0 %v9830_v61  ;;  %5967 = vmatpush1.bf16.msra.mxu1 %v9895_v44  ;;  %v7268_v19 = vpop.eup %7267  ;;  %v8506_v36 = vpop.permute.xlu1 %2204 }
 0x3d4   :  { %5937 = vmatprep.subr.bf16.mxu0 %v9896_v41  ;;  %5969 = vmatprep.subr.bf16.mxu1 %v9897_v49  ;;  %v7270_v25 = vpop.eup %7269  ;;  %vm2206_vm11 = vcmp.eq.s32.totalorder %v8506_v36, 1  ;;  %v9960_v36 = vld [vmem:[#allocation91_spill] sm:$0xff] }
 0x3d5   :  { %7273 = vrcp.f32 %v1871_v37 }
 0x3d7   :  { %5939 = vmatpush1.bf16.msra.mxu0 %v9898_v52  ;;  %5971 = vmatpush1.bf16.msra.mxu1 %v9899_v12  ;;  %v1881_v12 = vadd.f32 1.0, %v7270_v25  ;;  %v9910_v25 = vld [vmem:[#allocation104_spill] sm:$0xff] }
 0x3d8   :  { %5941 = vmatprep.subr.bf16.mxu0 %v9900_v13  ;;  %5973 = vmatprep.subr.bf16.mxu1 %v9901_v58  ;;  %v9906_v13 = vld [vmem:[#allocation99_spill] sm:$0xff] }
 0x3d9   :  { %7275 = vrcp.f32 %v1881_v12  ;;  %v9912_v12 = vld [vmem:[#allocation109_spill] sm:$0xff] }
 0x3db   :  { %5943 = vmatpush1.bf16.msra.mxu0 %v9902_v38  ;;  %5975 = vmatpush1.bf16.msra.mxu1 %v9903_v31  ;;  %v9907_v31 = vld [vmem:[#allocation101_spill] sm:$0xff]  ;;  %v9909_v38 = vld [vmem:[#allocation103_spill] sm:$0xff] }
 0x3dc   :  { %5945 = vmatprep.subr.bf16.mxu0 %v9904_v33  ;;  %5977 = vmatprep.subr.bf16.mxu1 %v9905_v6  ;;  %v9908_v6 = vld [vmem:[#allocation102_spill] sm:$0xff] }
 0x3dd   :  { %v7272_v22 = vpop.eup %7271 }
 0x3de   :  { %v1885_v32 = vmul.f32 %v7272_v22, %v7268_v19  ;;  %v9911_v22 = vld [vmem:[#allocation105_spill] sm:$0xff] }
 0x3df   :  { %v7274_v37 = vpop.eup %7273  ;;  %5947 = vmatpush1.bf16.msra.mxu0 %v9842_v48  ;;  %5979 = vmatpush1.bf16.msra.mxu1 %v9906_v13 }
 0x3e0   :  { %v1884_v58 = vmul.f32 %v7274_v37, %v8375_v59  ;;  %5949 = vmatprep.subr.bf16.mxu0 %v9844_v11  ;;  %5981 = vmatprep.subr.bf16.mxu1 %v9907_v31  ;;  %v9914_v37 = vld [vmem:[#allocation44_spill] sm:$0xff] }
 0x3e2   :  { %v1886_v33 = vadd.f32 %v1885_v32, %v1884_v58  ;;  %v9913_v32 = vld [vmem:[#allocation43_spill] sm:$0xff] }
 0x3e3   :  { %5951 = vmatpush1.bf16.msra.mxu0 %v9908_v6  ;;  %5983 = vmatpush1.bf16.msra.mxu1 %v9909_v38 }
 0x3e4   :  { %7277 = vtanh.f32 %v1886_v33  ;;  %v8519_v19 = vsel %vm2206_vm11, %v1886_v33, %v8375_v59  ;;  %5953 = vmatprep.subr.bf16.mxu0 %v9910_v25  ;;  %5985 = vmatprep.subr.bf16.mxu1 %v9911_v22  ;;  %v7276_v59 = vpop.eup %7275 }
 0x3e7   :  { %5955 = vmatpush1.bf16.msra.mxu0 %v9850_v10  ;;  %5987 = vmatpush1.bf16.msra.mxu1 %v9851_v40 }
 0x3e8   :  { %5957 = vmatprep.subr.bf16.mxu0 %v9852_v39  ;;  %5989 = vmatprep.subr.bf16.mxu1 %v9912_v12 }
 0x3eb   :  { %5959 = vmatpush1.bf16.msra.mxu0 %v9854_v35  ;;  %5991 = vmatpush1.bf16.msra.mxu1 %v9855_v56 }
 0x3ec   :  { %5993 = vmatprep.subr.bf16.mxu0 %v9856_v27  ;;  %6025 = vmatprep.subr.bf16.mxu1 %v9857_v1 }
 0x3ee   :  { %v7278_v58 = vpop.eup %7277 }
 0x3ef   :  { %v1888_v33 = vmul.f32 %v7278_v58, %v7276_v59  ;;  %v9915_v59 = vld [vmem:[#allocation45_spill] sm:$0xff]  ;;  %v9916_v58 = vld [vmem:[#allocation46_spill] sm:$0xff] }
 0x3f1   :  { %2096 = vmatmul.mubr.f32.vlgmr.msra.gmra.mrb[20].mxu0 %v1888_v33  ;;  %2167 = vmatmul.mubr.f32.vlgmr.msra.gmra.mrb[20].mxu1 %v1888_v33 }
 0x3f2   :  { %5995 = vmatpush1.bf16.msra.mxu0 %v7798_v51  ;;  %6027 = vmatpush1.bf16.msra.mxu1 %v7801_v54 }
 0x3f3   :  { %5997 = vmatprep.subr.bf16.mxu0 %v7803_v55  ;;  %6029 = vmatprep.subr.bf16.mxu1 %v7806_v57 }
 0x3f4   :  { %2278 = vmatprep.mubr.f32.mxu0 %v9736_v47  ;;  %2349 = vmatprep.mubr.f32.mxu1 %v9736_v47 }
 0x3f6   :  { %5999 = vmatpush1.bf16.msra.mxu0 %v7809_v2  ;;  %6031 = vmatpush1.bf16.msra.mxu1 %v7813_v4 }
 0x3f7   :  { %6001 = vmatprep.subr.bf16.mxu0 %v7815_v5  ;;  %6033 = vmatprep.subr.bf16.mxu1 %v7818_v8 }
 0x3fa   :  { %6003 = vmatpush1.bf16.msra.mxu0 %v7823_v15  ;;  %6035 = vmatpush1.bf16.msra.mxu1 %v7827_v16 }
 0x3fb   :  { %6005 = vmatprep.subr.bf16.mxu0 %v7829_v17  ;;  %6037 = vmatprep.subr.bf16.mxu1 %v7832_v21 }
 0x3fe   :  { %6007 = vmatpush1.bf16.msra.mxu0 %v7837_v28  ;;  %6039 = vmatpush1.bf16.msra.mxu1 %v7841_v29 }
 0x3ff   :  { %6009 = vmatprep.subr.bf16.mxu0 %v7843_v30  ;;  %6041 = vmatprep.subr.bf16.mxu1 %v7846_v34 }
 0x402   :  { %6011 = vmatpush1.bf16.msra.mxu0 %v7856_v42  ;;  %6043 = vmatpush1.bf16.msra.mxu1 %v7860_v45  ;;  %v9955_v42 = vld [vmem:[#allocation133_spill] sm:$0xff] }
 0x403   :  { %6013 = vmatprep.subr.bf16.mxu0 %v7862_v46  ;;  %6045 = vmatprep.subr.bf16.mxu1 %v7866_v50  ;;  %v9917_v46 = vld [vmem:[#allocation47_spill] sm:$0xff]  ;;  %v9918_v50 = vld [vmem:[#allocation48_spill] sm:$0xff] }
 0x406   :  { %6015 = vmatpush1.bf16.msra.mxu0 %v7871_v60  ;;  %6047 = vmatpush1.bf16.msra.mxu1 %v7876_v62  ;;  %v9919_v60 = vld [vmem:[#allocation49_spill] sm:$0xff] }
 0x407   :  { %6017 = vmatprep.subr.bf16.mxu0 %v7878_v63  ;;  %6049 = vmatprep.subr.bf16.mxu1 %v7882_v9  ;;  %v9920_v62 = vld [vmem:[#allocation113_spill] sm:$0xff]  ;;  %v9954_v63 = vld [vmem:[#allocation112_spill] sm:$0xff] }
 0x408   :  { %v8568_v9 = vsel %vm2206_vm11, %v1888_v33, %v9920_v62  ;;  %v9927_v62 = vld [vmem:[#allocation55_spill] sm:$0xff]  ;;  %v9928_v33 = vld [vmem:[#allocation56_spill] sm:$0xff] }
 0x409   :  { %9921 = vst [vmem:[#allocation114_spill] sm:$0xff] %v8568_v9 }
 0x40a   :  { %6019 = vmatpush1.bf16.msra.mxu0 %v7887_v18  ;;  %6051 = vmatpush1.bf16.msra.mxu1 %v9913_v32  ;;  %v9935_v32 = vld [vmem:[#allocation63_spill] sm:$0xff]  ;;  %v9936_v18 = vld [vmem:[#allocation64_spill] sm:$0xff] }
 0x40b   :  { %6021 = vmatprep.subr.bf16.mxu0 %v9914_v37  ;;  %6053 = vmatprep.subr.bf16.mxu1 %v9915_v59  ;;  %v9922_v37 = vld [vmem:[#allocation50_spill] sm:$0xff]  ;;  %v9923_v59 = vld [vmem:[#allocation51_spill] sm:$0xff] }
 0x40e   :  { %6023 = vmatpush1.bf16.msra.mxu0 %v9916_v58  ;;  %6055 = vmatpush1.bf16.msra.mxu1 %v9917_v46  ;;  %v9924_v58 = vld [vmem:[#allocation52_spill] sm:$0xff]  ;;  %v9925_v46 = vld [vmem:[#allocation53_spill] sm:$0xff] }
 0x40f   :  { %6057 = vmatprep.subr.bf16.mxu0 %v9918_v50  ;;  %6089 = vmatprep.subr.bf16.mxu1 %v9919_v60  ;;  %v9926_v60 = vld [vmem:[#allocation54_spill] sm:$0xff]  ;;  %v9929_v50 = vld [vmem:[#allocation57_spill] sm:$0xff] }
 0x411   :  { %2279 = vmatmul.mubr.f32.vlgmr.msra.gmra.mrb[22].mxu0 %v8568_v9  ;;  %2350 = vmatmul.mubr.f32.vlgmr.msra.gmra.mrb[22].mxu1 %v8568_v9  ;;  %v9930_v9 = vld [vmem:[#allocation58_spill] sm:$0xff] }
 0x412   :  { %6059 = vmatpush1.bf16.msra.mxu0 %v9922_v37  ;;  %6091 = vmatpush1.bf16.msra.mxu1 %v9923_v59  ;;  %v9931_v37 = vld [vmem:[#allocation59_spill] sm:$0xff]  ;;  %v9932_v59 = vld [vmem:[#allocation60_spill] sm:$0xff] }
 0x413   :  { %6061 = vmatprep.subr.bf16.mxu0 %v9924_v58  ;;  %6093 = vmatprep.subr.bf16.mxu1 %v9925_v46  ;;  %v9933_v58 = vld [vmem:[#allocation61_spill] sm:$0xff]  ;;  %v9934_v46 = vld [vmem:[#allocation62_spill] sm:$0xff] }
 0x414   :  { %2460 = vmatprep.mubr.f32.mxu0 %v9736_v47  ;;  %2531 = vmatprep.mubr.f32.mxu1 %v9736_v47 }
 0x416   :  { %6063 = vmatpush1.bf16.msra.mxu0 %v9926_v60  ;;  %6095 = vmatpush1.bf16.msra.mxu1 %v9927_v62  ;;  %v9937_v60 = vld [vmem:[#allocation65_spill] sm:$0xff]  ;;  %v9938_v62 = vld [vmem:[#allocation66_spill] sm:$0xff] }
 0x417   :  { %6065 = vmatprep.subr.bf16.mxu0 %v9928_v33  ;;  %6097 = vmatprep.subr.bf16.mxu1 %v9929_v50  ;;  %v9939_v33 = vld [vmem:[#allocation67_spill] sm:$0xff]  ;;  %v9940_v50 = vld [vmem:[#allocation68_spill] sm:$0xff] }
 0x41a   :  { %6067 = vmatpush1.bf16.msra.mxu0 %v9930_v9  ;;  %6099 = vmatpush1.bf16.msra.mxu1 %v9931_v37  ;;  %v9941_v9 = vld [vmem:[#allocation69_spill] sm:$0xff]  ;;  %v9942_v37 = vld [vmem:[#allocation70_spill] sm:$0xff] }
 0x41b   :  { %6069 = vmatprep.subr.bf16.mxu0 %v9932_v59  ;;  %6101 = vmatprep.subr.bf16.mxu1 %v9933_v58  ;;  %v9943_v59 = vld [vmem:[#allocation71_spill] sm:$0xff]  ;;  %v9944_v58 = vld [vmem:[#allocation72_spill] sm:$0xff] }
 0x41e   :  { %6071 = vmatpush1.bf16.msra.mxu0 %v9934_v46  ;;  %6103 = vmatpush1.bf16.msra.mxu1 %v9935_v32  ;;  %v9945_v46 = vld [vmem:[#allocation73_spill] sm:$0xff]  ;;  %v9946_v32 = vld [vmem:[#allocation74_spill] sm:$0xff] }
 0x41f   :  { %6073 = vmatprep.subr.bf16.mxu0 %v9936_v18  ;;  %6105 = vmatprep.subr.bf16.mxu1 %v9937_v60  ;;  %v9947_v18 = vld [vmem:[#allocation75_spill] sm:$0xff]  ;;  %v9948_v60 = vld [vmem:[#allocation76_spill] sm:$0xff] }
 0x422   :  { %6075 = vmatpush1.bf16.msra.mxu0 %v9938_v62  ;;  %6107 = vmatpush1.bf16.msra.mxu1 %v9939_v33  ;;  %v9949_v62 = vld [vmem:[#allocation77_spill] sm:$0xff]  ;;  %v9950_v33 = vld [vmem:[#allocation78_spill] sm:$0xff] }
 0x423   :  { %6077 = vmatprep.subr.bf16.mxu0 %v9940_v50  ;;  %6109 = vmatprep.subr.bf16.mxu1 %v9941_v9  ;;  %v9951_v50 = vld [vmem:[#allocation79_spill] sm:$0xff]  ;;  %v9952_v9 = vld [vmem:[#allocation80_spill] sm:$0xff] }
 0x426   :  { %6079 = vmatpush1.bf16.msra.mxu0 %v9942_v37  ;;  %6111 = vmatpush1.bf16.msra.mxu1 %v9943_v59  ;;  %v9953_v37 = vld [vmem:[#allocation81_spill] sm:$0xff] }
 0x427   :  { %6081 = vmatprep.subr.bf16.mxu0 %v9944_v58  ;;  %6113 = vmatprep.subr.bf16.mxu1 %v9945_v46 }
 0x42a   :  { %6083 = vmatpush1.bf16.msra.mxu0 %v9946_v32  ;;  %6115 = vmatpush1.bf16.msra.mxu1 %v9947_v18 }
 0x42b   :  { %6085 = vmatprep.subr.bf16.mxu0 %v9948_v60  ;;  %6117 = vmatprep.subr.bf16.mxu1 %v9949_v62  ;;  %v9956_v62 = vld [vmem:[#allocation134_spill] sm:$0xff] }
 0x42e   :  { %6087 = vmatpush1.bf16.msra.mxu0 %v9950_v33  ;;  %6119 = vmatpush1.bf16.msra.mxu1 %v9951_v50  ;;  %v9957_v50 = vld [vmem:[#allocation135_spill] sm:$0xff] }
 0x42f   :  { %6121 = vmatprep.subr.bf16.mxu0 %v9952_v9  ;;  %6153 = vmatprep.subr.bf16.mxu1 %v9953_v37 }
 0x4c4   :  { %v2097_v59 = vpop.f32.mrb[20].mxu0  ;;  %v2168_v58 = vpop.f32.mrb[20].mxu1 }
 0x4c5   :  { %v2173_v46 = vadd.f32 %v2097_v59, %v9954_v63  ;;  %v2099_v45 = vpop.f32.mrb[21].mxu0  ;;  %v2170_v32 = vpop.f32.mrb[21].mxu1  ;;  %v2175_v29 = vadd.f32 %v2168_v58, %v9957_v50 }
 0x4c6   :  { %v2174_v18 = vadd.f32 %v2099_v45, %v9955_v42  ;;  %v2176_v33 = vadd.f32 %v2170_v32, %v9956_v62 }
 0x4c7   :  { %v5313_v34 = vmul.f32 -1.442695, %v2173_v46 }
 0x4c8   :  { %v5314_v60 = vmul.f32 -1.442695, %v2174_v18  ;;  %v5315_v30 = vmul.f32 -1.442695, %v2176_v33 }
 0x4c9   :  { %7279 = vpow2.f32 %v5313_v34 }
 0x4ca   :  { %7281 = vpow2.f32 %v5314_v60 }
 0x4cb   :  { %7283 = vpow2.f32 %v5315_v30 }
 0x4cc   :  { %7285 = vtanh.f32 %v2175_v29 }
 0x4d3   :  { %v7280_v9 = vpop.eup %7279 }
 0x4d4   :  { %v7282_v28 = vpop.eup %7281  ;;  %v2180_v37 = vadd.f32 1.0, %v7280_v9 }
 0x4d5   :  { %v2186_v21 = vadd.f32 1.0, %v7282_v28  ;;  %v7284_v59 = vpop.eup %7283  ;;  %v9958_v28 = vcombine.high %v9889_v53, %v9890_v23 }
 0x4d6   :  { %7287 = vrcp.f32 %v2180_v37  ;;  %v7286_v63 = vpop.eup %7285  ;;  %v2193_v34 = vadd.f32 1.0, %v7284_v59 }
 0x4d7   :  { %7289 = vrcp.f32 %v2186_v21 }
 0x4d8   :  { %7291 = vrcp.f32 %v2193_v34 }
 0x4e0   :  { %v7288_v45 = vpop.eup %7287 }
 0x4e1   :  { %v7290_v46 = vpop.eup %7289  ;;  %v2197_v18 = vmul.f32 %v7288_v45, %v7286_v63  ;;  %v9959_v63 = vcombine.high %v9892_v24, %v9893_v26 }
 0x4e2   :  { %v2196_v60 = vmul.f32 %v7290_v46, %v8471_v20 }
 0x4e4   :  { %v2198_v32 = vadd.f32 %v2197_v18, %v2196_v60  ;;  %v2280_v33 = vpop.f32.mrb[22].mxu0  ;;  %v2351_v62 = vpop.f32.mrb[22].mxu1  ;;  %v9961_v60 = vld [vmem:[#allocation92_spill] sm:$0xff] }
 0x4e5   :  { %v2282_v58 = vpop.f32.mrb[23].mxu0  ;;  %v2353_v50 = vpop.f32.mrb[23].mxu1 }
 0x4e6   :  { %v2360_v9 = vcombine.low %v2280_v33, %v2282_v58  ;;  %v2361_v30 = vcombine.low %v2351_v62, %v2353_v50  ;;  %7293 = vtanh.f32 %v2198_v32  ;;  %v8614_v21 = vsel %vm2206_vm11, %v2198_v32, %v8471_v20  ;;  %v7292_v50 = vpop.eup %7291  ;;  %v9962_v32 = vld [vmem:[#allocation93_spill] sm:$0xff]  ;;  %v9963_v58 = vld [vmem:[#allocation94_spill] sm:$0xff] }
 0x4e8   :  { %v2364_v29 = vadd.f32 %v2360_v9, %v9958_v28  ;;  %v2365_v37 = vadd.f32 %v2361_v30, %v9959_v63  ;;  %v9964_v9 = vld [vmem:[#allocation95_spill] sm:$0xff]  ;;  %v9965_v28 = vld [vmem:[#allocation96_spill] sm:$0xff] }
 0x4ea   :  { %v5316_v59 = vmul.f32 -1.442695, %v2364_v29  ;;  %v2373_v45 = vrot.slane %v2364_v29, 4  ;;  %v2383_v18 = vrot.slane %v2365_v37, 4  ;;  %v9966_v29 = vld [vmem:[#allocation97_spill] sm:$0xff] }
 0x4ec   :  { %7295 = vpow2.f32 %v5316_v59  ;;  %v5317_v46 = vmul.f32 -1.442695, %v2373_v45  ;;  %v5318_v23 = vmul.f32 -1.442695, %v2383_v18 }
 0x4ee   :  { %7297 = vpow2.f32 %v5317_v46 }
 0x4ef   :  { %7299 = vtanh.f32 %v2365_v37 }
 0x4f0   :  { %v7294_v62 = vpop.eup %7293  ;;  %7301 = vpow2.f32 %v5318_v23 }
 0x4f1   :  { %v2200_v34 = vmul.f32 %v7294_v62, %v7292_v50  ;;  %v8652_v50 = vpop.permute.xlu1 %2711 }
 0x4f2   :  { %vm2713_vm12 = vcmp.eq.s32.totalorder %v8652_v50, 1 }
 0x4f3   :  { %v8625_v20 = vsel %vm2206_vm11, %v2200_v34, %v8484_v43 }
 0x4f4   :  { %2461 = vmatmul.mubr.f32.vlgmr.msra.gmra.mrb[24].mxu0 %v8625_v20  ;;  %2532 = vmatmul.mubr.f32.vlgmr.msra.gmra.mrb[24].mxu1 %v8625_v20 }
 0x4f5   :  { %6123 = vmatpush1.bf16.msra.mxu0 %v9826_v3  ;;  %6155 = vmatpush1.bf16.msra.mxu1 %v9827_v7 }
 0x4f6   :  { %v7296_v53 = vpop.eup %7295  ;;  %6125 = vmatprep.subr.bf16.mxu0 %v9828_v0  ;;  %6157 = vmatprep.subr.bf16.mxu1 %v9829_v14 }
 0x4f7   :  { %v2369_v24 = vadd.f32 1.0, %v7296_v53  ;;  %2602 = vmatprep.mubr.f32.mxu0 %v9736_v47  ;;  %2673 = vmatprep.mubr.f32.mxu1 %v9736_v47  ;;  %v9967_v53 = vld [vmem:[#allocation29_spill] sm:$0xff] }
 0x4f8   :  { %v7298_v26 = vpop.eup %7297 }
 0x4f9   :  { %7303 = vrcp.f32 %v2369_v24  ;;  %v2378_v43 = vadd.f32 1.0, %v7298_v26  ;;  %6127 = vmatpush1.bf16.msra.mxu0 %v9830_v61  ;;  %6159 = vmatpush1.bf16.msra.mxu1 %v9895_v44  ;;  %v7300_v33 = vpop.eup %7299  ;;  %v9968_v24 = vld [vmem:[#allocation30_spill] sm:$0xff]  ;;  %v9969_v26 = vld [vmem:[#allocation31_spill] sm:$0xff] }
 0x4fa   :  { %6129 = vmatprep.subr.bf16.mxu0 %v9896_v41  ;;  %6161 = vmatprep.subr.bf16.mxu1 %v9897_v49  ;;  %v7302_v30 = vpop.eup %7301 }
 0x4fb   :  { %7305 = vrcp.f32 %v2378_v43  ;;  %v2388_v45 = vadd.f32 1.0, %v7302_v30  ;;  %v9970_v43 = vld [vmem:[#allocation32_spill] sm:$0xff]  ;;  %v9972_v30 = vld [vmem:[#allocation34_spill] sm:$0xff] }
 0x4fd   :  { %6131 = vmatpush1.bf16.msra.mxu0 %v9898_v52  ;;  %6163 = vmatpush1.bf16.msra.mxu1 %v9960_v36  ;;  %7307 = vrcp.f32 %v2388_v45  ;;  %v9976_v45 = vld [vmem:[#allocation38_spill] sm:$0xff] }
 0x4fe   :  { %6133 = vmatprep.subr.bf16.mxu0 %v9961_v60  ;;  %6165 = vmatprep.subr.bf16.mxu1 %v9962_v32 }
 0x501   :  { %6135 = vmatpush1.bf16.msra.mxu0 %v9963_v58  ;;  %6167 = vmatpush1.bf16.msra.mxu1 %v9964_v9 }
 0x502   :  { %6137 = vmatprep.subr.bf16.mxu0 %v9965_v28  ;;  %6169 = vmatprep.subr.bf16.mxu1 %v9966_v29 }
 0x503   :  { %v7304_v63 = vpop.eup %7303 }
 0x504   :  { %v2392_v37 = vmul.f32 %v7304_v63, %v7300_v33  ;;  %v9971_v33 = vld [vmem:[#allocation33_spill] sm:$0xff]  ;;  %v9973_v63 = vld [vmem:[#allocation35_spill] sm:$0xff] }
 0x505   :  { %v7306_v59 = vpop.eup %7305  ;;  %6139 = vmatpush1.bf16.msra.mxu0 %v9842_v48  ;;  %6171 = vmatpush1.bf16.msra.mxu1 %v9906_v13 }
 0x506   :  { %v2391_v46 = vmul.f32 %v7306_v59, %v8519_v19  ;;  %6141 = vmatprep.subr.bf16.mxu0 %v9844_v11  ;;  %6173 = vmatprep.subr.bf16.mxu1 %v9907_v31  ;;  %v9975_v59 = vld [vmem:[#allocation37_spill] sm:$0xff] }
 0x507   :  { %v7308_v34 = vpop.eup %7307 }
 0x508   :  { %v2393_v62 = vadd.f32 %v2392_v37, %v2391_v46  ;;  %v9974_v37 = vld [vmem:[#allocation36_spill] sm:$0xff]  ;;  %v9977_v46 = vld [vmem:[#allocation39_spill] sm:$0xff] }
 0x509   :  { %6143 = vmatpush1.bf16.msra.mxu0 %v9908_v6  ;;  %6175 = vmatpush1.bf16.msra.mxu1 %v9909_v38 }
 0x50a   :  { %6145 = vmatprep.subr.bf16.mxu0 %v9910_v25  ;;  %6177 = vmatprep.subr.bf16.mxu1 %v9911_v22  ;;  %7309 = vtanh.f32 %v2393_v62  ;;  %v8662_v18 = vsel %vm2713_vm12, %v2393_v62, %v8519_v19  ;;  %v9978_v62 = vld [vmem:[#allocation40_spill] sm:$0xff] }
 0x50d   :  { %6147 = vmatpush1.bf16.msra.mxu0 %v9850_v10  ;;  %6179 = vmatpush1.bf16.msra.mxu1 %v9851_v40 }
 0x50e   :  { %6149 = vmatprep.subr.bf16.mxu0 %v9852_v39  ;;  %6181 = vmatprep.subr.bf16.mxu1 %v9912_v12 }
 0x511   :  { %6151 = vmatpush1.bf16.msra.mxu0 %v9854_v35  ;;  %6183 = vmatpush1.bf16.msra.mxu1 %v9855_v56 }
 0x512   :  { %6185 = vmatprep.subr.bf16.mxu0 %v9856_v27  ;;  %6217 = vmatprep.subr.bf16.mxu1 %v9857_v1 }
 0x514   :  { %v7310_v23 = vpop.eup %7309 }
 0x515   :  { %v2395_v19 = vmul.f32 %v7310_v23, %v7308_v34  ;;  %v9979_v34 = vld [vmem:[#allocation41_spill] sm:$0xff]  ;;  %v9980_v23 = vld [vmem:[#allocation42_spill] sm:$0xff] }
 0x517   :  { %2603 = vmatmul.mubr.f32.vlgmr.msra.gmra.mrb[24].mxu0 %v2395_v19  ;;  %2674 = vmatmul.mubr.f32.vlgmr.msra.gmra.mrb[24].mxu1 %v2395_v19 }
 0x518   :  { %6187 = vmatpush1.bf16.msra.mxu0 %v7798_v51  ;;  %6219 = vmatpush1.bf16.msra.mxu1 %v7801_v54 }
 0x519   :  { %6189 = vmatprep.subr.bf16.mxu0 %v7803_v55  ;;  %6221 = vmatprep.subr.bf16.mxu1 %v7806_v57 }
 0x51a   :  { %2785 = vmatprep.mubr.f32.mxu0 %v9736_v47  ;;  %2856 = vmatprep.mubr.f32.mxu1 %v9736_v47 }
 0x51c   :  { %6191 = vmatpush1.bf16.msra.mxu0 %v7809_v2  ;;  %6223 = vmatpush1.bf16.msra.mxu1 %v7813_v4 }
 0x51d   :  { %6193 = vmatprep.subr.bf16.mxu0 %v7815_v5  ;;  %6225 = vmatprep.subr.bf16.mxu1 %v7818_v8 }
 0x520   :  { %6195 = vmatpush1.bf16.msra.mxu0 %v7823_v15  ;;  %6227 = vmatpush1.bf16.msra.mxu1 %v7827_v16 }
 0x521   :  { %6197 = vmatprep.subr.bf16.mxu0 %v7829_v17  ;;  %6229 = vmatprep.subr.bf16.mxu1 %v9967_v53 }
 0x524   :  { %6199 = vmatpush1.bf16.msra.mxu0 %v9968_v24  ;;  %6231 = vmatpush1.bf16.msra.mxu1 %v9969_v26 }
 0x525   :  { %6201 = vmatprep.subr.bf16.mxu0 %v9970_v43  ;;  %6233 = vmatprep.subr.bf16.mxu1 %v9971_v33  ;;  %v9981_v43 = vld [vmem:[#allocation43_spill] sm:$0xff]  ;;  %v9982_v33 = vld [vmem:[#allocation44_spill] sm:$0xff] }
 0x528   :  { %6203 = vmatpush1.bf16.msra.mxu0 %v9972_v30  ;;  %6235 = vmatpush1.bf16.msra.mxu1 %v9973_v63  ;;  %v9983_v30 = vld [vmem:[#allocation45_spill] sm:$0xff]  ;;  %v9984_v63 = vld [vmem:[#allocation46_spill] sm:$0xff] }
 0x529   :  { %6205 = vmatprep.subr.bf16.mxu0 %v9974_v37  ;;  %6237 = vmatprep.subr.bf16.mxu1 %v9975_v59  ;;  %v9985_v37 = vld [vmem:[#allocation47_spill] sm:$0xff]  ;;  %v9986_v59 = vld [vmem:[#allocation48_spill] sm:$0xff] }
 0x52c   :  { %6207 = vmatpush1.bf16.msra.mxu0 %v9976_v45  ;;  %6239 = vmatpush1.bf16.msra.mxu1 %v9977_v46  ;;  %v9987_v45 = vld [vmem:[#allocation49_spill] sm:$0xff]  ;;  %v9988_v46 = vld [vmem:[#allocation114_spill] sm:$0xff] }
 0x52d   :  { %6209 = vmatprep.subr.bf16.mxu0 %v9978_v62  ;;  %6241 = vmatprep.subr.bf16.mxu1 %v9979_v34  ;;  %v8709_v34 = vsel %vm2713_vm12, %v2395_v19, %v9988_v46  ;;  %v9995_v19 = vld [vmem:[#allocation55_spill] sm:$0xff]  ;;  %v9996_v46 = vld [vmem:[#allocation56_spill] sm:$0xff] }
 0x52e   :  { %9989 = vst [vmem:[#allocation115_spill] sm:$0xff] %v8709_v34  ;;  %v10022_v62 = vld [vmem:[#allocation112_spill] sm:$0xff] }
 0x530   :  { %6211 = vmatpush1.bf16.msra.mxu0 %v9980_v23  ;;  %6243 = vmatpush1.bf16.msra.mxu1 %v9981_v43  ;;  %v10003_v43 = vld [vmem:[#allocation63_spill] sm:$0xff]  ;;  %v10004_v23 = vld [vmem:[#allocation64_spill] sm:$0xff] }
 0x531   :  { %6213 = vmatprep.subr.bf16.mxu0 %v9982_v33  ;;  %6245 = vmatprep.subr.bf16.mxu1 %v9983_v30  ;;  %v9990_v33 = vld [vmem:[#allocation50_spill] sm:$0xff]  ;;  %v9991_v30 = vld [vmem:[#allocation51_spill] sm:$0xff] }
 0x534   :  { %6215 = vmatpush1.bf16.msra.mxu0 %v9984_v63  ;;  %6247 = vmatpush1.bf16.msra.mxu1 %v9985_v37  ;;  %v9992_v63 = vld [vmem:[#allocation52_spill] sm:$0xff]  ;;  %v9993_v37 = vld [vmem:[#allocation53_spill] sm:$0xff] }
 0x535   :  { %6249 = vmatprep.subr.bf16.mxu0 %v9986_v59  ;;  %6281 = vmatprep.subr.bf16.mxu1 %v9987_v45  ;;  %v9994_v45 = vld [vmem:[#allocation54_spill] sm:$0xff]  ;;  %v9997_v59 = vld [vmem:[#allocation57_spill] sm:$0xff] }
 0x537   :  { %2786 = vmatmul.mubr.f32.vlgmr.msra.gmra.mrb[26].mxu0 %v8709_v34  ;;  %2857 = vmatmul.mubr.f32.vlgmr.msra.gmra.mrb[26].mxu1 %v8709_v34  ;;  %v9998_v34 = vld [vmem:[#allocation58_spill] sm:$0xff] }
 0x538   :  { %6251 = vmatpush1.bf16.msra.mxu0 %v9990_v33  ;;  %6283 = vmatpush1.bf16.msra.mxu1 %v9991_v30  ;;  %v9999_v33 = vld [vmem:[#allocation59_spill] sm:$0xff]  ;;  %v10000_v30 = vld [vmem:[#allocation60_spill] sm:$0xff] }
 0x539   :  { %6253 = vmatprep.subr.bf16.mxu0 %v9992_v63  ;;  %6285 = vmatprep.subr.bf16.mxu1 %v9993_v37  ;;  %v10001_v63 = vld [vmem:[#allocation61_spill] sm:$0xff]  ;;  %v10002_v37 = vld [vmem:[#allocation62_spill] sm:$0xff] }
 0x53a   :  { %2967 = vmatprep.mubr.f32.mxu0 %v9736_v47  ;;  %3038 = vmatprep.mubr.f32.mxu1 %v9736_v47 }
 0x53c   :  { %6255 = vmatpush1.bf16.msra.mxu0 %v9994_v45  ;;  %6287 = vmatpush1.bf16.msra.mxu1 %v9995_v19  ;;  %v10005_v45 = vld [vmem:[#allocation65_spill] sm:$0xff]  ;;  %v10006_v19 = vld [vmem:[#allocation66_spill] sm:$0xff] }
 0x53d   :  { %6257 = vmatprep.subr.bf16.mxu0 %v9996_v46  ;;  %6289 = vmatprep.subr.bf16.mxu1 %v9997_v59  ;;  %v10007_v46 = vld [vmem:[#allocation67_spill] sm:$0xff]  ;;  %v10008_v59 = vld [vmem:[#allocation68_spill] sm:$0xff] }
 0x540   :  { %6259 = vmatpush1.bf16.msra.mxu0 %v9998_v34  ;;  %6291 = vmatpush1.bf16.msra.mxu1 %v9999_v33  ;;  %v10009_v34 = vld [vmem:[#allocation69_spill] sm:$0xff]  ;;  %v10010_v33 = vld [vmem:[#allocation70_spill] sm:$0xff] }
 0x541   :  { %6261 = vmatprep.subr.bf16.mxu0 %v10000_v30  ;;  %6293 = vmatprep.subr.bf16.mxu1 %v10001_v63  ;;  %v10011_v30 = vld [vmem:[#allocation71_spill] sm:$0xff]  ;;  %v10012_v63 = vld [vmem:[#allocation72_spill] sm:$0xff] }
 0x544   :  { %6263 = vmatpush1.bf16.msra.mxu0 %v10002_v37  ;;  %6295 = vmatpush1.bf16.msra.mxu1 %v10003_v43  ;;  %v10013_v37 = vld [vmem:[#allocation73_spill] sm:$0xff]  ;;  %v10014_v43 = vld [vmem:[#allocation74_spill] sm:$0xff] }
 0x545   :  { %6265 = vmatprep.subr.bf16.mxu0 %v10004_v23  ;;  %6297 = vmatprep.subr.bf16.mxu1 %v10005_v45  ;;  %v10015_v23 = vld [vmem:[#allocation75_spill] sm:$0xff]  ;;  %v10016_v45 = vld [vmem:[#allocation76_spill] sm:$0xff] }
 0x548   :  { %6267 = vmatpush1.bf16.msra.mxu0 %v10006_v19  ;;  %6299 = vmatpush1.bf16.msra.mxu1 %v10007_v46  ;;  %v10017_v19 = vld [vmem:[#allocation77_spill] sm:$0xff]  ;;  %v10018_v46 = vld [vmem:[#allocation78_spill] sm:$0xff] }
 0x549   :  { %6269 = vmatprep.subr.bf16.mxu0 %v10008_v59  ;;  %6301 = vmatprep.subr.bf16.mxu1 %v10009_v34  ;;  %v10019_v59 = vld [vmem:[#allocation79_spill] sm:$0xff]  ;;  %v10020_v34 = vld [vmem:[#allocation80_spill] sm:$0xff] }
 0x54c   :  { %6271 = vmatpush1.bf16.msra.mxu0 %v10010_v33  ;;  %6303 = vmatpush1.bf16.msra.mxu1 %v10011_v30  ;;  %v10021_v33 = vld [vmem:[#allocation81_spill] sm:$0xff] }
 0x54d   :  { %6273 = vmatprep.subr.bf16.mxu0 %v10012_v63  ;;  %6305 = vmatprep.subr.bf16.mxu1 %v10013_v37 }
 0x550   :  { %6275 = vmatpush1.bf16.msra.mxu0 %v10014_v43  ;;  %6307 = vmatpush1.bf16.msra.mxu1 %v10015_v23 }
 0x551   :  { %6277 = vmatprep.subr.bf16.mxu0 %v10016_v45  ;;  %6309 = vmatprep.subr.bf16.mxu1 %v10017_v19  ;;  %v10023_v19 = vld [vmem:[#allocation134_spill] sm:$0xff] }
 0x554   :  { %6279 = vmatpush1.bf16.msra.mxu0 %v10018_v46  ;;  %6311 = vmatpush1.bf16.msra.mxu1 %v10019_v59  ;;  %v10024_v59 = vld [vmem:[#allocation135_spill] sm:$0xff] }
 0x555   :  { %6313 = vmatprep.subr.bf16.mxu0 %v10020_v34  ;;  %6345 = vmatprep.subr.bf16.mxu1 %v10021_v33 }
 0x5ea   :  { %v2604_v30 = vpop.f32.mrb[24].mxu0  ;;  %v2675_v63 = vpop.f32.mrb[24].mxu1 }
 0x5eb   :  { %v2680_v37 = vadd.f32 %v2604_v30, %v10022_v62  ;;  %v2606_v26 = vpop.f32.mrb[25].mxu0  ;;  %v2677_v43 = vpop.f32.mrb[25].mxu1  ;;  %v2682_v17 = vadd.f32 %v2675_v63, %v10024_v59 }
 0x5ec   :  { %v2681_v23 = vadd.f32 %v2606_v26, %v9955_v42  ;;  %v2683_v46 = vadd.f32 %v2677_v43, %v10023_v19 }
 0x5ed   :  { %v5319_v24 = vmul.f32 -1.442695, %v2680_v37 }
 0x5ee   :  { %v5320_v45 = vmul.f32 -1.442695, %v2681_v23  ;;  %v5321_v53 = vmul.f32 -1.442695, %v2683_v46 }
 0x5ef   :  { %7311 = vpow2.f32 %v5319_v24 }
 0x5f0   :  { %7313 = vpow2.f32 %v5320_v45 }
 0x5f1   :  { %7315 = vpow2.f32 %v5321_v53 }
 0x5f2   :  { %7317 = vtanh.f32 %v2682_v17  ;;  %v10026_v17 = vld [vmem:[#allocation122_spill] sm:$0xff] }
 0x5f9   :  { %v7312_v34 = vpop.eup %7311 }
 0x5fa   :  { %v7314_v16 = vpop.eup %7313  ;;  %v2687_v33 = vadd.f32 1.0, %v7312_v34 }
 0x5fb   :  { %v2693_v15 = vadd.f32 1.0, %v7314_v16  ;;  %v7316_v30 = vpop.eup %7315  ;;  %v10025_v16 = vld [vmem:[#allocation121_spill] sm:$0xff] }
 0x5fc   :  { %7319 = vrcp.f32 %v2687_v33  ;;  %v7318_v62 = vpop.eup %7317  ;;  %v2700_v24 = vadd.f32 1.0, %v7316_v30  ;;  %v10027_v33 = vcombine.low %v10025_v16, %v10026_v17  ;;  %v10028_v30 = vld [vmem:[#allocation123_spill] sm:$0xff] }
 0x5fd   :  { %7321 = vrcp.f32 %v2693_v15 }
 0x5fe   :  { %7323 = vrcp.f32 %v2700_v24 }
 0x606   :  { %v7320_v26 = vpop.eup %7319 }
 0x607   :  { %v7322_v37 = vpop.eup %7321  ;;  %v2704_v23 = vmul.f32 %v7320_v26, %v7318_v62  ;;  %v10029_v26 = vld [vmem:[#allocation124_spill] sm:$0xff] }
 0x608   :  { %v2703_v45 = vmul.f32 %v7322_v37, %v8614_v21  ;;  %v10030_v37 = vcombine.low %v10028_v30, %v10029_v26 }
 0x60a   :  { %v2705_v43 = vadd.f32 %v2704_v23, %v2703_v45  ;;  %v2787_v46 = vpop.f32.mrb[26].mxu0  ;;  %v2858_v19 = vpop.f32.mrb[26].mxu1 }
 0x60b   :  { %v2789_v63 = vpop.f32.mrb[27].mxu0  ;;  %v2860_v59 = vpop.f32.mrb[27].mxu1 }
 0x60c   :  { %v2867_v34 = vcombine.low %v2787_v46, %v2789_v63  ;;  %v2868_v53 = vcombine.low %v2858_v19, %v2860_v59  ;;  %7325 = vtanh.f32 %v2705_v43  ;;  %v8755_v15 = vsel %vm2713_vm12, %v2705_v43, %v8614_v21  ;;  %v7324_v59 = vpop.eup %7323 }
 0x60e   :  { %v2871_v62 = vadd.f32 %v2867_v34, %v10027_v33  ;;  %v2872_v23 = vadd.f32 %v2868_v53, %v10030_v37 }
 0x610   :  { %v5322_v45 = vmul.f32 -1.442695, %v2871_v62  ;;  %v2880_v24 = vrot.slane %v2871_v62, 4  ;;  %v2890_v46 = vrot.slane %v2872_v23, 4 }
 0x612   :  { %7327 = vpow2.f32 %v5322_v45  ;;  %v5323_v42 = vmul.f32 -1.442695, %v2880_v24  ;;  %v5324_v43 = vmul.f32 -1.442695, %v2890_v46 }
 0x614   :  { %7329 = vpow2.f32 %v5323_v42 }
 0x615   :  { %7331 = vtanh.f32 %v2872_v23 }
 0x616   :  { %v7326_v19 = vpop.eup %7325  ;;  %7333 = vpow2.f32 %v5324_v43 }
 0x617   :  { %v2707_v63 = vmul.f32 %v7326_v19, %v7324_v59  ;;  %v8793_v59 = vpop.permute.xlu0 %3218 }
 0x618   :  { %vm3220_vm13 = vcmp.eq.s32.totalorder %v8793_v59, 1 }
 0x619   :  { %v8766_v21 = vsel %vm2713_vm12, %v2707_v63, %v8625_v20 }
 0x61a   :  { %2968 = vmatmul.mubr.f32.vlgmr.msra.gmra.mrb[28].mxu0 %v8766_v21  ;;  %3039 = vmatmul.mubr.f32.vlgmr.msra.gmra.mrb[28].mxu1 %v8766_v21 }
 0x61b   :  { %6315 = vmatpush1.bf16.msra.mxu0 %v9826_v3  ;;  %6347 = vmatpush1.bf16.msra.mxu1 %v9827_v7 }
 0x61c   :  { %v7328_v34 = vpop.eup %7327  ;;  %6317 = vmatprep.subr.bf16.mxu0 %v9828_v0  ;;  %6349 = vmatprep.subr.bf16.mxu1 %v9829_v14 }
 0x61d   :  { %v2876_v42 = vadd.f32 1.0, %v7328_v34  ;;  %3109 = vmatprep.mubr.f32.mxu0 %v9736_v47  ;;  %3180 = vmatprep.mubr.f32.mxu1 %v9736_v47  ;;  %v10031_v34 = vld [vmem:[#allocation26_spill] sm:$0xff] }
 0x61e   :  { %v7330_v20 = vpop.eup %7329 }
 0x61f   :  { %7335 = vrcp.f32 %v2876_v42  ;;  %v2885_v50 = vadd.f32 1.0, %v7330_v20  ;;  %6319 = vmatpush1.bf16.msra.mxu0 %v9830_v61  ;;  %6351 = vmatpush1.bf16.msra.mxu1 %v9895_v44  ;;  %v7332_v53 = vpop.eup %7331  ;;  %v10032_v42 = vld [vmem:[#allocation27_spill] sm:$0xff]  ;;  %v10033_v20 = vld [vmem:[#allocation28_spill] sm:$0xff] }
 0x620   :  { %6321 = vmatprep.subr.bf16.mxu0 %v9896_v41  ;;  %6353 = vmatprep.subr.bf16.mxu1 %v9897_v49  ;;  %v7334_v33 = vpop.eup %7333 }
 0x621   :  { %7337 = vrcp.f32 %v2885_v50  ;;  %v2895_v45 = vadd.f32 1.0, %v7334_v33  ;;  %v10034_v50 = vld [vmem:[#allocation29_spill] sm:$0xff]  ;;  %v10036_v33 = vld [vmem:[#allocation31_spill] sm:$0xff] }
 0x623   :  { %6323 = vmatpush1.bf16.msra.mxu0 %v9898_v52  ;;  %6355 = vmatpush1.bf16.msra.mxu1 %v9960_v36  ;;  %7339 = vrcp.f32 %v2895_v45  ;;  %v10040_v45 = vld [vmem:[#allocation35_spill] sm:$0xff] }
 0x624   :  { %6325 = vmatprep.subr.bf16.mxu0 %v9961_v60  ;;  %6357 = vmatprep.subr.bf16.mxu1 %v9962_v32 }
 0x627   :  { %6327 = vmatpush1.bf16.msra.mxu0 %v9963_v58  ;;  %6359 = vmatpush1.bf16.msra.mxu1 %v9964_v9 }
 0x628   :  { %6329 = vmatprep.subr.bf16.mxu0 %v9965_v28  ;;  %6361 = vmatprep.subr.bf16.mxu1 %v9966_v29 }
 0x629   :  { %v7336_v62 = vpop.eup %7335 }
 0x62a   :  { %v2899_v37 = vmul.f32 %v7336_v62, %v7332_v53  ;;  %v10035_v53 = vld [vmem:[#allocation30_spill] sm:$0xff]  ;;  %v10037_v62 = vld [vmem:[#allocation32_spill] sm:$0xff] }
 0x62b   :  { %v7338_v23 = vpop.eup %7337  ;;  %6331 = vmatpush1.bf16.msra.mxu0 %v9842_v48  ;;  %6363 = vmatpush1.bf16.msra.mxu1 %v9906_v13 }
 0x62c   :  { %v2898_v24 = vmul.f32 %v7338_v23, %v8662_v18  ;;  %6333 = vmatprep.subr.bf16.mxu0 %v9844_v11  ;;  %6365 = vmatprep.subr.bf16.mxu1 %v9907_v31  ;;  %v10039_v23 = vld [vmem:[#allocation34_spill] sm:$0xff] }
 0x62d   :  { %v7340_v63 = vpop.eup %7339 }
 0x62e   :  { %v2900_v19 = vadd.f32 %v2899_v37, %v2898_v24  ;;  %v10038_v37 = vld [vmem:[#allocation33_spill] sm:$0xff]  ;;  %v10041_v24 = vld [vmem:[#allocation36_spill] sm:$0xff] }
 0x62f   :  { %6335 = vmatpush1.bf16.msra.mxu0 %v9908_v6  ;;  %6367 = vmatpush1.bf16.msra.mxu1 %v9909_v38 }
 0x630   :  { %6337 = vmatprep.subr.bf16.mxu0 %v9910_v25  ;;  %6369 = vmatprep.subr.bf16.mxu1 %v9911_v22  ;;  %7341 = vtanh.f32 %v2900_v19  ;;  %v8803_v46 = vsel %vm3220_vm13, %v2900_v19, %v8662_v18  ;;  %v10042_v19 = vld [vmem:[#allocation37_spill] sm:$0xff] }
 0x633   :  { %6339 = vmatpush1.bf16.msra.mxu0 %v9850_v10  ;;  %6371 = vmatpush1.bf16.msra.mxu1 %v9851_v40 }
 0x634   :  { %6341 = vmatprep.subr.bf16.mxu0 %v9852_v39  ;;  %6373 = vmatprep.subr.bf16.mxu1 %v9912_v12 }
 0x637   :  { %6343 = vmatpush1.bf16.msra.mxu0 %v9854_v35  ;;  %6375 = vmatpush1.bf16.msra.mxu1 %v9855_v56 }
 0x638   :  { %6377 = vmatprep.subr.bf16.mxu0 %v9856_v27  ;;  %6409 = vmatprep.subr.bf16.mxu1 %v9857_v1 }
 0x63a   :  { %v7342_v43 = vpop.eup %7341 }
 0x63b   :  { %v2902_v18 = vmul.f32 %v7342_v43, %v7340_v63  ;;  %v10043_v63 = vld [vmem:[#allocation38_spill] sm:$0xff]  ;;  %v10044_v43 = vld [vmem:[#allocation39_spill] sm:$0xff] }
 0x63d   :  { %3110 = vmatmul.mubr.f32.vlgmr.msra.gmra.mrb[28].mxu0 %v2902_v18  ;;  %3181 = vmatmul.mubr.f32.vlgmr.msra.gmra.mrb[28].mxu1 %v2902_v18 }
 0x63e   :  { %6379 = vmatpush1.bf16.msra.mxu0 %v7798_v51  ;;  %6411 = vmatpush1.bf16.msra.mxu1 %v7801_v54 }
 0x63f   :  { %6381 = vmatprep.subr.bf16.mxu0 %v7803_v55  ;;  %6413 = vmatprep.subr.bf16.mxu1 %v7806_v57 }
 0x640   :  { %3292 = vmatprep.mubr.f32.mxu0 %v9736_v47  ;;  %3363 = vmatprep.mubr.f32.mxu1 %v9736_v47 }
 0x642   :  { %6383 = vmatpush1.bf16.msra.mxu0 %v7809_v2  ;;  %6415 = vmatpush1.bf16.msra.mxu1 %v7813_v4 }
 0x643   :  { %6385 = vmatprep.subr.bf16.mxu0 %v7815_v5  ;;  %6417 = vmatprep.subr.bf16.mxu1 %v7818_v8 }
 0x646   :  { %6387 = vmatpush1.bf16.msra.mxu0 %v10031_v34  ;;  %6419 = vmatpush1.bf16.msra.mxu1 %v10032_v42  ;;  %v10090_v42 = vld [vmem:[#allocation133_spill] sm:$0xff] }
 0x647   :  { %6389 = vmatprep.subr.bf16.mxu0 %v10033_v20  ;;  %6421 = vmatprep.subr.bf16.mxu1 %v10034_v50  ;;  %v10045_v50 = vld [vmem:[#allocation40_spill] sm:$0xff] }
 0x64a   :  { %6391 = vmatpush1.bf16.msra.mxu0 %v10035_v53  ;;  %6423 = vmatpush1.bf16.msra.mxu1 %v10036_v33  ;;  %v10046_v53 = vld [vmem:[#allocation41_spill] sm:$0xff]  ;;  %v10047_v33 = vld [vmem:[#allocation42_spill] sm:$0xff] }
 0x64b   :  { %6393 = vmatprep.subr.bf16.mxu0 %v10037_v62  ;;  %6425 = vmatprep.subr.bf16.mxu1 %v10038_v37  ;;  %v10048_v62 = vld [vmem:[#allocation43_spill] sm:$0xff]  ;;  %v10049_v37 = vld [vmem:[#allocation44_spill] sm:$0xff] }
 0x64e   :  { %6395 = vmatpush1.bf16.msra.mxu0 %v10039_v23  ;;  %6427 = vmatpush1.bf16.msra.mxu1 %v10040_v45  ;;  %v10050_v23 = vld [vmem:[#allocation45_spill] sm:$0xff]  ;;  %v10051_v45 = vld [vmem:[#allocation46_spill] sm:$0xff] }
 0x64f   :  { %6397 = vmatprep.subr.bf16.mxu0 %v10041_v24  ;;  %6429 = vmatprep.subr.bf16.mxu1 %v10042_v19  ;;  %v10052_v24 = vld [vmem:[#allocation47_spill] sm:$0xff]  ;;  %v10053_v19 = vld [vmem:[#allocation48_spill] sm:$0xff] }
 0x652   :  { %6399 = vmatpush1.bf16.msra.mxu0 %v10043_v63  ;;  %6431 = vmatpush1.bf16.msra.mxu1 %v10044_v43  ;;  %v10054_v63 = vld [vmem:[#allocation49_spill] sm:$0xff]  ;;  %v10055_v43 = vld [vmem:[#allocation115_spill] sm:$0xff] }
 0x653   :  { %6401 = vmatprep.subr.bf16.mxu0 %v10045_v50  ;;  %6433 = vmatprep.subr.bf16.mxu1 %v10046_v53  ;;  %v8850_v53 = vsel %vm3220_vm13, %v2902_v18, %v10055_v43  ;;  %v10062_v18 = vld [vmem:[#allocation55_spill] sm:$0xff]  ;;  %v10063_v43 = vld [vmem:[#allocation56_spill] sm:$0xff] }
 0x654   :  { %10056 = vst [vmem:[#allocation116_spill] sm:$0xff] %v8850_v53  ;;  %v10089_v50 = vld [vmem:[#allocation112_spill] sm:$0xff] }
 0x656   :  { %6403 = vmatpush1.bf16.msra.mxu0 %v10047_v33  ;;  %6435 = vmatpush1.bf16.msra.mxu1 %v10048_v62  ;;  %v10070_v62 = vld [vmem:[#allocation63_spill] sm:$0xff]  ;;  %v10071_v33 = vld [vmem:[#allocation64_spill] sm:$0xff] }
 0x657   :  { %6405 = vmatprep.subr.bf16.mxu0 %v10049_v37  ;;  %6437 = vmatprep.subr.bf16.mxu1 %v10050_v23  ;;  %v10057_v37 = vld [vmem:[#allocation50_spill] sm:$0xff]  ;;  %v10058_v23 = vld [vmem:[#allocation51_spill] sm:$0xff] }
 0x65a   :  { %6407 = vmatpush1.bf16.msra.mxu0 %v10051_v45  ;;  %6439 = vmatpush1.bf16.msra.mxu1 %v10052_v24  ;;  %v10059_v45 = vld [vmem:[#allocation52_spill] sm:$0xff]  ;;  %v10060_v24 = vld [vmem:[#allocation53_spill] sm:$0xff] }
 0x65b   :  { %6441 = vmatprep.subr.bf16.mxu0 %v10053_v19  ;;  %6473 = vmatprep.subr.bf16.mxu1 %v10054_v63  ;;  %v10061_v63 = vld [vmem:[#allocation54_spill] sm:$0xff]  ;;  %v10064_v19 = vld [vmem:[#allocation57_spill] sm:$0xff] }
 0x65d   :  { %3293 = vmatmul.mubr.f32.vlgmr.msra.gmra.mrb[30].mxu0 %v8850_v53  ;;  %3364 = vmatmul.mubr.f32.vlgmr.msra.gmra.mrb[30].mxu1 %v8850_v53  ;;  %v10065_v53 = vld [vmem:[#allocation58_spill] sm:$0xff] }
 0x65e   :  { %6443 = vmatpush1.bf16.msra.mxu0 %v10057_v37  ;;  %6475 = vmatpush1.bf16.msra.mxu1 %v10058_v23  ;;  %v10066_v37 = vld [vmem:[#allocation59_spill] sm:$0xff]  ;;  %v10067_v23 = vld [vmem:[#allocation60_spill] sm:$0xff] }
 0x65f   :  { %6445 = vmatprep.subr.bf16.mxu0 %v10059_v45  ;;  %6477 = vmatprep.subr.bf16.mxu1 %v10060_v24  ;;  %v10068_v45 = vld [vmem:[#allocation61_spill] sm:$0xff]  ;;  %v10069_v24 = vld [vmem:[#allocation62_spill] sm:$0xff] }
 0x660   :  { %3474 = vmatprep.mubr.f32.mxu0 %v9736_v47  ;;  %3545 = vmatprep.mubr.f32.mxu1 %v9736_v47 }
 0x662   :  { %6447 = vmatpush1.bf16.msra.mxu0 %v10061_v63  ;;  %6479 = vmatpush1.bf16.msra.mxu1 %v10062_v18  ;;  %v10072_v63 = vld [vmem:[#allocation65_spill] sm:$0xff]  ;;  %v10073_v18 = vld [vmem:[#allocation66_spill] sm:$0xff] }
 0x663   :  { %6449 = vmatprep.subr.bf16.mxu0 %v10063_v43  ;;  %6481 = vmatprep.subr.bf16.mxu1 %v10064_v19  ;;  %v10074_v43 = vld [vmem:[#allocation67_spill] sm:$0xff]  ;;  %v10075_v19 = vld [vmem:[#allocation68_spill] sm:$0xff] }
 0x666   :  { %6451 = vmatpush1.bf16.msra.mxu0 %v10065_v53  ;;  %6483 = vmatpush1.bf16.msra.mxu1 %v10066_v37  ;;  %v10076_v53 = vld [vmem:[#allocation69_spill] sm:$0xff]  ;;  %v10077_v37 = vld [vmem:[#allocation70_spill] sm:$0xff] }
 0x667   :  { %6453 = vmatprep.subr.bf16.mxu0 %v10067_v23  ;;  %6485 = vmatprep.subr.bf16.mxu1 %v10068_v45  ;;  %v10078_v23 = vld [vmem:[#allocation71_spill] sm:$0xff]  ;;  %v10079_v45 = vld [vmem:[#allocation72_spill] sm:$0xff] }
 0x66a   :  { %6455 = vmatpush1.bf16.msra.mxu0 %v10069_v24  ;;  %6487 = vmatpush1.bf16.msra.mxu1 %v10070_v62  ;;  %v10080_v24 = vld [vmem:[#allocation73_spill] sm:$0xff]  ;;  %v10081_v62 = vld [vmem:[#allocation74_spill] sm:$0xff] }
 0x66b   :  { %6457 = vmatprep.subr.bf16.mxu0 %v10071_v33  ;;  %6489 = vmatprep.subr.bf16.mxu1 %v10072_v63  ;;  %v10082_v33 = vld [vmem:[#allocation75_spill] sm:$0xff]  ;;  %v10083_v63 = vld [vmem:[#allocation76_spill] sm:$0xff] }
 0x66e   :  { %6459 = vmatpush1.bf16.msra.mxu0 %v10073_v18  ;;  %6491 = vmatpush1.bf16.msra.mxu1 %v10074_v43  ;;  %v10084_v18 = vld [vmem:[#allocation77_spill] sm:$0xff]  ;;  %v10085_v43 = vld [vmem:[#allocation78_spill] sm:$0xff] }
 0x66f   :  { %6461 = vmatprep.subr.bf16.mxu0 %v10075_v19  ;;  %6493 = vmatprep.subr.bf16.mxu1 %v10076_v53  ;;  %v10086_v19 = vld [vmem:[#allocation79_spill] sm:$0xff]  ;;  %v10087_v53 = vld [vmem:[#allocation80_spill] sm:$0xff] }
 0x672   :  { %6463 = vmatpush1.bf16.msra.mxu0 %v10077_v37  ;;  %6495 = vmatpush1.bf16.msra.mxu1 %v10078_v23  ;;  %v10088_v37 = vld [vmem:[#allocation81_spill] sm:$0xff] }
 0x673   :  { %6465 = vmatprep.subr.bf16.mxu0 %v10079_v45  ;;  %6497 = vmatprep.subr.bf16.mxu1 %v10080_v24 }
 0x676   :  { %6467 = vmatpush1.bf16.msra.mxu0 %v10081_v62  ;;  %6499 = vmatpush1.bf16.msra.mxu1 %v10082_v33 }
 0x677   :  { %6469 = vmatprep.subr.bf16.mxu0 %v10083_v63  ;;  %6501 = vmatprep.subr.bf16.mxu1 %v10084_v18  ;;  %v10091_v18 = vld [vmem:[#allocation134_spill] sm:$0xff] }
 0x67a   :  { %6471 = vmatpush1.bf16.msra.mxu0 %v10085_v43  ;;  %6503 = vmatpush1.bf16.msra.mxu1 %v10086_v19  ;;  %v10092_v19 = vld [vmem:[#allocation135_spill] sm:$0xff] }
 0x67b   :  { %6505 = vmatprep.subr.bf16.mxu0 %v10087_v53  ;;  %6537 = vmatprep.subr.bf16.mxu1 %v10088_v37 }
 0x710   :  { %v3111_v23 = vpop.f32.mrb[28].mxu0  ;;  %v3182_v45 = vpop.f32.mrb[28].mxu1 }
 0x711   :  { %v3187_v24 = vadd.f32 %v3111_v23, %v10089_v50  ;;  %v3113_v20 = vpop.f32.mrb[29].mxu0  ;;  %v3184_v62 = vpop.f32.mrb[29].mxu1  ;;  %v3189_v5 = vadd.f32 %v3182_v45, %v10092_v19 }
 0x712   :  { %v3188_v33 = vadd.f32 %v3113_v20, %v10090_v42  ;;  %v3190_v43 = vadd.f32 %v3184_v62, %v10091_v18 }
 0x713   :  { %v5325_v34 = vmul.f32 -1.442695, %v3187_v24 }
 0x714   :  { %v5326_v63 = vmul.f32 -1.442695, %v3188_v33  ;;  %v5327_v8 = vmul.f32 -1.442695, %v3190_v43 }
 0x715   :  { %7343 = vpow2.f32 %v5325_v34 }
 0x716   :  { %7345 = vpow2.f32 %v5326_v63 }
 0x717   :  { %7347 = vpow2.f32 %v5327_v8 }
 0x718   :  { %7349 = vtanh.f32 %v3189_v5 }
 0x71f   :  { %v7344_v53 = vpop.eup %7343 }
 0x720   :  { %v7346_v4 = vpop.eup %7345  ;;  %v3194_v37 = vadd.f32 1.0, %v7344_v53 }
 0x721   :  { %v3200_v2 = vadd.f32 1.0, %v7346_v4  ;;  %v7348_v23 = vpop.eup %7347  ;;  %v10093_v4 = vcombine.high %v10025_v16, %v10026_v17 }
 0x722   :  { %7351 = vrcp.f32 %v3194_v37  ;;  %v7350_v50 = vpop.eup %7349  ;;  %v3207_v34 = vadd.f32 1.0, %v7348_v23 }
 0x723   :  { %7353 = vrcp.f32 %v3200_v2 }
 0x724   :  { %7355 = vrcp.f32 %v3207_v34 }
 0x72c   :  { %v7352_v20 = vpop.eup %7351 }
 0x72d   :  { %v7354_v24 = vpop.eup %7353  ;;  %v3211_v33 = vmul.f32 %v7352_v20, %v7350_v50  ;;  %v10094_v50 = vcombine.high %v10028_v30, %v10029_v26 }
 0x72e   :  { %v3210_v63 = vmul.f32 %v7354_v24, %v8755_v15 }
 0x730   :  { %v3212_v62 = vadd.f32 %v3211_v33, %v3210_v63  ;;  %v3294_v43 = vpop.f32.mrb[30].mxu0  ;;  %v3365_v18 = vpop.f32.mrb[30].mxu1 }
 0x731   :  { %v3296_v45 = vpop.f32.mrb[31].mxu0  ;;  %v3367_v19 = vpop.f32.mrb[31].mxu1 }
 0x732   :  { %v3374_v53 = vcombine.low %v3294_v43, %v3296_v45  ;;  %v3375_v8 = vcombine.low %v3365_v18, %v3367_v19  ;;  %7357 = vtanh.f32 %v3212_v62  ;;  %v8896_v2 = vsel %vm3220_vm13, %v3212_v62, %v8755_v15  ;;  %v7356_v19 = vpop.eup %7355 }
 0x734   :  { %v3378_v5 = vadd.f32 %v3374_v53, %v10093_v4  ;;  %v3379_v37 = vadd.f32 %v3375_v8, %v10094_v50  ;;  %v8934_v4 = vpop.permute.xlu1 %3725 }
 0x735   :  { %vm3727_vm14 = vcmp.eq.s32.totalorder %v8934_v4, 1 }
 0x736   :  { %v5328_v23 = vmul.f32 -1.442695, %v3378_v5  ;;  %v3387_v20 = vrot.slane %v3378_v5, 4  ;;  %v3397_v33 = vrot.slane %v3379_v37, 4 }
 0x738   :  { %7359 = vpow2.f32 %v5328_v23  ;;  %v5329_v24 = vmul.f32 -1.442695, %v3387_v20  ;;  %v5330_v16 = vmul.f32 -1.442695, %v3397_v33  ;;  %v10095_v20 = vld [vmem:[#allocation22_spill] sm:$0xff] }
 0x739   :  { %v10099_v33 = vld [vmem:[#allocation26_spill] sm:$0xff] }
 0x73a   :  { %7361 = vpow2.f32 %v5329_v24  ;;  %v10096_v24 = vld [vmem:[#allocation23_spill] sm:$0xff] }
 0x73b   :  { %7363 = vtanh.f32 %v3379_v37 }
 0x73c   :  { %v7358_v18 = vpop.eup %7357  ;;  %7365 = vpow2.f32 %v5330_v16  ;;  %v10101_v16 = vld [vmem:[#allocation28_spill] sm:$0xff] }
 0x73d   :  { %v3214_v34 = vmul.f32 %v7358_v18, %v7356_v19  ;;  %v10097_v19 = vld [vmem:[#allocation24_spill] sm:$0xff]  ;;  %v10098_v18 = vld [vmem:[#allocation25_spill] sm:$0xff] }
 0x73f   :  { %v8907_v15 = vsel %vm3220_vm13, %v3214_v34, %v8766_v21  ;;  %v10100_v34 = vld [vmem:[#allocation27_spill] sm:$0xff] }
 0x740   :  { %3475 = vmatmul.mubr.f32.vlgmr.msra.gmra.mrb[32].mxu0 %v8907_v15  ;;  %3546 = vmatmul.mubr.f32.vlgmr.msra.gmra.mrb[32].mxu1 %v8907_v15 }
 0x741   :  { %6507 = vmatpush1.bf16.msra.mxu0 %v9826_v3  ;;  %6539 = vmatpush1.bf16.msra.mxu1 %v9827_v7 }
 0x742   :  { %v7360_v17 = vpop.eup %7359  ;;  %6509 = vmatprep.subr.bf16.mxu0 %v9828_v0  ;;  %6541 = vmatprep.subr.bf16.mxu1 %v9829_v14 }
 0x743   :  { %v3383_v30 = vadd.f32 1.0, %v7360_v17  ;;  %3616 = vmatprep.mubr.f32.mxu0 %v9736_v47  ;;  %3687 = vmatprep.mubr.f32.mxu1 %v9736_v47  ;;  %v10102_v17 = vld [vmem:[#allocation29_spill] sm:$0xff] }
 0x744   :  { %v7362_v26 = vpop.eup %7361 }
 0x745   :  { %7367 = vrcp.f32 %v3383_v30  ;;  %v3392_v21 = vadd.f32 1.0, %v7362_v26  ;;  %6511 = vmatpush1.bf16.msra.mxu0 %v9830_v61  ;;  %6543 = vmatpush1.bf16.msra.mxu1 %v9895_v44  ;;  %v7364_v59 = vpop.eup %7363  ;;  %v10103_v30 = vld [vmem:[#allocation30_spill] sm:$0xff]  ;;  %v10104_v26 = vld [vmem:[#allocation31_spill] sm:$0xff] }
 0x746   :  { %6513 = vmatprep.subr.bf16.mxu0 %v9896_v41  ;;  %6545 = vmatprep.subr.bf16.mxu1 %v9897_v49  ;;  %v7366_v63 = vpop.eup %7365 }
 0x747   :  { %7369 = vrcp.f32 %v3392_v21  ;;  %v3402_v53 = vadd.f32 1.0, %v7366_v63  ;;  %v10105_v21 = vld [vmem:[#allocation32_spill] sm:$0xff]  ;;  %v10107_v63 = vld [vmem:[#allocation34_spill] sm:$0xff] }
 0x749   :  { %6515 = vmatpush1.bf16.msra.mxu0 %v9898_v52  ;;  %6547 = vmatpush1.bf16.msra.mxu1 %v9960_v36  ;;  %7371 = vrcp.f32 %v3402_v53  ;;  %v10111_v53 = vld [vmem:[#allocation38_spill] sm:$0xff] }
 0x74a   :  { %6517 = vmatprep.subr.bf16.mxu0 %v9961_v60  ;;  %6549 = vmatprep.subr.bf16.mxu1 %v9962_v32 }
 0x74d   :  { %6519 = vmatpush1.bf16.msra.mxu0 %v9963_v58  ;;  %6551 = vmatpush1.bf16.msra.mxu1 %v9964_v9 }
 0x74e   :  { %6521 = vmatprep.subr.bf16.mxu0 %v9965_v28  ;;  %6553 = vmatprep.subr.bf16.mxu1 %v9966_v29 }
 0x74f   :  { %v7368_v62 = vpop.eup %7367 }
 0x750   :  { %v3406_v43 = vmul.f32 %v7368_v62, %v7364_v59  ;;  %v10106_v59 = vld [vmem:[#allocation33_spill] sm:$0xff]  ;;  %v10108_v62 = vld [vmem:[#allocation35_spill] sm:$0xff] }
 0x751   :  { %v7370_v45 = vpop.eup %7369  ;;  %6523 = vmatpush1.bf16.msra.mxu0 %v9842_v48  ;;  %6555 = vmatpush1.bf16.msra.mxu1 %v9906_v13 }
 0x752   :  { %v3405_v8 = vmul.f32 %v7370_v45, %v8803_v46  ;;  %6525 = vmatprep.subr.bf16.mxu0 %v9844_v11  ;;  %6557 = vmatprep.subr.bf16.mxu1 %v9907_v31  ;;  %v10110_v45 = vld [vmem:[#allocation37_spill] sm:$0xff] }
 0x753   :  { %v7372_v37 = vpop.eup %7371 }
 0x754   :  { %v3407_v5 = vadd.f32 %v3406_v43, %v3405_v8  ;;  %v10109_v43 = vld [vmem:[#allocation36_spill] sm:$0xff]  ;;  %v10112_v8 = vld [vmem:[#allocation39_spill] sm:$0xff] }
 0x755   :  { %6527 = vmatpush1.bf16.msra.mxu0 %v9908_v6  ;;  %6559 = vmatpush1.bf16.msra.mxu1 %v9909_v38 }
 0x756   :  { %6529 = vmatprep.subr.bf16.mxu0 %v9910_v25  ;;  %6561 = vmatprep.subr.bf16.mxu1 %v9911_v22  ;;  %7373 = vtanh.f32 %v3407_v5  ;;  %v8944_v50 = vsel %vm3727_vm14, %v3407_v5, %v8803_v46  ;;  %v10113_v5 = vld [vmem:[#allocation40_spill] sm:$0xff] }
 0x759   :  { %6531 = vmatpush1.bf16.msra.mxu0 %v9850_v10  ;;  %6563 = vmatpush1.bf16.msra.mxu1 %v9851_v40 }
 0x75a   :  { %6533 = vmatprep.subr.bf16.mxu0 %v9852_v39  ;;  %6565 = vmatprep.subr.bf16.mxu1 %v9912_v12 }
 0x75d   :  { %6535 = vmatpush1.bf16.msra.mxu0 %v9854_v35  ;;  %6567 = vmatpush1.bf16.msra.mxu1 %v9855_v56 }
 0x75e   :  { %6569 = vmatprep.subr.bf16.mxu0 %v9856_v27  ;;  %6601 = vmatprep.subr.bf16.mxu1 %v9857_v1 }
 0x760   :  { %v7374_v23 = vpop.eup %7373 }
 0x761   :  { %v3409_v46 = vmul.f32 %v7374_v23, %v7372_v37  ;;  %v10114_v37 = vld [vmem:[#allocation41_spill] sm:$0xff]  ;;  %v10115_v23 = vld [vmem:[#allocation42_spill] sm:$0xff] }
 0x763   :  { %3617 = vmatmul.mubr.f32.vlgmr.msra.gmra.mrb[32].mxu0 %v3409_v46  ;;  %3688 = vmatmul.mubr.f32.vlgmr.msra.gmra.mrb[32].mxu1 %v3409_v46 }
 0x764   :  { %6571 = vmatpush1.bf16.msra.mxu0 %v7798_v51  ;;  %6603 = vmatpush1.bf16.msra.mxu1 %v7801_v54 }
 0x765   :  { %6573 = vmatprep.subr.bf16.mxu0 %v7803_v55  ;;  %6605 = vmatprep.subr.bf16.mxu1 %v7806_v57 }
 0x766   :  { %3799 = vmatprep.mubr.f32.mxu0 %v9736_v47  ;;  %3870 = vmatprep.mubr.f32.mxu1 %v9736_v47 }
 0x768   :  { %6575 = vmatpush1.bf16.msra.mxu0 %v10095_v20  ;;  %6607 = vmatpush1.bf16.msra.mxu1 %v10096_v24 }
 0x769   :  { %6577 = vmatprep.subr.bf16.mxu0 %v10097_v19  ;;  %6609 = vmatprep.subr.bf16.mxu1 %v10098_v18 }
 0x76c   :  { %6579 = vmatpush1.bf16.msra.mxu0 %v10099_v33  ;;  %6611 = vmatpush1.bf16.msra.mxu1 %v10100_v34 }
 0x76d   :  { %6581 = vmatprep.subr.bf16.mxu0 %v10101_v16  ;;  %6613 = vmatprep.subr.bf16.mxu1 %v10102_v17 }
 0x770   :  { %6583 = vmatpush1.bf16.msra.mxu0 %v10103_v30  ;;  %6615 = vmatpush1.bf16.msra.mxu1 %v10104_v26 }
 0x771   :  { %6585 = vmatprep.subr.bf16.mxu0 %v10105_v21  ;;  %6617 = vmatprep.subr.bf16.mxu1 %v10106_v59  ;;  %v10116_v21 = vld [vmem:[#allocation43_spill] sm:$0xff]  ;;  %v10117_v59 = vld [vmem:[#allocation44_spill] sm:$0xff] }
 0x774   :  { %6587 = vmatpush1.bf16.msra.mxu0 %v10107_v63  ;;  %6619 = vmatpush1.bf16.msra.mxu1 %v10108_v62  ;;  %v10118_v63 = vld [vmem:[#allocation45_spill] sm:$0xff]  ;;  %v10119_v62 = vld [vmem:[#allocation46_spill] sm:$0xff] }
 0x775   :  { %6589 = vmatprep.subr.bf16.mxu0 %v10109_v43  ;;  %6621 = vmatprep.subr.bf16.mxu1 %v10110_v45  ;;  %v10120_v43 = vld [vmem:[#allocation47_spill] sm:$0xff]  ;;  %v10121_v45 = vld [vmem:[#allocation48_spill] sm:$0xff] }
 0x778   :  { %6591 = vmatpush1.bf16.msra.mxu0 %v10111_v53  ;;  %6623 = vmatpush1.bf16.msra.mxu1 %v10112_v8  ;;  %v10122_v53 = vld [vmem:[#allocation49_spill] sm:$0xff]  ;;  %v10123_v8 = vld [vmem:[#allocation116_spill] sm:$0xff] }
 0x779   :  { %6593 = vmatprep.subr.bf16.mxu0 %v10113_v5  ;;  %6625 = vmatprep.subr.bf16.mxu1 %v10114_v37  ;;  %v8991_v37 = vsel %vm3727_vm14, %v3409_v46, %v10123_v8  ;;  %v10130_v46 = vld [vmem:[#allocation55_spill] sm:$0xff]  ;;  %v10131_v8 = vld [vmem:[#allocation56_spill] sm:$0xff] }
 0x77a   :  { %10124 = vst [vmem:[#allocation82_spill] sm:$0xff] %v8991_v37  ;;  %v10157_v5 = vld [vmem:[#allocation112_spill] sm:$0xff] }
 0x77c   :  { %6595 = vmatpush1.bf16.msra.mxu0 %v10115_v23  ;;  %6627 = vmatpush1.bf16.msra.mxu1 %v10116_v21  ;;  %v10138_v21 = vld [vmem:[#allocation63_spill] sm:$0xff]  ;;  %v10139_v23 = vld [vmem:[#allocation64_spill] sm:$0xff] }
 0x77d   :  { %6597 = vmatprep.subr.bf16.mxu0 %v10117_v59  ;;  %6629 = vmatprep.subr.bf16.mxu1 %v10118_v63  ;;  %v10125_v59 = vld [vmem:[#allocation50_spill] sm:$0xff]  ;;  %v10126_v63 = vld [vmem:[#allocation51_spill] sm:$0xff] }
 0x780   :  { %6599 = vmatpush1.bf16.msra.mxu0 %v10119_v62  ;;  %6631 = vmatpush1.bf16.msra.mxu1 %v10120_v43  ;;  %v10127_v62 = vld [vmem:[#allocation52_spill] sm:$0xff]  ;;  %v10128_v43 = vld [vmem:[#allocation53_spill] sm:$0xff] }
 0x781   :  { %6633 = vmatprep.subr.bf16.mxu0 %v10121_v45  ;;  %6665 = vmatprep.subr.bf16.mxu1 %v10122_v53  ;;  %v10129_v53 = vld [vmem:[#allocation54_spill] sm:$0xff]  ;;  %v10132_v45 = vld [vmem:[#allocation57_spill] sm:$0xff] }
 0x783   :  { %3800 = vmatmul.mubr.f32.vlgmr.msra.gmra.mrb[34].mxu0 %v8991_v37  ;;  %3871 = vmatmul.mubr.f32.vlgmr.msra.gmra.mrb[34].mxu1 %v8991_v37  ;;  %v10133_v37 = vld [vmem:[#allocation58_spill] sm:$0xff] }
 0x784   :  { %6635 = vmatpush1.bf16.msra.mxu0 %v10125_v59  ;;  %6667 = vmatpush1.bf16.msra.mxu1 %v10126_v63  ;;  %v10134_v59 = vld [vmem:[#allocation59_spill] sm:$0xff]  ;;  %v10135_v63 = vld [vmem:[#allocation60_spill] sm:$0xff] }
 0x785   :  { %6637 = vmatprep.subr.bf16.mxu0 %v10127_v62  ;;  %6669 = vmatprep.subr.bf16.mxu1 %v10128_v43  ;;  %v10136_v62 = vld [vmem:[#allocation61_spill] sm:$0xff]  ;;  %v10137_v43 = vld [vmem:[#allocation62_spill] sm:$0xff] }
 0x786   :  { %3981 = vmatprep.mubr.f32.mxu0 %v9736_v47  ;;  %4052 = vmatprep.mubr.f32.mxu1 %v9736_v47 }
 0x788   :  { %6639 = vmatpush1.bf16.msra.mxu0 %v10129_v53  ;;  %6671 = vmatpush1.bf16.msra.mxu1 %v10130_v46  ;;  %v10140_v53 = vld [vmem:[#allocation65_spill] sm:$0xff]  ;;  %v10141_v46 = vld [vmem:[#allocation66_spill] sm:$0xff] }
 0x789   :  { %6641 = vmatprep.subr.bf16.mxu0 %v10131_v8  ;;  %6673 = vmatprep.subr.bf16.mxu1 %v10132_v45  ;;  %v10142_v8 = vld [vmem:[#allocation67_spill] sm:$0xff]  ;;  %v10143_v45 = vld [vmem:[#allocation68_spill] sm:$0xff] }
 0x78c   :  { %6643 = vmatpush1.bf16.msra.mxu0 %v10133_v37  ;;  %6675 = vmatpush1.bf16.msra.mxu1 %v10134_v59  ;;  %v10144_v37 = vld [vmem:[#allocation69_spill] sm:$0xff]  ;;  %v10145_v59 = vld [vmem:[#allocation70_spill] sm:$0xff] }
 0x78d   :  { %6645 = vmatprep.subr.bf16.mxu0 %v10135_v63  ;;  %6677 = vmatprep.subr.bf16.mxu1 %v10136_v62  ;;  %v10146_v63 = vld [vmem:[#allocation71_spill] sm:$0xff]  ;;  %v10147_v62 = vld [vmem:[#allocation72_spill] sm:$0xff] }
 0x790   :  { %6647 = vmatpush1.bf16.msra.mxu0 %v10137_v43  ;;  %6679 = vmatpush1.bf16.msra.mxu1 %v10138_v21  ;;  %v10148_v43 = vld [vmem:[#allocation73_spill] sm:$0xff]  ;;  %v10149_v21 = vld [vmem:[#allocation74_spill] sm:$0xff] }
 0x791   :  { %6649 = vmatprep.subr.bf16.mxu0 %v10139_v23  ;;  %6681 = vmatprep.subr.bf16.mxu1 %v10140_v53  ;;  %v10150_v23 = vld [vmem:[#allocation75_spill] sm:$0xff]  ;;  %v10151_v53 = vld [vmem:[#allocation76_spill] sm:$0xff] }
 0x794   :  { %6651 = vmatpush1.bf16.msra.mxu0 %v10141_v46  ;;  %6683 = vmatpush1.bf16.msra.mxu1 %v10142_v8  ;;  %v10152_v46 = vld [vmem:[#allocation77_spill] sm:$0xff]  ;;  %v10153_v8 = vld [vmem:[#allocation78_spill] sm:$0xff] }
 0x795   :  { %6653 = vmatprep.subr.bf16.mxu0 %v10143_v45  ;;  %6685 = vmatprep.subr.bf16.mxu1 %v10144_v37  ;;  %v10154_v45 = vld [vmem:[#allocation79_spill] sm:$0xff]  ;;  %v10155_v37 = vld [vmem:[#allocation80_spill] sm:$0xff] }
 0x798   :  { %6655 = vmatpush1.bf16.msra.mxu0 %v10145_v59  ;;  %6687 = vmatpush1.bf16.msra.mxu1 %v10146_v63  ;;  %v10156_v59 = vld [vmem:[#allocation81_spill] sm:$0xff] }
 0x799   :  { %6657 = vmatprep.subr.bf16.mxu0 %v10147_v62  ;;  %6689 = vmatprep.subr.bf16.mxu1 %v10148_v43 }
 0x79c   :  { %6659 = vmatpush1.bf16.msra.mxu0 %v10149_v21  ;;  %6691 = vmatpush1.bf16.msra.mxu1 %v10150_v23 }
 0x79d   :  { %6661 = vmatprep.subr.bf16.mxu0 %v10151_v53  ;;  %6693 = vmatprep.subr.bf16.mxu1 %v10152_v46  ;;  %v10158_v46 = vld [vmem:[#allocation134_spill] sm:$0xff] }
 0x7a0   :  { %6663 = vmatpush1.bf16.msra.mxu0 %v10153_v8  ;;  %6695 = vmatpush1.bf16.msra.mxu1 %v10154_v45  ;;  %v10159_v45 = vld [vmem:[#allocation135_spill] sm:$0xff] }
 0x7a1   :  { %6697 = vmatprep.subr.bf16.mxu0 %v10155_v37  ;;  %6729 = vmatprep.subr.bf16.mxu1 %v10156_v59 }
 0x836   :  { %v3618_v63 = vpop.f32.mrb[32].mxu0  ;;  %v3689_v62 = vpop.f32.mrb[32].mxu1 }
 0x837   :  { %v3694_v43 = vadd.f32 %v3618_v63, %v10157_v5  ;;  %v3620_v26 = vpop.f32.mrb[33].mxu0  ;;  %v3691_v21 = vpop.f32.mrb[33].mxu1  ;;  %v3696_v16 = vadd.f32 %v3689_v62, %v10159_v45 }
 0x838   :  { %v3695_v23 = vadd.f32 %v3620_v26, %v10090_v42  ;;  %v3697_v8 = vadd.f32 %v3691_v21, %v10158_v46 }
 0x839   :  { %v5331_v30 = vmul.f32 -1.442695, %v3694_v43 }
 0x83a   :  { %v5332_v53 = vmul.f32 -1.442695, %v3695_v23  ;;  %v5333_v17 = vmul.f32 -1.442695, %v3697_v8 }
 0x83b   :  { %7375 = vpow2.f32 %v5331_v30 }
 0x83c   :  { %7377 = vpow2.f32 %v5332_v53 }
 0x83d   :  { %7379 = vpow2.f32 %v5333_v17 }
 0x83e   :  { %7381 = vtanh.f32 %v3696_v16  ;;  %v10161_v16 = vld [vmem:[#allocation126_spill] sm:$0xff] }
 0x845   :  { %v7376_v37 = vpop.eup %7375 }
 0x846   :  { %v7378_v34 = vpop.eup %7377  ;;  %v3701_v59 = vadd.f32 1.0, %v7376_v37 }
 0x847   :  { %v3707_v33 = vadd.f32 1.0, %v7378_v34  ;;  %v7380_v63 = vpop.eup %7379  ;;  %v10160_v34 = vld [vmem:[#allocation125_spill] sm:$0xff] }
 0x848   :  { %7383 = vrcp.f32 %v3701_v59  ;;  %v7382_v5 = vpop.eup %7381  ;;  %v3714_v30 = vadd.f32 1.0, %v7380_v63  ;;  %v10162_v59 = vcombine.low %v10160_v34, %v10161_v16  ;;  %v10163_v63 = vld [vmem:[#allocation127_spill] sm:$0xff] }
 0x849   :  { %7385 = vrcp.f32 %v3707_v33 }
 0x84a   :  { %7387 = vrcp.f32 %v3714_v30 }
 0x852   :  { %v7384_v26 = vpop.eup %7383 }
 0x853   :  { %v7386_v43 = vpop.eup %7385  ;;  %v3718_v23 = vmul.f32 %v7384_v26, %v7382_v5  ;;  %v10164_v26 = vld [vmem:[#allocation128_spill] sm:$0xff] }
 0x854   :  { %v3717_v53 = vmul.f32 %v7386_v43, %v8896_v2  ;;  %v10165_v43 = vcombine.low %v10163_v63, %v10164_v26 }
 0x856   :  { %v3719_v21 = vadd.f32 %v3718_v23, %v3717_v53  ;;  %v3801_v8 = vpop.f32.mrb[34].mxu0  ;;  %v3872_v46 = vpop.f32.mrb[34].mxu1 }
 0x857   :  { %v3803_v62 = vpop.f32.mrb[35].mxu0  ;;  %v3874_v45 = vpop.f32.mrb[35].mxu1 }
 0x858   :  { %v3881_v37 = vcombine.low %v3801_v8, %v3803_v62  ;;  %v3882_v17 = vcombine.low %v3872_v46, %v3874_v45  ;;  %7389 = vtanh.f32 %v3719_v21  ;;  %v9037_v33 = vsel %vm3727_vm14, %v3719_v21, %v8896_v2  ;;  %v7388_v45 = vpop.eup %7387 }
 0x85a   :  { %v3885_v5 = vadd.f32 %v3881_v37, %v10162_v59  ;;  %v3886_v23 = vadd.f32 %v3882_v17, %v10165_v43 }
 0x85c   :  { %v5334_v53 = vmul.f32 -1.442695, %v3885_v5  ;;  %v3894_v30 = vrot.slane %v3885_v5, 4  ;;  %v3904_v8 = vrot.slane %v3886_v23, 4 }
 0x85e   :  { %7391 = vpow2.f32 %v5334_v53  ;;  %v5335_v42 = vmul.f32 -1.442695, %v3894_v30  ;;  %v5336_v21 = vmul.f32 -1.442695, %v3904_v8 }
 0x860   :  { %7393 = vpow2.f32 %v5335_v42 }
 0x861   :  { %7395 = vtanh.f32 %v3886_v23 }
 0x862   :  { %v7390_v46 = vpop.eup %7389  ;;  %7397 = vpow2.f32 %v5336_v21 }
 0x863   :  { %v3721_v62 = vmul.f32 %v7390_v46, %v7388_v45  ;;  %v9075_v45 = vpop.permute.xlu0 %4232 }
 0x864   :  { %vm4234_vm15 = vcmp.eq.s32.totalorder %v9075_v45, 1 }
 0x865   :  { %v9048_v2 = vsel %vm3727_vm14, %v3721_v62, %v8907_v15 }
 0x866   :  { %3982 = vmatmul.mubr.f32.vlgmr.msra.gmra.mrb[36].mxu0 %v9048_v2  ;;  %4053 = vmatmul.mubr.f32.vlgmr.msra.gmra.mrb[36].mxu1 %v9048_v2 }
 0x867   :  { %6699 = vmatpush1.bf16.msra.mxu0 %v9826_v3  ;;  %6731 = vmatpush1.bf16.msra.mxu1 %v9827_v7 }
 0x868   :  { %v7392_v37 = vpop.eup %7391  ;;  %6701 = vmatprep.subr.bf16.mxu0 %v9828_v0  ;;  %6733 = vmatprep.subr.bf16.mxu1 %v9829_v14 }
 0x869   :  { %v3890_v42 = vadd.f32 1.0, %v7392_v37  ;;  %4123 = vmatprep.mubr.f32.mxu0 %v9736_v47  ;;  %4194 = vmatprep.mubr.f32.mxu1 %v9736_v47  ;;  %v10166_v37 = vld [vmem:[#allocation26_spill] sm:$0xff] }
 0x86a   :  { %v7394_v15 = vpop.eup %7393 }
 0x86b   :  { %7399 = vrcp.f32 %v3890_v42  ;;  %v3899_v4 = vadd.f32 1.0, %v7394_v15  ;;  %6703 = vmatpush1.bf16.msra.mxu0 %v9830_v61  ;;  %6735 = vmatpush1.bf16.msra.mxu1 %v9895_v44  ;;  %v7396_v17 = vpop.eup %7395  ;;  %v10167_v42 = vld [vmem:[#allocation27_spill] sm:$0xff]  ;;  %v10168_v15 = vld [vmem:[#allocation28_spill] sm:$0xff] }
 0x86c   :  { %6705 = vmatprep.subr.bf16.mxu0 %v9896_v41  ;;  %6737 = vmatprep.subr.bf16.mxu1 %v9897_v49  ;;  %v7398_v59 = vpop.eup %7397 }
 0x86d   :  { %7401 = vrcp.f32 %v3899_v4  ;;  %v3909_v53 = vadd.f32 1.0, %v7398_v59  ;;  %v10169_v4 = vld [vmem:[#allocation29_spill] sm:$0xff]  ;;  %v10171_v59 = vld [vmem:[#allocation31_spill] sm:$0xff] }
 0x86f   :  { %6707 = vmatpush1.bf16.msra.mxu0 %v9898_v52  ;;  %6739 = vmatpush1.bf16.msra.mxu1 %v9960_v36  ;;  %7403 = vrcp.f32 %v3909_v53  ;;  %v10175_v53 = vld [vmem:[#allocation35_spill] sm:$0xff] }
 0x870   :  { %6709 = vmatprep.subr.bf16.mxu0 %v9961_v60  ;;  %6741 = vmatprep.subr.bf16.mxu1 %v9962_v32 }
 0x873   :  { %6711 = vmatpush1.bf16.msra.mxu0 %v9963_v58  ;;  %6743 = vmatpush1.bf16.msra.mxu1 %v9964_v9 }
 0x874   :  { %6713 = vmatprep.subr.bf16.mxu0 %v9965_v28  ;;  %6745 = vmatprep.subr.bf16.mxu1 %v9966_v29 }
 0x875   :  { %v7400_v5 = vpop.eup %7399 }
 0x876   :  { %v3913_v43 = vmul.f32 %v7400_v5, %v7396_v17  ;;  %v10170_v17 = vld [vmem:[#allocation30_spill] sm:$0xff]  ;;  %v10172_v5 = vld [vmem:[#allocation32_spill] sm:$0xff] }
 0x877   :  { %v7402_v23 = vpop.eup %7401  ;;  %6715 = vmatpush1.bf16.msra.mxu0 %v9842_v48  ;;  %6747 = vmatpush1.bf16.msra.mxu1 %v9906_v13 }
 0x878   :  { %v3912_v30 = vmul.f32 %v7402_v23, %v8944_v50  ;;  %6717 = vmatprep.subr.bf16.mxu0 %v9844_v11  ;;  %6749 = vmatprep.subr.bf16.mxu1 %v9907_v31  ;;  %v10174_v23 = vld [vmem:[#allocation34_spill] sm:$0xff] }
 0x879   :  { %v7404_v62 = vpop.eup %7403 }
 0x87a   :  { %v3914_v46 = vadd.f32 %v3913_v43, %v3912_v30  ;;  %v10173_v43 = vld [vmem:[#allocation33_spill] sm:$0xff]  ;;  %v10176_v30 = vld [vmem:[#allocation36_spill] sm:$0xff] }
 0x87b   :  { %6719 = vmatpush1.bf16.msra.mxu0 %v9908_v6  ;;  %6751 = vmatpush1.bf16.msra.mxu1 %v9909_v38 }
 0x87c   :  { %6721 = vmatprep.subr.bf16.mxu0 %v9910_v25  ;;  %6753 = vmatprep.subr.bf16.mxu1 %v9911_v22  ;;  %7405 = vtanh.f32 %v3914_v46  ;;  %v9085_v8 = vsel %vm4234_vm15, %v3914_v46, %v8944_v50  ;;  %v10177_v46 = vld [vmem:[#allocation37_spill] sm:$0xff] }
 0x87f   :  { %6723 = vmatpush1.bf16.msra.mxu0 %v9850_v10  ;;  %6755 = vmatpush1.bf16.msra.mxu1 %v9851_v40 }
 0x880   :  { %6725 = vmatprep.subr.bf16.mxu0 %v9852_v39  ;;  %6757 = vmatprep.subr.bf16.mxu1 %v9912_v12 }
 0x883   :  { %6727 = vmatpush1.bf16.msra.mxu0 %v9854_v35  ;;  %6759 = vmatpush1.bf16.msra.mxu1 %v9855_v56 }
 0x884   :  { %6761 = vmatprep.subr.bf16.mxu0 %v9856_v27  ;;  %6793 = vmatprep.subr.bf16.mxu1 %v9857_v1 }
 0x886   :  { %v7406_v21 = vpop.eup %7405 }
 0x887   :  { %v3916_v50 = vmul.f32 %v7406_v21, %v7404_v62  ;;  %v10178_v62 = vld [vmem:[#allocation38_spill] sm:$0xff]  ;;  %v10179_v21 = vld [vmem:[#allocation39_spill] sm:$0xff] }
 0x889   :  { %4124 = vmatmul.mubr.f32.vlgmr.msra.gmra.mrb[36].mxu0 %v3916_v50  ;;  %4195 = vmatmul.mubr.f32.vlgmr.msra.gmra.mrb[36].mxu1 %v3916_v50 }
 0x88a   :  { %6763 = vmatpush1.bf16.msra.mxu0 %v7798_v51  ;;  %6795 = vmatpush1.bf16.msra.mxu1 %v7801_v54 }
 0x88b   :  { %6765 = vmatprep.subr.bf16.mxu0 %v7803_v55  ;;  %6797 = vmatprep.subr.bf16.mxu1 %v7806_v57 }
 0x88c   :  { %4306 = vmatprep.mubr.f32.mxu0 %v9736_v47  ;;  %4377 = vmatprep.mubr.f32.mxu1 %v9736_v47 }
 0x88e   :  { %6767 = vmatpush1.bf16.msra.mxu0 %v10095_v20  ;;  %6799 = vmatpush1.bf16.msra.mxu1 %v10096_v24 }
 0x88f   :  { %6769 = vmatprep.subr.bf16.mxu0 %v10097_v19  ;;  %6801 = vmatprep.subr.bf16.mxu1 %v10098_v18 }
 0x892   :  { %6771 = vmatpush1.bf16.msra.mxu0 %v10166_v37  ;;  %6803 = vmatpush1.bf16.msra.mxu1 %v10167_v42  ;;  %v10225_v42 = vld [vmem:[#allocation133_spill] sm:$0xff] }
 0x893   :  { %6773 = vmatprep.subr.bf16.mxu0 %v10168_v15  ;;  %6805 = vmatprep.subr.bf16.mxu1 %v10169_v4  ;;  %v10180_v4 = vld [vmem:[#allocation40_spill] sm:$0xff] }
 0x896   :  { %6775 = vmatpush1.bf16.msra.mxu0 %v10170_v17  ;;  %6807 = vmatpush1.bf16.msra.mxu1 %v10171_v59  ;;  %v10181_v17 = vld [vmem:[#allocation41_spill] sm:$0xff]  ;;  %v10182_v59 = vld [vmem:[#allocation42_spill] sm:$0xff] }
 0x897   :  { %6777 = vmatprep.subr.bf16.mxu0 %v10172_v5  ;;  %6809 = vmatprep.subr.bf16.mxu1 %v10173_v43  ;;  %v10183_v5 = vld [vmem:[#allocation43_spill] sm:$0xff]  ;;  %v10184_v43 = vld [vmem:[#allocation44_spill] sm:$0xff] }
 0x89a   :  { %6779 = vmatpush1.bf16.msra.mxu0 %v10174_v23  ;;  %6811 = vmatpush1.bf16.msra.mxu1 %v10175_v53  ;;  %v10185_v23 = vld [vmem:[#allocation45_spill] sm:$0xff]  ;;  %v10186_v53 = vld [vmem:[#allocation46_spill] sm:$0xff] }
 0x89b   :  { %6781 = vmatprep.subr.bf16.mxu0 %v10176_v30  ;;  %6813 = vmatprep.subr.bf16.mxu1 %v10177_v46  ;;  %v10187_v30 = vld [vmem:[#allocation47_spill] sm:$0xff]  ;;  %v10188_v46 = vld [vmem:[#allocation48_spill] sm:$0xff] }
 0x89e   :  { %6783 = vmatpush1.bf16.msra.mxu0 %v10178_v62  ;;  %6815 = vmatpush1.bf16.msra.mxu1 %v10179_v21  ;;  %v10189_v62 = vld [vmem:[#allocation49_spill] sm:$0xff]  ;;  %v10190_v21 = vld [vmem:[#allocation82_spill] sm:$0xff] }
 0x89f   :  { %6785 = vmatprep.subr.bf16.mxu0 %v10180_v4  ;;  %6817 = vmatprep.subr.bf16.mxu1 %v10181_v17  ;;  %v9132_v17 = vsel %vm4234_vm15, %v3916_v50, %v10190_v21  ;;  %v10197_v50 = vld [vmem:[#allocation55_spill] sm:$0xff]  ;;  %v10198_v21 = vld [vmem:[#allocation56_spill] sm:$0xff] }
 0x8a0   :  { %10191 = vst [vmem:[#allocation83_spill] sm:$0xff] %v9132_v17  ;;  %v10224_v4 = vld [vmem:[#allocation112_spill] sm:$0xff] }
 0x8a2   :  { %6787 = vmatpush1.bf16.msra.mxu0 %v10182_v59  ;;  %6819 = vmatpush1.bf16.msra.mxu1 %v10183_v5  ;;  %v10205_v5 = vld [vmem:[#allocation63_spill] sm:$0xff]  ;;  %v10206_v59 = vld [vmem:[#allocation64_spill] sm:$0xff] }
 0x8a3   :  { %6789 = vmatprep.subr.bf16.mxu0 %v10184_v43  ;;  %6821 = vmatprep.subr.bf16.mxu1 %v10185_v23  ;;  %v10192_v43 = vld [vmem:[#allocation50_spill] sm:$0xff]  ;;  %v10193_v23 = vld [vmem:[#allocation51_spill] sm:$0xff] }
 0x8a6   :  { %6791 = vmatpush1.bf16.msra.mxu0 %v10186_v53  ;;  %6823 = vmatpush1.bf16.msra.mxu1 %v10187_v30  ;;  %v10194_v53 = vld [vmem:[#allocation52_spill] sm:$0xff]  ;;  %v10195_v30 = vld [vmem:[#allocation53_spill] sm:$0xff] }
 0x8a7   :  { %6825 = vmatprep.subr.bf16.mxu0 %v10188_v46  ;;  %6857 = vmatprep.subr.bf16.mxu1 %v10189_v62  ;;  %v10196_v62 = vld [vmem:[#allocation54_spill] sm:$0xff]  ;;  %v10199_v46 = vld [vmem:[#allocation57_spill] sm:$0xff] }
 0x8a9   :  { %4307 = vmatmul.mubr.f32.vlgmr.msra.gmra.mrb[38].mxu0 %v9132_v17  ;;  %4378 = vmatmul.mubr.f32.vlgmr.msra.gmra.mrb[38].mxu1 %v9132_v17  ;;  %v10200_v17 = vld [vmem:[#allocation58_spill] sm:$0xff] }
 0x8aa   :  { %6827 = vmatpush1.bf16.msra.mxu0 %v10192_v43  ;;  %6859 = vmatpush1.bf16.msra.mxu1 %v10193_v23  ;;  %v10201_v43 = vld [vmem:[#allocation59_spill] sm:$0xff]  ;;  %v10202_v23 = vld [vmem:[#allocation60_spill] sm:$0xff] }
 0x8ab   :  { %6829 = vmatprep.subr.bf16.mxu0 %v10194_v53  ;;  %6861 = vmatprep.subr.bf16.mxu1 %v10195_v30  ;;  %v10203_v53 = vld [vmem:[#allocation61_spill] sm:$0xff]  ;;  %v10204_v30 = vld [vmem:[#allocation62_spill] sm:$0xff] }
 0x8ac   :  { %4488 = vmatprep.mubr.f32.mxu0 %v9736_v47  ;;  %4559 = vmatprep.mubr.f32.mxu1 %v9736_v47 }
 0x8ae   :  { %6831 = vmatpush1.bf16.msra.mxu0 %v10196_v62  ;;  %6863 = vmatpush1.bf16.msra.mxu1 %v10197_v50  ;;  %v10207_v62 = vld [vmem:[#allocation65_spill] sm:$0xff]  ;;  %v10208_v50 = vld [vmem:[#allocation66_spill] sm:$0xff] }
 0x8af   :  { %6833 = vmatprep.subr.bf16.mxu0 %v10198_v21  ;;  %6865 = vmatprep.subr.bf16.mxu1 %v10199_v46  ;;  %v10209_v21 = vld [vmem:[#allocation67_spill] sm:$0xff]  ;;  %v10210_v46 = vld [vmem:[#allocation68_spill] sm:$0xff] }
 0x8b2   :  { %6835 = vmatpush1.bf16.msra.mxu0 %v10200_v17  ;;  %6867 = vmatpush1.bf16.msra.mxu1 %v10201_v43  ;;  %v10211_v17 = vld [vmem:[#allocation69_spill] sm:$0xff]  ;;  %v10212_v43 = vld [vmem:[#allocation70_spill] sm:$0xff] }
 0x8b3   :  { %6837 = vmatprep.subr.bf16.mxu0 %v10202_v23  ;;  %6869 = vmatprep.subr.bf16.mxu1 %v10203_v53  ;;  %v10213_v23 = vld [vmem:[#allocation71_spill] sm:$0xff]  ;;  %v10214_v53 = vld [vmem:[#allocation72_spill] sm:$0xff] }
 0x8b6   :  { %6839 = vmatpush1.bf16.msra.mxu0 %v10204_v30  ;;  %6871 = vmatpush1.bf16.msra.mxu1 %v10205_v5  ;;  %v10215_v30 = vld [vmem:[#allocation73_spill] sm:$0xff]  ;;  %v10216_v5 = vld [vmem:[#allocation74_spill] sm:$0xff] }
 0x8b7   :  { %6841 = vmatprep.subr.bf16.mxu0 %v10206_v59  ;;  %6873 = vmatprep.subr.bf16.mxu1 %v10207_v62  ;;  %v10217_v59 = vld [vmem:[#allocation75_spill] sm:$0xff]  ;;  %v10218_v62 = vld [vmem:[#allocation76_spill] sm:$0xff] }
 0x8ba   :  { %6843 = vmatpush1.bf16.msra.mxu0 %v10208_v50  ;;  %6875 = vmatpush1.bf16.msra.mxu1 %v10209_v21  ;;  %v10219_v50 = vld [vmem:[#allocation77_spill] sm:$0xff]  ;;  %v10220_v21 = vld [vmem:[#allocation78_spill] sm:$0xff] }
 0x8bb   :  { %6845 = vmatprep.subr.bf16.mxu0 %v10210_v46  ;;  %6877 = vmatprep.subr.bf16.mxu1 %v10211_v17  ;;  %v10221_v46 = vld [vmem:[#allocation79_spill] sm:$0xff]  ;;  %v10222_v17 = vld [vmem:[#allocation80_spill] sm:$0xff] }
 0x8be   :  { %6847 = vmatpush1.bf16.msra.mxu0 %v10212_v43  ;;  %6879 = vmatpush1.bf16.msra.mxu1 %v10213_v23  ;;  %v10223_v43 = vld [vmem:[#allocation81_spill] sm:$0xff] }
 0x8bf   :  { %6849 = vmatprep.subr.bf16.mxu0 %v10214_v53  ;;  %6881 = vmatprep.subr.bf16.mxu1 %v10215_v30 }
 0x8c2   :  { %6851 = vmatpush1.bf16.msra.mxu0 %v10216_v5  ;;  %6883 = vmatpush1.bf16.msra.mxu1 %v10217_v59 }
 0x8c3   :  { %6853 = vmatprep.subr.bf16.mxu0 %v10218_v62  ;;  %6885 = vmatprep.subr.bf16.mxu1 %v10219_v50  ;;  %v10226_v50 = vld [vmem:[#allocation134_spill] sm:$0xff] }
 0x8c6   :  { %6855 = vmatpush1.bf16.msra.mxu0 %v10220_v21  ;;  %6887 = vmatpush1.bf16.msra.mxu1 %v10221_v46  ;;  %v10227_v46 = vld [vmem:[#allocation135_spill] sm:$0xff] }
 0x8c7   :  { %6889 = vmatprep.subr.bf16.mxu0 %v10222_v17  ;;  %6921 = vmatprep.subr.bf16.mxu1 %v10223_v43 }
 0x95c   :  { %v4125_v23 = vpop.f32.mrb[36].mxu0  ;;  %v4196_v53 = vpop.f32.mrb[36].mxu1 }
 0x95d   :  { %v4201_v30 = vadd.f32 %v4125_v23, %v10224_v4  ;;  %v4127_v15 = vpop.f32.mrb[37].mxu0  ;;  %v4198_v5 = vpop.f32.mrb[37].mxu1  ;;  %v4203_v19 = vadd.f32 %v4196_v53, %v10227_v46 }
 0x95e   :  { %v4202_v59 = vadd.f32 %v4127_v15, %v10225_v42  ;;  %v4204_v21 = vadd.f32 %v4198_v5, %v10226_v50 }
 0x95f   :  { %v5337_v37 = vmul.f32 -1.442695, %v4201_v30 }
 0x960   :  { %v5338_v62 = vmul.f32 -1.442695, %v4202_v59  ;;  %v5339_v18 = vmul.f32 -1.442695, %v4204_v21 }
 0x961   :  { %7407 = vpow2.f32 %v5337_v37 }
 0x962   :  { %7409 = vpow2.f32 %v5338_v62 }
 0x963   :  { %7411 = vpow2.f32 %v5339_v18 }
 0x964   :  { %7413 = vtanh.f32 %v4203_v19 }
 0x96b   :  { %v7408_v17 = vpop.eup %7407 }
 0x96c   :  { %v7410_v24 = vpop.eup %7409  ;;  %v4208_v43 = vadd.f32 1.0, %v7408_v17 }
 0x96d   :  { %v4214_v20 = vadd.f32 1.0, %v7410_v24  ;;  %v7412_v23 = vpop.eup %7411  ;;  %v10228_v24 = vcombine.high %v10160_v34, %v10161_v16 }
 0x96e   :  { %7415 = vrcp.f32 %v4208_v43  ;;  %v7414_v4 = vpop.eup %7413  ;;  %v4221_v37 = vadd.f32 1.0, %v7412_v23 }
 0x96f   :  { %7417 = vrcp.f32 %v4214_v20 }
 0x970   :  { %7419 = vrcp.f32 %v4221_v37 }
 0x978   :  { %v7416_v15 = vpop.eup %7415 }
 0x979   :  { %v7418_v30 = vpop.eup %7417  ;;  %v4225_v59 = vmul.f32 %v7416_v15, %v7414_v4  ;;  %v10229_v4 = vcombine.high %v10163_v63, %v10164_v26 }
 0x97a   :  { %v4224_v62 = vmul.f32 %v7418_v30, %v9037_v33 }
 0x97c   :  { %v4226_v5 = vadd.f32 %v4225_v59, %v4224_v62  ;;  %v4308_v21 = vpop.f32.mrb[38].mxu0  ;;  %v4379_v50 = vpop.f32.mrb[38].mxu1 }
 0x97d   :  { %v4310_v53 = vpop.f32.mrb[39].mxu0  ;;  %v4381_v46 = vpop.f32.mrb[39].mxu1 }
 0x97e   :  { %v4388_v17 = vcombine.low %v4308_v21, %v4310_v53  ;;  %v4389_v18 = vcombine.low %v4379_v50, %v4381_v46  ;;  %7421 = vtanh.f32 %v4226_v5  ;;  %v9178_v20 = vsel %vm4234_vm15, %v4226_v5, %v9037_v33  ;;  %v7420_v46 = vpop.eup %7419 }
 0x980   :  { %v4392_v19 = vadd.f32 %v4388_v17, %v10228_v24  ;;  %v4393_v43 = vadd.f32 %v4389_v18, %v10229_v4  ;;  %v9213_v18 = vpop.permute.xlu1 %4739 }
 0x981   :  { %vm4741_vm0 = vcmp.eq.s32.totalorder %v9213_v18, 1 }
 0x982   :  { %v5340_v23 = vmul.f32 -1.442695, %v4392_v19  ;;  %v4401_v15 = vrot.slane %v4392_v19, 4  ;;  %v4411_v59 = vrot.slane %v4393_v43, 4 }
 0x984   :  { %7423 = vpow2.f32 %v5340_v23  ;;  %v5341_v30 = vmul.f32 -1.442695, %v4401_v15  ;;  %v5342_v34 = vmul.f32 -1.442695, %v4411_v59  ;;  %v10232_v15 = vld [vmem:[#allocation24_spill] sm:$0xff] }
 0x985   :  { %v10240_v59 = vld [vmem:[#allocation32_spill] sm:$0xff] }
 0x986   :  { %7425 = vpow2.f32 %v5341_v30  ;;  %v10233_v30 = vld [vmem:[#allocation25_spill] sm:$0xff] }
 0x987   :  { %7427 = vtanh.f32 %v4393_v43 }
 0x988   :  { %v7422_v50 = vpop.eup %7421  ;;  %7429 = vpow2.f32 %v5342_v34  ;;  %v10242_v34 = vld [vmem:[#allocation34_spill] sm:$0xff] }
 0x989   :  { %v4228_v37 = vmul.f32 %v7422_v50, %v7420_v46  ;;  %v10234_v46 = vld [vmem:[#allocation26_spill] sm:$0xff]  ;;  %v10239_v50 = vld [vmem:[#allocation31_spill] sm:$0xff] }
 0x98b   :  { %v9189_v33 = vsel %vm4234_vm15, %v4228_v37, %v9048_v2  ;;  %v10241_v37 = vld [vmem:[#allocation33_spill] sm:$0xff] }
 0x98c   :  { %4489 = vmatmul.mubr.f32.vlgmr.msra.gmra.mrb[40].mxu0 %v9189_v33  ;;  %4560 = vmatmul.mubr.f32.vlgmr.msra.gmra.mrb[40].mxu1 %v9189_v33 }
 0x98d   :  { %6891 = vmatpush1.bf16.msra.mxu0 %v9826_v3  ;;  %6923 = vmatpush1.bf16.msra.mxu1 %v9827_v7 }
 0x98e   :  { %v7424_v16 = vpop.eup %7423  ;;  %6893 = vmatprep.subr.bf16.mxu0 %v9828_v0  ;;  %6925 = vmatprep.subr.bf16.mxu1 %v9829_v14 }
 0x98f   :  { %v4397_v63 = vadd.f32 1.0, %v7424_v16  ;;  %4630 = vmatprep.mubr.f32.mxu0 %v9736_v47  ;;  %4701 = vmatprep.mubr.f32.mxu1 %v9736_v47  ;;  %v10243_v16 = vld [vmem:[#allocation35_spill] sm:$0xff] }
 0x990   :  { %v7426_v26 = vpop.eup %7425 }
 0x991   :  { %7431 = vrcp.f32 %v4397_v63  ;;  %v4406_v2 = vadd.f32 1.0, %v7426_v26  ;;  %6895 = vmatpush1.bf16.msra.mxu0 %v9830_v61  ;;  %6927 = vmatpush1.bf16.msra.mxu1 %v9895_v44  ;;  %v7428_v45 = vpop.eup %7427  ;;  %v10244_v63 = vld [vmem:[#allocation36_spill] sm:$0xff]  ;;  %v10245_v26 = vld [vmem:[#allocation37_spill] sm:$0xff] }
 0x992   :  { %6897 = vmatprep.subr.bf16.mxu0 %v9896_v41  ;;  %6929 = vmatprep.subr.bf16.mxu1 %v9897_v49  ;;  %v7430_v62 = vpop.eup %7429 }
 0x993   :  { %7433 = vrcp.f32 %v4406_v2  ;;  %v4416_v17 = vadd.f32 1.0, %v7430_v62  ;;  %v10246_v2 = vld [vmem:[#allocation38_spill] sm:$0xff]  ;;  %v10248_v62 = vld [vmem:[#allocation40_spill] sm:$0xff] }
 0x995   :  { %6899 = vmatpush1.bf16.msra.mxu0 %v9898_v52  ;;  %6931 = vmatpush1.bf16.msra.mxu1 %v9960_v36  ;;  %7435 = vrcp.f32 %v4416_v17  ;;  %v10252_v17 = vld [vmem:[#allocation44_spill] sm:$0xff] }
 0x996   :  { %6901 = vmatprep.subr.bf16.mxu0 %v9961_v60  ;;  %6933 = vmatprep.subr.bf16.mxu1 %v9962_v32 }
 0x999   :  { %6903 = vmatpush1.bf16.msra.mxu0 %v9963_v58  ;;  %6935 = vmatpush1.bf16.msra.mxu1 %v9964_v9 }
 0x99a   :  { %6905 = vmatprep.subr.bf16.mxu0 %v9965_v28  ;;  %6937 = vmatprep.subr.bf16.mxu1 %v9966_v29 }
 0x99b   :  { %v7432_v5 = vpop.eup %7431 }
 0x99c   :  { %v4420_v21 = vmul.f32 %v7432_v5, %v7428_v45  ;;  %v10247_v45 = vld [vmem:[#allocation39_spill] sm:$0xff]  ;;  %v10249_v5 = vld [vmem:[#allocation41_spill] sm:$0xff] }
 0x99d   :  { %v7434_v53 = vpop.eup %7433  ;;  %6907 = vmatpush1.bf16.msra.mxu0 %v9842_v48  ;;  %6939 = vmatpush1.bf16.msra.mxu1 %v9906_v13 }
 0x99e   :  { %v4419_v24 = vmul.f32 %v7434_v53, %v9085_v8  ;;  %6909 = vmatprep.subr.bf16.mxu0 %v9844_v11  ;;  %6941 = vmatprep.subr.bf16.mxu1 %v9907_v31  ;;  %v10251_v53 = vld [vmem:[#allocation43_spill] sm:$0xff] }
 0x99f   :  { %v7436_v43 = vpop.eup %7435 }
 0x9a0   :  { %v4421_v19 = vadd.f32 %v4420_v21, %v4419_v24  ;;  %v10250_v21 = vld [vmem:[#allocation42_spill] sm:$0xff]  ;;  %v10253_v24 = vld [vmem:[#allocation45_spill] sm:$0xff] }
 0x9a1   :  { %6911 = vmatpush1.bf16.msra.mxu0 %v9908_v6  ;;  %6943 = vmatpush1.bf16.msra.mxu1 %v9909_v38 }
 0x9a2   :  { %6913 = vmatprep.subr.bf16.mxu0 %v9910_v25  ;;  %6945 = vmatprep.subr.bf16.mxu1 %v9911_v22  ;;  %7437 = vtanh.f32 %v4421_v19  ;;  %v9226_v4 = vsel %vm4741_vm0, %v4421_v19, %v9085_v8  ;;  %v10254_v19 = vld [vmem:[#allocation46_spill] sm:$0xff] }
 0x9a5   :  { %6915 = vmatpush1.bf16.msra.mxu0 %v9850_v10  ;;  %6947 = vmatpush1.bf16.msra.mxu1 %v9851_v40 }
 0x9a6   :  { %6917 = vmatprep.subr.bf16.mxu0 %v9852_v39  ;;  %6949 = vmatprep.subr.bf16.mxu1 %v9912_v12 }
 0x9a9   :  { %6919 = vmatpush1.bf16.msra.mxu0 %v9854_v35  ;;  %6951 = vmatpush1.bf16.msra.mxu1 %v9855_v56 }
 0x9aa   :  { %6953 = vmatprep.subr.bf16.mxu0 %v9856_v27  ;;  %6985 = vmatprep.subr.bf16.mxu1 %v9857_v1  ;;  %v10230_v27 = vld [vmem:[#allocation22_spill] sm:$0xff]  ;;  %v10231_v1 = vld [vmem:[#allocation23_spill] sm:$0xff] }
 0x9ac   :  { %v7438_v23 = vpop.eup %7437 }
 0x9ad   :  { %v4423_v8 = vmul.f32 %v7438_v23, %v7436_v43  ;;  %v10255_v43 = vld [vmem:[#allocation47_spill] sm:$0xff]  ;;  %v10256_v23 = vld [vmem:[#allocation48_spill] sm:$0xff] }
 0x9af   :  { %4631 = vmatmul.mubr.f32.vlgmr.msra.gmra.mrb[40].mxu0 %v4423_v8  ;;  %4702 = vmatmul.mubr.f32.vlgmr.msra.gmra.mrb[40].mxu1 %v4423_v8 }
 0x9b0   :  { %6955 = vmatpush1.bf16.msra.mxu0 %v7798_v51  ;;  %6987 = vmatpush1.bf16.msra.mxu1 %v7801_v54  ;;  %v10235_v51 = vld [vmem:[#allocation27_spill] sm:$0xff]  ;;  %v10236_v54 = vld [vmem:[#allocation28_spill] sm:$0xff] }
 0x9b1   :  { %6957 = vmatprep.subr.bf16.mxu0 %v7803_v55  ;;  %6989 = vmatprep.subr.bf16.mxu1 %v7806_v57  ;;  %v10237_v55 = vld [vmem:[#allocation29_spill] sm:$0xff]  ;;  %v10238_v57 = vld [vmem:[#allocation30_spill] sm:$0xff] }
 0x9b2   :  { %4813 = vmatprep.mubr.f32.mxu0 %v9736_v47  ;;  %4884 = vmatprep.mubr.f32.mxu1 %v9736_v47 }
 0x9b4   :  { %6959 = vmatpush1.bf16.msra.mxu0 %v10230_v27  ;;  %6991 = vmatpush1.bf16.msra.mxu1 %v10231_v1  ;;  %v10257_v27 = vld [vmem:[#allocation49_spill] sm:$0xff]  ;;  %v10258_v1 = vld [vmem:[#allocation83_spill] sm:$0xff] }
 0x9b5   :  { %6961 = vmatprep.subr.bf16.mxu0 %v10232_v15  ;;  %6993 = vmatprep.subr.bf16.mxu1 %v10233_v30  ;;  %v9273_v15 = vsel %vm4741_vm0, %v4423_v8, %v10258_v1  ;;  %v10259_v30 = vld [vmem:[#allocation50_spill] sm:$0xff]  ;;  %v10264_v8 = vld [vmem:[#allocation55_spill] sm:$0xff]  ;;  %v10285_v1 = vld [vmem:[#allocation76_spill] sm:$0xff] }
 0x9b8   :  { %6963 = vmatpush1.bf16.msra.mxu0 %v10234_v46  ;;  %6995 = vmatpush1.bf16.msra.mxu1 %v10235_v51  ;;  %v10260_v46 = vld [vmem:[#allocation51_spill] sm:$0xff]  ;;  %v10261_v51 = vld [vmem:[#allocation52_spill] sm:$0xff] }
 0x9b9   :  { %6965 = vmatprep.subr.bf16.mxu0 %v10236_v54  ;;  %6997 = vmatprep.subr.bf16.mxu1 %v10237_v55  ;;  %v10262_v54 = vld [vmem:[#allocation53_spill] sm:$0xff]  ;;  %v10263_v55 = vld [vmem:[#allocation54_spill] sm:$0xff] }
 0x9bc   :  { %6967 = vmatpush1.bf16.msra.mxu0 %v10238_v57  ;;  %6999 = vmatpush1.bf16.msra.mxu1 %v10239_v50  ;;  %v10265_v57 = vld [vmem:[#allocation56_spill] sm:$0xff]  ;;  %v10266_v50 = vld [vmem:[#allocation57_spill] sm:$0xff] }
 0x9bd   :  { %6969 = vmatprep.subr.bf16.mxu0 %v10240_v59  ;;  %7001 = vmatprep.subr.bf16.mxu1 %v10241_v37  ;;  %v10267_v59 = vld [vmem:[#allocation58_spill] sm:$0xff]  ;;  %v10268_v37 = vld [vmem:[#allocation59_spill] sm:$0xff] }
 0x9c0   :  { %6971 = vmatpush1.bf16.msra.mxu0 %v10242_v34  ;;  %7003 = vmatpush1.bf16.msra.mxu1 %v10243_v16  ;;  %v10269_v34 = vld [vmem:[#allocation60_spill] sm:$0xff]  ;;  %v10270_v16 = vld [vmem:[#allocation61_spill] sm:$0xff] }
 0x9c1   :  { %6973 = vmatprep.subr.bf16.mxu0 %v10244_v63  ;;  %7005 = vmatprep.subr.bf16.mxu1 %v10245_v26  ;;  %v10271_v63 = vld [vmem:[#allocation62_spill] sm:$0xff]  ;;  %v10272_v26 = vld [vmem:[#allocation63_spill] sm:$0xff] }
 0x9c4   :  { %6975 = vmatpush1.bf16.msra.mxu0 %v10246_v2  ;;  %7007 = vmatpush1.bf16.msra.mxu1 %v10247_v45  ;;  %v10273_v2 = vld [vmem:[#allocation64_spill] sm:$0xff]  ;;  %v10274_v45 = vld [vmem:[#allocation65_spill] sm:$0xff] }
 0x9c5   :  { %6977 = vmatprep.subr.bf16.mxu0 %v10248_v62  ;;  %7009 = vmatprep.subr.bf16.mxu1 %v10249_v5  ;;  %v10275_v62 = vld [vmem:[#allocation66_spill] sm:$0xff]  ;;  %v10276_v5 = vld [vmem:[#allocation67_spill] sm:$0xff] }
 0x9c8   :  { %6979 = vmatpush1.bf16.msra.mxu0 %v10250_v21  ;;  %7011 = vmatpush1.bf16.msra.mxu1 %v10251_v53  ;;  %v10277_v21 = vld [vmem:[#allocation68_spill] sm:$0xff]  ;;  %v10278_v53 = vld [vmem:[#allocation69_spill] sm:$0xff] }
 0x9c9   :  { %6981 = vmatprep.subr.bf16.mxu0 %v10252_v17  ;;  %7013 = vmatprep.subr.bf16.mxu1 %v10253_v24  ;;  %v10279_v17 = vld [vmem:[#allocation70_spill] sm:$0xff]  ;;  %v10280_v24 = vld [vmem:[#allocation71_spill] sm:$0xff] }
 0x9cc   :  { %6983 = vmatpush1.bf16.msra.mxu0 %v10254_v19  ;;  %7015 = vmatpush1.bf16.msra.mxu1 %v10255_v43  ;;  %v10281_v19 = vld [vmem:[#allocation72_spill] sm:$0xff]  ;;  %v10282_v43 = vld [vmem:[#allocation73_spill] sm:$0xff] }
 0x9cd   :  { %7017 = vmatprep.subr.bf16.mxu0 %v10256_v23  ;;  %7049 = vmatprep.subr.bf16.mxu1 %v10257_v27  ;;  %v10283_v23 = vld [vmem:[#allocation74_spill] sm:$0xff]  ;;  %v10284_v27 = vld [vmem:[#allocation75_spill] sm:$0xff] }
 0x9cf   :  { %4814 = vmatmul.mubr.f32.vlgmr.msra.gmra.mrb[42].mxu0 %v9273_v15  ;;  %4885 = vmatmul.mubr.f32.vlgmr.msra.gmra.mrb[42].mxu1 %v9273_v15 }
 0x9d0   :  { %7019 = vmatpush1.bf16.msra.mxu0 %v10259_v30  ;;  %7051 = vmatpush1.bf16.msra.mxu1 %v10260_v46  ;;  %v10286_v30 = vld [vmem:[#allocation77_spill] sm:$0xff]  ;;  %v10287_v46 = vld [vmem:[#allocation78_spill] sm:$0xff] }
 0x9d1   :  { %7021 = vmatprep.subr.bf16.mxu0 %v10261_v51  ;;  %7053 = vmatprep.subr.bf16.mxu1 %v10262_v54  ;;  %v10288_v51 = vld [vmem:[#allocation79_spill] sm:$0xff]  ;;  %v10289_v54 = vld [vmem:[#allocation80_spill] sm:$0xff] }
 0x9d2   :  { %4995 = vmatprep.mubr.f32.mxu0 %v9736_v47  ;;  %5066 = vmatprep.mubr.f32.mxu1 %v9736_v47 }
 0x9d4   :  { %7023 = vmatpush1.bf16.msra.mxu0 %v10263_v55  ;;  %7055 = vmatpush1.bf16.msra.mxu1 %v10264_v8  ;;  %v10290_v55 = vld [vmem:[#allocation81_spill] sm:$0xff] }
 0x9d5   :  { %7025 = vmatprep.subr.bf16.mxu0 %v10265_v57  ;;  %7057 = vmatprep.subr.bf16.mxu1 %v10266_v50  ;;  %v10291_v50 = vld [vmem:[#allocation112_spill] sm:$0xff] }
 0x9d8   :  { %7027 = vmatpush1.bf16.msra.mxu0 %v10267_v59  ;;  %7059 = vmatpush1.bf16.msra.mxu1 %v10268_v37 }
 0x9d9   :  { %7029 = vmatprep.subr.bf16.mxu0 %v10269_v34  ;;  %7061 = vmatprep.subr.bf16.mxu1 %v10270_v16 }
 0x9dc   :  { %7031 = vmatpush1.bf16.msra.mxu0 %v10271_v63  ;;  %7063 = vmatpush1.bf16.msra.mxu1 %v10272_v26 }
 0x9dd   :  { %7033 = vmatprep.subr.bf16.mxu0 %v10273_v2  ;;  %7065 = vmatprep.subr.bf16.mxu1 %v10274_v45  ;;  %v10292_v2 = vld [vmem:[#allocation134_spill] sm:$0xff] }
 0x9e0   :  { %7035 = vmatpush1.bf16.msra.mxu0 %v10275_v62  ;;  %7067 = vmatpush1.bf16.msra.mxu1 %v10276_v5  ;;  %v10293_v5 = vld [vmem:[#allocation135_spill] sm:$0xff] }
 0x9e1   :  { %7037 = vmatprep.subr.bf16.mxu0 %v10277_v21  ;;  %7069 = vmatprep.subr.bf16.mxu1 %v10278_v53 }
 0x9e4   :  { %7039 = vmatpush1.bf16.msra.mxu0 %v10279_v17  ;;  %7071 = vmatpush1.bf16.msra.mxu1 %v10280_v24 }
 0x9e5   :  { %7041 = vmatprep.subr.bf16.mxu0 %v10281_v19  ;;  %7073 = vmatprep.subr.bf16.mxu1 %v10282_v43 }
 0x9e8   :  { %7043 = vmatpush1.bf16.msra.mxu0 %v10283_v23  ;;  %7075 = vmatpush1.bf16.msra.mxu1 %v10284_v27 }
 0x9e9   :  { %7045 = vmatprep.subr.bf16.mxu0 %v10285_v1  ;;  %7077 = vmatprep.subr.bf16.mxu1 %v10286_v30 }
 0x9ec   :  { %7047 = vmatpush1.bf16.msra.mxu0 %v10287_v46  ;;  %7079 = vmatpush1.bf16.msra.mxu1 %v10288_v51 }
 0x9ed   :  { %7081 = vmatprep.subr.bf16.mxu0 %v10289_v54  ;;  %7113 = vmatprep.subr.bf16.mxu1 %v10290_v55 }
 0xa82   :  { %v4632_v8 = vpop.f32.mrb[40].mxu0  ;;  %v4703_v57 = vpop.f32.mrb[40].mxu1 }
 0xa83   :  { %v4708_v59 = vadd.f32 %v4632_v8, %v10291_v50  ;;  %v4634_v37 = vpop.f32.mrb[41].mxu0  ;;  %v4705_v34 = vpop.f32.mrb[41].mxu1  ;;  %v4710_v21 = vadd.f32 %v4703_v57, %v10293_v5 }
 0xa84   :  { %v4709_v16 = vadd.f32 %v4634_v37, %v10225_v42  ;;  %v4711_v45 = vadd.f32 %v4705_v34, %v10292_v2 }
 0xa85   :  { %v5343_v63 = vmul.f32 -1.442695, %v4708_v59 }
 0xa86   :  { %v5344_v26 = vmul.f32 -1.442695, %v4709_v16  ;;  %v5345_v62 = vmul.f32 -1.442695, %v4711_v45 }
 0xa87   :  { %7439 = vpow2.f32 %v5343_v63  ;;  %v10294_v63 = vld [vmem:[#allocation129_spill] sm:$0xff] }
 0xa88   :  { %7441 = vpow2.f32 %v5344_v26  ;;  %v10295_v26 = vld [vmem:[#allocation130_spill] sm:$0xff] }
 0xa89   :  { %7443 = vpow2.f32 %v5345_v62  ;;  %v10296_v45 = vcombine.low %v10294_v63, %v10295_v26 }
 0xa8a   :  { %7445 = vtanh.f32 %v4710_v21  ;;  %v10297_v21 = vld [vmem:[#allocation131_spill] sm:$0xff] }
 0xa91   :  { %v7440_v53 = vpop.eup %7439 }
 0xa92   :  { %v7442_v17 = vpop.eup %7441  ;;  %v4715_v24 = vadd.f32 1.0, %v7440_v53  ;;  %v10298_v53 = vld [vmem:[#allocation132_spill] sm:$0xff] }
 0xa93   :  { %v4721_v19 = vadd.f32 1.0, %v7442_v17  ;;  %v7444_v43 = vpop.eup %7443  ;;  %v10299_v17 = vcombine.low %v10297_v21, %v10298_v53 }
 0xa94   :  { %7447 = vrcp.f32 %v4715_v24  ;;  %v7446_v23 = vpop.eup %7445  ;;  %v4728_v46 = vadd.f32 1.0, %v7444_v43 }
 0xa95   :  { %7449 = vrcp.f32 %v4721_v19 }
 0xa96   :  { %7451 = vrcp.f32 %v4728_v46 }
 0xa9e   :  { %v7448_v27 = vpop.eup %7447 }
 0xa9f   :  { %v7450_v1 = vpop.eup %7449  ;;  %v4732_v30 = vmul.f32 %v7448_v27, %v7446_v23 }
 0xaa0   :  { %v4731_v51 = vmul.f32 %v7450_v1, %v9178_v20  ;;  %v7452_v27 = vpop.eup %7451 }
 0xaa2   :  { %v4733_v54 = vadd.f32 %v4732_v30, %v4731_v51  ;;  %v4815_v55 = vpop.f32.mrb[42].mxu0  ;;  %v4886_v8 = vpop.f32.mrb[42].mxu1 }
 0xaa3   :  { %v4817_v57 = vpop.f32.mrb[43].mxu0  ;;  %v4888_v59 = vpop.f32.mrb[43].mxu1 }
 0xaa4   :  { %v4895_v37 = vcombine.low %v4815_v55, %v4817_v57  ;;  %v4896_v34 = vcombine.low %v4886_v8, %v4888_v59  ;;  %7453 = vtanh.f32 %v4733_v54  ;;  %v9319_v16 = vsel %vm4741_vm0, %v4733_v54, %v9178_v20 }
 0xaa6   :  { %v4899_v62 = vadd.f32 %v4895_v37, %v10296_v45  ;;  %v4900_v24 = vadd.f32 %v4896_v34, %v10299_v17 }
 0xaa8   :  { %v5346_v19 = vmul.f32 -1.442695, %v4899_v62  ;;  %v4908_v43 = vrot.slane %v4899_v62, 4  ;;  %v4918_v30 = vrot.slane %v4900_v24, 4 }
 0xaaa   :  { %7455 = vpow2.f32 %v5346_v19  ;;  %v5347_v23 = vmul.f32 -1.442695, %v4908_v43  ;;  %v5348_v51 = vmul.f32 -1.442695, %v4918_v30 }
 0xaac   :  { %7457 = vpow2.f32 %v5347_v23 }
 0xaad   :  { %7459 = vtanh.f32 %v4900_v24 }
 0xaae   :  { %v7454_v1 = vpop.eup %7453  ;;  %7461 = vpow2.f32 %v5348_v51 }
 0xaaf   :  { %v4735_v46 = vmul.f32 %v7454_v1, %v7452_v27 }
 0xab1   :  { %v9330_v20 = vsel %vm4741_vm0, %v4735_v46, %v9189_v33 }
 0xab2   :  { %4996 = vmatmul.mubr.f32.vlgmr.msra.gmra.mrb[44].mxu0 %v9330_v20  ;;  %5067 = vmatmul.mubr.f32.vlgmr.msra.gmra.mrb[44].mxu1 %v9330_v20 }
 0xab3   :  { %7083 = vmatpush1.bf16.msra.mxu0 %v9826_v3  ;;  %7115 = vmatpush1.bf16.msra.mxu1 %v9827_v7 }
 0xab4   :  { %v7456_v54 = vpop.eup %7455  ;;  %7085 = vmatprep.subr.bf16.mxu0 %v9828_v0  ;;  %7117 = vmatprep.subr.bf16.mxu1 %v9829_v14 }
 0xab5   :  { %v4904_v55 = vadd.f32 1.0, %v7456_v54  ;;  %5137 = vmatprep.mubr.f32.mxu0 %v9736_v47  ;;  %5208 = vmatprep.mubr.f32.mxu1 %v9736_v47 }
 0xab6   :  { %v7458_v33 = vpop.eup %7457 }
 0xab7   :  { %7463 = vrcp.f32 %v4904_v55  ;;  %v4913_v18 = vadd.f32 1.0, %v7458_v33  ;;  %7087 = vmatpush1.bf16.msra.mxu0 %v9830_v61  ;;  %7119 = vmatpush1.bf16.msra.mxu1 %v9895_v44  ;;  %v7460_v47 = vpop.eup %7459  ;;  %v9354_v44 = vpop.permute.xlu0 %5246 }
 0xab8   :  { %7089 = vmatprep.subr.bf16.mxu0 %v9896_v41  ;;  %7121 = vmatprep.subr.bf16.mxu1 %v9897_v49  ;;  %v7462_v3 = vpop.eup %7461  ;;  %vm5248_vm1 = vcmp.eq.s32.totalorder %v9354_v44, 1 }
 0xab9   :  { %7465 = vrcp.f32 %v4913_v18  ;;  %v4923_v61 = vadd.f32 1.0, %v7462_v3 }
 0xabb   :  { %7091 = vmatpush1.bf16.msra.mxu0 %v9898_v52  ;;  %7123 = vmatpush1.bf16.msra.mxu1 %v9960_v36  ;;  %7467 = vrcp.f32 %v4923_v61 }
 0xabc   :  { %7093 = vmatprep.subr.bf16.mxu0 %v9961_v60  ;;  %7125 = vmatprep.subr.bf16.mxu1 %v9962_v32 }
 0xabf   :  { %7095 = vmatpush1.bf16.msra.mxu0 %v9963_v58  ;;  %7127 = vmatpush1.bf16.msra.mxu1 %v9964_v9 }
 0xac0   :  { %7097 = vmatprep.subr.bf16.mxu0 %v9965_v28  ;;  %7129 = vmatprep.subr.bf16.mxu1 %v9966_v29 }
 0xac1   :  { %v7464_v7 = vpop.eup %7463 }
 0xac2   :  { %v4927_v0 = vmul.f32 %v7464_v7, %v7460_v47 }
 0xac3   :  { %v7466_v14 = vpop.eup %7465  ;;  %7099 = vmatpush1.bf16.msra.mxu0 %v9842_v48  ;;  %7131 = vmatpush1.bf16.msra.mxu1 %v9906_v13 }
 0xac4   :  { %v4926_v41 = vmul.f32 %v7466_v14, %v9226_v4  ;;  %7101 = vmatprep.subr.bf16.mxu0 %v9844_v11  ;;  %7133 = vmatprep.subr.bf16.mxu1 %v9907_v31 }
 0xac5   :  { %v7468_v11 = vpop.eup %7467 }
 0xac6   :  { %v4928_v49 = vadd.f32 %v4927_v0, %v4926_v41 }
 0xac7   :  { %7103 = vmatpush1.bf16.msra.mxu0 %v9908_v6  ;;  %7135 = vmatpush1.bf16.msra.mxu1 %v9909_v38 }
 0xac8   :  { %7105 = vmatprep.subr.bf16.mxu0 %v9910_v25  ;;  %7137 = vmatprep.subr.bf16.mxu1 %v9911_v22  ;;  %7469 = vtanh.f32 %v4928_v49  ;;  %v5250_v48 = vsel %vm5248_vm1, %v4928_v49, %v9226_v4 }
 0xac9   :  { %5256 = vst [vmem:[#allocation13] sm:$0xf] %v5250_v48 }
 0xacb   :  { %7107 = vmatpush1.bf16.msra.mxu0 %v9850_v10  ;;  %7139 = vmatpush1.bf16.msra.mxu1 %v9851_v40 }
 0xacc   :  { %7109 = vmatprep.subr.bf16.mxu0 %v9852_v39  ;;  %7141 = vmatprep.subr.bf16.mxu1 %v9912_v12 }
 0xacf   :  { %7111 = vmatpush1.bf16.msra.mxu0 %v9854_v35  ;;  %7143 = vmatpush1.bf16.msra.mxu1 %v9855_v56 }
 0xad2   :  { %v7470_v52 = vpop.eup %7469 }
 0xad3   :  { %v4930_v13 = vmul.f32 %v7470_v52, %v7468_v11 }
 0xad5   :  { %5138 = vmatmul.mubr.f32.vlgmr.msra.gmra.mrb[44].mxu0 %v4930_v13  ;;  %5209 = vmatmul.mubr.f32.vlgmr.msra.gmra.mrb[44].mxu1 %v4930_v13  ;;  %v5249_v38 = vsel %vm5248_vm1, %v4930_v13, %v9273_v15 }
 0xad6   :  { %5253 = vst [vmem:[#allocation12] sm:$0xf] %v5249_v38 }
 0xba8   :  { %v5139_v10 = vpop.f32.mrb[44].mxu0  ;;  %v5210_v40 = vpop.f32.mrb[44].mxu1 }
 0xba9   :  { %v5215_v39 = vadd.f32 %v5139_v10, %v10291_v50  ;;  %v5141_v31 = vpop.f32.mrb[45].mxu0  ;;  %v5212_v6 = vpop.f32.mrb[45].mxu1  ;;  %v5217_v36 = vadd.f32 %v5210_v40, %v10293_v5 }
 0xbaa   :  { %v5216_v35 = vadd.f32 %v5141_v31, %v10225_v42  ;;  %v5218_v22 = vadd.f32 %v5212_v6, %v10292_v2 }
 0xbab   :  { %v5349_v25 = vmul.f32 -1.442695, %v5215_v39 }
 0xbac   :  { %v5350_v56 = vmul.f32 -1.442695, %v5216_v35  ;;  %v5351_v12 = vmul.f32 -1.442695, %v5218_v22 }
 0xbad   :  { %7471 = vpow2.f32 %v5349_v25 }
 0xbae   :  { %7473 = vpow2.f32 %v5350_v56 }
 0xbaf   :  { %7475 = vpow2.f32 %v5351_v12 }
 0xbb0   :  { %7477 = vtanh.f32 %v5217_v36 }
 0xbb7   :  { %v7472_v60 = vpop.eup %7471 }
 0xbb8   :  { %v7474_v32 = vpop.eup %7473  ;;  %v5222_v58 = vadd.f32 1.0, %v7472_v60 }
 0xbb9   :  { %v5228_v9 = vadd.f32 1.0, %v7474_v32  ;;  %v7476_v28 = vpop.eup %7475 }
 0xbba   :  { %7479 = vrcp.f32 %v5222_v58  ;;  %v7478_v29 = vpop.eup %7477  ;;  %v5235_v50 = vadd.f32 1.0, %v7476_v28 }
 0xbbb   :  { %7481 = vrcp.f32 %v5228_v9 }
 0xbbc   :  { %7483 = vrcp.f32 %v5235_v50 }
 0xbc4   :  { %v7480_v42 = vpop.eup %7479 }
 0xbc5   :  { %v7482_v4 = vpop.eup %7481  ;;  %v5239_v15 = vmul.f32 %v7480_v42, %v7478_v29 }
 0xbc6   :  { %v5238_v8 = vmul.f32 %v7482_v4, %v9319_v16 }
 0xbc8   :  { %v5240_v2 = vadd.f32 %v5239_v15, %v5238_v8 }
 0xbca   :  { %7485 = vtanh.f32 %v5240_v2  ;;  %v5252_v5 = vsel %vm5248_vm1, %v5240_v2, %v9319_v16 }
 0xbcb   :  { %5258 = vst [vmem:[#allocation13 + $0x4] sm:$0xf] %v5252_v5 }
 0xbcc   :  { %7609 = shalt.err (!%p7606_p2)
}
 0xbcd   :  { %s7610_s17 = scalar_lea.hbm %s9426_s9, 128 }
 0xbce   :  { %p7611_p3 = scmp.ne.s32.totalorder %s9426_s9, %s7610_s17  ;;  %p7614_p4 = scmp.lt.u32.totalorder %s7610_s17, %s9426_s9 }
 0xbd0   :  { %p7616_p5 = pnand %p7614_p4, %p7611_p3 }
 0xbd2   :  { %7619 = shalt.err (!%p7616_p5)
}
 0xbd3   :  { %5282 = dma.vmem_to_hbm [thread:$0]  %s5277_s7, 128, %s9426_s9, [#allocation14], %s7657_s5, %s7657_s5, %s7658_s24   ;;  %v7484_v57 = vpop.eup %7483 }
 0xbd4   :  { %s7664_s25 = smov [#allocation12]   ;;  %v7486_v59 = vpop.eup %7485 }
 0xbd5   :  { %s5264_s27 = sshll.u32 %s7664_s25, 4  ;;  %v5242_v37 = vmul.f32 %v7486_v59, %v7484_v57  ;;  %s5265_s27 = int_to_ptr.vmem [resolvable:$true] %s5264_s27 }
 0xbd6   :  { %s7620_s28 = scalar_lea.vmem %s5265_s27, 128  ;;  %p7625_p7 = scmp.lt.s32.totalorder %s5265_s27, %s5265_s27 }
 0xbd7   :  { %v5251_v34 = vsel %vm5248_vm1, %v5242_v37, %v9330_v20  ;;  %p7621_p6 = scmp.ne.s32.totalorder %s5265_s27, %s7620_s28  ;;  %p7626_p8 = scmp.lt.s32.totalorder %s7620_s28, %s7620_s28 }
 0xbd8   :  { %5255 = vst [vmem:[#allocation12 + $0x4] sm:$0xf] %v5251_v34 }
 0xbd9   :  { %p7627_p9 = por %p7626_p8, %p7625_p7 }
 0xbdb   :  { %p7628_p10 = pnand %p7627_p9, %p7621_p6 }
 0xbdd   :  { %7631 = shalt.err (!%p7628_p10)
}
 0xbde   :  { %s7632_s11 = scalar_lea.hbm %s9425_s8, 128 }
 0xbdf   :  { %p7633_p11 = scmp.ne.s32.totalorder %s9425_s8, %s7632_s11  ;;  %p7636_p12 = scmp.lt.u32.totalorder %s7632_s11, %s9425_s8 }
 0xbe1   :  { %p7638_p13 = pnand %p7636_p12, %p7633_p11 }
 0xbe3   :  { %7641 = shalt.err (!%p7638_p13)
}
 0xbe4   :  { %5270 = dma.vmem_to_hbm [thread:$0]  %s5265_s27, 128, %s9425_s8, [#allocation5], %s7657_s5, %s7657_s5, %s7658_s24  }
 0xbe5   :  { %7648 = dma.done.wait [#allocation5], 128  }
 0xbe6   :  { %7649 = vsyncadd [#allocation5], 4294967168 }
 0xbe7   :  { %7650 = dma.done.wait [#allocation14], 128  }
 0xbe8   :  { %7651 = vsyncadd [#allocation14], 4294967168 }
 0xbe9   :  { %5289 = vsyncpa [#allocation4], 1 }
 0xbea   :  { %5290 = vsyncpa [#allocation7], 1 }
 0xbeb   :  { %5291 = vsyncpa [#allocation10], 1 }
 0xbec   :  { %5292 = vsyncpa [#allocation5], 1 }
 0xbed   :  { %5293 = vsyncpa [#allocation14], 1 }

</bundles_post_ra>
